<compile_context>
chip_gen: v5e
topology: v5e:2x2
jax: 0.10.0
libtpu: 0.0.40
codegen_flags: <defaults>
</compile_context>

<pallas_src>
import numpy as np
import jax
import jax.numpy as jnp
from jax.experimental import pallas as pl
from jax.experimental.pallas import tpu as pltpu

SEQ_LEN = 30
INPUT_SIZE = 300
K_PAD = 384                  # input features zero-padded to 3*128 lanes
N_HIDDEN = 5
HP = 8                       # hidden padded to 8 -> 8-aligned gate lane slices
GATE_W = 4 * HP              # 32
X_FEAT = 27                  # len(X[1])
FC1_IN = X_FEAT + N_HIDDEN   # 32
FC1_OUT = 32
FC2_OUT = 1


def lstmeaning_kernel(veckos_ref, x_ref, state_ref, wih_ref, whh_ref,
                      w1_ref, consts_ref, out_ref, xproj_scr):
    # ---- Hoisted input projection: one bf16 MXU matmul (f32 accumulate) for
    #      all 30 timesteps, with the combined LSTM bias (consts row 0) folded
    #      in.  The g-gate block of W_ih / W_hh / bias was pre-scaled by 2 on
    #      the host (tanh-via-sigmoid identity used in the loop below). ----
    xproj_scr[...] = (jnp.dot(veckos_ref[...], wih_ref[...],
                              preferred_element_type=jnp.float32)
                      + consts_ref[0:1, :])                     # (30, 32) f32

    # Loop-invariant hidden->gates weight rows (for the VPU matvec).
    whh_rows = [whh_ref[j:j + 1, :] for j in range(N_HIDDEN)]    # 5 x (1, 32)

    h = state_ref[0:1, :]                                        # (1, 8)
    c = state_ref[1:2, :]                                        # (1, 8)

    # ---- LSTM recurrence: fully unrolled, h/c live in vregs, no MXU and no
    #      scratch round-trips inside the loop; 2 EUP pushes per step. ----
    for t in range(SEQ_LEN):
        xt = xproj_scr[t:t + 1, :]                               # (1, 32)
        # h @ W_hh^T on the VPU: 5 broadcast multiply-adds (tree-summed).
        hh = ((whh_rows[0] * h[:, 0:1] + whh_rows[1] * h[:, 1:2])
              + (whh_rows[2] * h[:, 2:3] + whh_rows[3] * h[:, 3:4])
              + whh_rows[4] * h[:, 4:5])                         # (1, 32)
        gates = xt + hh                                          # (1, 32)
        sg = jax.nn.sigmoid(gates)                               # EUP push #1
        # PyTorch gate order i, f, g, o; slices are 8-lane aligned (padded).
        i_g = sg[:, 0 * HP:1 * HP]
        f_g = sg[:, 1 * HP:2 * HP]
        # g gate: tanh(z) = 2*sigmoid(2z) - 1 (g pre-act already scaled by 2).
        g_g = 2.0 * sg[:, 2 * HP:3 * HP] - 1.0                   # VPU FMA
        o_g = sg[:, 3 * HP:4 * HP]
        c = f_g * c + i_g * g_g
        h = o_g * jnp.tanh(c)                                    # EUP push #2
        # Padded lanes stay inert: gate pre-acts are 0 there (zero-padded
        # weights/bias) -> i/f/o = 0.5, g = 2*0.5 - 1 = 0, so with c0_pad = 0
        # c_pad stays 0 and h_pad = 0.5 * tanh(0) = 0.

    # ---- MLP head: fully1(cat(h, x)) -> Sigmoid -> fully2 ----
    # cat([h, x]) @ W1^T == h @ W1h + x @ W1x (split avoids an in-kernel concat).
    z1 = (jnp.dot(h, w1_ref[0:HP, :], preferred_element_type=jnp.float32)
          + jnp.dot(x_ref[...], w1_ref[HP:HP + X_FEAT, :],
                    preferred_element_type=jnp.float32)
          + consts_ref[1:2, :])                                  # (1, 32)
    a1 = jax.nn.sigmoid(z1)
    # fully2 as an elementwise mul + lane reduction (w2 packed as a row).
    z2 = (jnp.sum(a1 * consts_ref[2:3, :], axis=1, keepdims=True)
          + consts_ref[3:4, 0:1])                                # (1, 1)
    out_ref[...] = z2


def _pad_gate_cols(w_t, g_scale=1.0):
    """(in_dim, 4*N_HIDDEN) -> (in_dim, GATE_W): each gate block padded to HP,
    padded columns zero so padded lanes never carry signal.  The g-gate block
    is optionally pre-scaled (tanh-via-sigmoid identity)."""
    in_dim = w_t.shape[0]
    out = jnp.zeros((in_dim, GATE_W), jnp.float32)
    for k in range(4):
        blk = w_t[:, k * N_HIDDEN:(k + 1) * N_HIDDEN]
        if k == 2:
            blk = g_scale * blk
        out = out.at[:, k * HP:k * HP + N_HIDDEN].set(blk)
    return out


def lstmeaning_forward(veckos, x, h0, c0, params):
    """veckos: (30, 300); x: (1, X_FEAT); h0/c0: (1, N_HIDDEN). Returns (1, 1)."""
    (w_ih, w_hh, b_ih, b_hh, w1, b1, w2, b2) = params  # PyTorch conventions

    # ---- host-side packing (layout / dtype only) ----
    # Input-projection weights: gate-padded, g-block x2, K zero-padded to 384,
    # cast to bf16 for the MXU feed (accumulation stays f32 in-kernel).
    wih_p = _pad_gate_cols(w_ih.T, g_scale=2.0)                        # (300, 32)
    wih_p = jnp.pad(wih_p, ((0, K_PAD - INPUT_SIZE), (0, 0)))          # (384, 32)
    wih_bf = wih_p.astype(jnp.bfloat16)
    veckos_bf = jnp.pad(
        veckos, ((0, 0), (0, K_PAD - INPUT_SIZE))).astype(jnp.bfloat16)  # (30,384)

    whh_p = _pad_gate_cols(w_hh.T, g_scale=2.0)                        # (5, 32)
    bias_p = _pad_gate_cols((b_ih + b_hh).reshape(1, -1), g_scale=2.0)  # (1, 32)

    w1h_p = jnp.zeros((HP, FC1_OUT), jnp.float32).at[:N_HIDDEN, :].set(
        w1[:, :N_HIDDEN].T)                                 # (8, 32), pad rows 0
    w1x = w1[:, N_HIDDEN:].T                                # (27, 32)
    w1_p = jnp.concatenate([w1h_p, w1x], axis=0)            # (35, 32)

    b2_row = jnp.zeros((1, FC1_OUT), jnp.float32).at[0, 0].set(b2[0])
    consts = jnp.concatenate(
        [bias_p,                      # row 0: summed LSTM bias (gate-padded, g x2)
         b1.reshape(1, -1),           # row 1: fully1 bias
         w2.reshape(1, -1),           # row 2: fully2 weight as a row
         b2_row], axis=0)             # row 3: [b2, 0, ...]        -> (4, 32)

    pad_h = HP - N_HIDDEN
    state0 = jnp.concatenate(
        [jnp.pad(h0, ((0, 0), (0, pad_h))),
         jnp.pad(c0, ((0, 0), (0, pad_h)))], axis=0)        # (2, 8)

    vmem = pl.BlockSpec(memory_space=pltpu.MemorySpace.VMEM)
    out = pl.pallas_call(
        lstmeaning_kernel,
        out_shape=jax.ShapeDtypeStruct((1, FC2_OUT), jnp.float32),
        in_specs=[vmem] * 7,
        out_specs=vmem,
        scratch_shapes=[pltpu.VMEM((SEQ_LEN, GATE_W), jnp.float32)],
    )(veckos_bf, x, state0, wih_bf, whh_p, w1_p, consts)
    return out


def lstmeaning_reference(veckos, x, h0, c0, params, bf16_feed=False):
    """Pure-JAX reference mirroring PyTorch semantics.  With bf16_feed=True the
    input projection uses the same bf16-rounded operands as the kernel's MXU
    feed (everything else f32), isolating structural bugs from quantization."""
    (w_ih, w_hh, b_ih, b_hh, w1, b1, w2, b2) = params
    hp = jax.lax.Precision.HIGHEST
    if bf16_feed:
        veckos = veckos.astype(jnp.bfloat16).astype(jnp.float32)
        w_ih = w_ih.astype(jnp.bfloat16).astype(jnp.float32)
    h, c = h0, c0
    for t in range(SEQ_LEN):
        xt = veckos[t:t + 1, :]
        gates = (jnp.dot(xt, w_ih.T, precision=hp)
                 + jnp.dot(h, w_hh.T, precision=hp) + b_ih + b_hh)
        i = jax.nn.sigmoid(gates[:, 0 * N_HIDDEN:1 * N_HIDDEN])
        f = jax.nn.sigmoid(gates[:, 1 * N_HIDDEN:2 * N_HIDDEN])
        g = jnp.tanh(gates[:, 2 * N_HIDDEN:3 * N_HIDDEN])
        o = jax.nn.sigmoid(gates[:, 3 * N_HIDDEN:4 * N_HIDDEN])
        c = f * c + i * g
        h = o * jnp.tanh(c)
    comb = jnp.concatenate([h, x], axis=1)                  # (1, 32)
    z1 = jax.nn.sigmoid(jnp.dot(comb, w1.T, precision=hp) + b1)
    return jnp.dot(z1, w2.T, precision=hp) + b2


def init_params(key):
    """Deterministic synthetic parameters in PyTorch shape conventions."""
    ks = jax.random.split(key, 8)
    s = 0.1
    w_ih = s * jax.random.normal(ks[0], (4 * N_HIDDEN, INPUT_SIZE), jnp.float32)
    w_hh = s * jax.random.normal(ks[1], (4 * N_HIDDEN, N_HIDDEN), jnp.float32)
    b_ih = s * jax.random.normal(ks[2], (4 * N_HIDDEN,), jnp.float32)
    b_hh = s * jax.random.normal(ks[3], (4 * N_HIDDEN,), jnp.float32)
    w1 = s * jax.random.normal(ks[4], (FC1_OUT, FC1_IN), jnp.float32)
    b1 = s * jax.random.normal(ks[5], (FC1_OUT,), jnp.float32)
    w2 = s * jax.random.normal(ks[6], (FC2_OUT, FC1_OUT), jnp.float32)
    b2 = s * jax.random.normal(ks[7], (FC2_OUT,), jnp.float32)
    return (w_ih, w_hh, b_ih, b_hh, w1, b1, w2, b2)


if __name__ == "__main__":
    key = jax.random.PRNGKey(0)
    k_v, k_x = jax.random.split(key)
    veckos = jax.random.normal(k_v, (SEQ_LEN, INPUT_SIZE), jnp.float32)
    x = jax.random.normal(k_x, (1, X_FEAT), jnp.float32)
    # init_hidden(): zeros of shape (n_layers=1, batch=1, n_hidden) -> (1, 5)
    h0 = jnp.zeros((1, N_HIDDEN), jnp.float32)
    c0 = jnp.zeros((1, N_HIDDEN), jnp.float32)

    params = init_params(jax.random.PRNGKey(42))

    out = jax.block_until_ready(lstmeaning_forward(veckos, x, h0, c0, params))
    assert out.shape == (1, FC2_OUT)

    # Tight check against a reference that uses the same bf16-rounded MXU feed
    # (catches structural bugs independent of the intentional quantization).
    ref_bf = jax.block_until_ready(
        lstmeaning_reference(veckos, x, h0, c0, params, bf16_feed=True))
    assert np.allclose(np.asarray(out), np.asarray(ref_bf),
                       atol=5e-4, rtol=5e-3), (out, ref_bf)

    # Parity check against the pure-f32 PyTorch-semantics reference; the gap is
    # dominated by the bf16 MXU feed of the hoisted input projection.
    ref_f32 = jax.block_until_ready(
        lstmeaning_reference(veckos, x, h0, c0, params, bf16_feed=False))
    assert np.allclose(np.asarray(out), np.asarray(ref_f32),
                       atol=2e-2, rtol=2e-2), (out, ref_f32)

    print("KERNEL_OK")
</pallas_src>

<mosaic_0001>
module attributes {stable_mosaic.version = 11 : i64} {
  func.func @lstmeaning_kernel(%arg0: memref<30x384xbf16, #tpu.memory_space<vmem>>, %arg1: memref<1x27xf32, #tpu.memory_space<vmem>>, %arg2: memref<2x8xf32, #tpu.memory_space<vmem>>, %arg3: memref<384x32xbf16, #tpu.memory_space<vmem>>, %arg4: memref<5x32xf32, #tpu.memory_space<vmem>>, %arg5: memref<35x32xf32, #tpu.memory_space<vmem>>, %arg6: memref<4x32xf32, #tpu.memory_space<vmem>>, %arg7: memref<1x1xf32, #tpu.memory_space<vmem>>, %arg8: memref<30x32xf32, #tpu.memory_space<vmem>>) attributes {dimension_semantics = [], scalar_prefetch = 0 : i64, scratch_operands = 1 : i64, tpu.core_type = #tpu.core_type<tc>} {
    %c0 = arith.constant 0 : index
    %c0_0 = arith.constant 0 : index
    %0 = vector.load %arg0[%c0, %c0_0] : memref<30x384xbf16, #tpu.memory_space<vmem>>, vector<30x384xbf16>
    %c0_1 = arith.constant 0 : index
    %c0_2 = arith.constant 0 : index
    %1 = vector.load %arg3[%c0_1, %c0_2] : memref<384x32xbf16, #tpu.memory_space<vmem>>, vector<384x32xbf16>
    %cst = arith.constant dense<0.000000e+00> : vector<30x32xf32>
    %2 = tpu.matmul %0, %1, %cst {dimension_numbers = #tpu.dot_dimension_numbers<[1], [0], [0], [1], [0, 0, 1, 1], [], []>} : vector<30x384xbf16>, vector<384x32xbf16>, vector<30x32xf32> -> vector<30x32xf32>
    %c0_3 = arith.constant 0 : index
    %c0_4 = arith.constant 0 : index
    %3 = vector.load %arg6[%c0_3, %c0_4] : memref<4x32xf32, #tpu.memory_space<vmem>>, vector<1x32xf32>
    %4 = vector.broadcast %3 : vector<1x32xf32> to vector<30x32xf32>
    %5 = arith.addf %2, %4 : vector<30x32xf32>
    %c0_5 = arith.constant 0 : index
    %c0_6 = arith.constant 0 : index
    %6 = vector.load %arg8[%c0_5, %c0_6] : memref<30x32xf32, #tpu.memory_space<vmem>>, vector<30x32xf32>
    tpu.vector_store %arg8[%c0_5, %c0_6], %5 {strides = array<i32>} : memref<30x32xf32, #tpu.memory_space<vmem>>, vector<30x32xf32>,
    %c0_7 = arith.constant 0 : index
    %c0_8 = arith.constant 0 : index
    %7 = vector.load %arg4[%c0_7, %c0_8] : memref<5x32xf32, #tpu.memory_space<vmem>>, vector<1x32xf32>
    %c1 = arith.constant 1 : index
    %c0_9 = arith.constant 0 : index
    %8 = vector.load %arg4[%c1, %c0_9] : memref<5x32xf32, #tpu.memory_space<vmem>>, vector<1x32xf32>
    %c2 = arith.constant 2 : index
    %c0_10 = arith.constant 0 : index
    %9 = vector.load %arg4[%c2, %c0_10] : memref<5x32xf32, #tpu.memory_space<vmem>>, vector<1x32xf32>
    %c3 = arith.constant 3 : index
    %c0_11 = arith.constant 0 : index
    %10 = vector.load %arg4[%c3, %c0_11] : memref<5x32xf32, #tpu.memory_space<vmem>>, vector<1x32xf32>
    %c4 = arith.constant 4 : index
    %c0_12 = arith.constant 0 : index
    %11 = vector.load %arg4[%c4, %c0_12] : memref<5x32xf32, #tpu.memory_space<vmem>>, vector<1x32xf32>
    %c0_13 = arith.constant 0 : index
    %c0_14 = arith.constant 0 : index
    %12 = vector.load %arg2[%c0_13, %c0_14] : memref<2x8xf32, #tpu.memory_space<vmem>>, vector<1x8xf32>
    %c1_15 = arith.constant 1 : index
    %c0_16 = arith.constant 0 : index
    %13 = vector.load %arg2[%c1_15, %c0_16] : memref<2x8xf32, #tpu.memory_space<vmem>>, vector<1x8xf32>
    %c0_17 = arith.constant 0 : index
    %c0_18 = arith.constant 0 : index
    %14 = vector.load %arg8[%c0_17, %c0_18] : memref<30x32xf32, #tpu.memory_space<vmem>>, vector<1x32xf32>
    %15 = vector.extract_strided_slice %12 {offsets = [0, 0], sizes = [1, 1], strides = [1, 1]} : vector<1x8xf32> to vector<1x1xf32>
    %16 = vector.broadcast %15 : vector<1x1xf32> to vector<1x32xf32>
    %17 = arith.mulf %7, %16 : vector<1x32xf32>
    %18 = vector.extract_strided_slice %12 {offsets = [0, 1], sizes = [1, 1], strides = [1, 1]} : vector<1x8xf32> to vector<1x1xf32>
    %19 = vector.broadcast %18 : vector<1x1xf32> to vector<1x32xf32>
    %20 = arith.mulf %8, %19 : vector<1x32xf32>
    %21 = arith.addf %17, %20 : vector<1x32xf32>
    %22 = vector.extract_strided_slice %12 {offsets = [0, 2], sizes = [1, 1], strides = [1, 1]} : vector<1x8xf32> to vector<1x1xf32>
    %23 = vector.broadcast %22 : vector<1x1xf32> to vector<1x32xf32>
    %24 = arith.mulf %9, %23 : vector<1x32xf32>
    %25 = vector.extract_strided_slice %12 {offsets = [0, 3], sizes = [1, 1], strides = [1, 1]} : vector<1x8xf32> to vector<1x1xf32>
    %26 = vector.broadcast %25 : vector<1x1xf32> to vector<1x32xf32>
    %27 = arith.mulf %10, %26 : vector<1x32xf32>
    %28 = arith.addf %24, %27 : vector<1x32xf32>
    %29 = arith.addf %21, %28 : vector<1x32xf32>
    %30 = vector.extract_strided_slice %12 {offsets = [0, 4], sizes = [1, 1], strides = [1, 1]} : vector<1x8xf32> to vector<1x1xf32>
    %31 = vector.broadcast %30 : vector<1x1xf32> to vector<1x32xf32>
    %32 = arith.mulf %11, %31 : vector<1x32xf32>
    %33 = arith.addf %29, %32 : vector<1x32xf32>
    %34 = arith.addf %14, %33 : vector<1x32xf32>
    %35 = arith.negf %34 : vector<1x32xf32>
    %36 = math.exp %35 : vector<1x32xf32>
    %cst_19 = arith.constant 1.000000e+00 : f32
    %37 = vector.broadcast %cst_19 : f32 to vector<1x32xf32>
    %38 = arith.addf %37, %36 : vector<1x32xf32>
    %39 = arith.divf %37, %38 : vector<1x32xf32>
    %40 = vector.extract_strided_slice %39 {offsets = [0, 0], sizes = [1, 8], strides = [1, 1]} : vector<1x32xf32> to vector<1x8xf32>
    %41 = vector.extract_strided_slice %39 {offsets = [0, 8], sizes = [1, 8], strides = [1, 1]} : vector<1x32xf32> to vector<1x8xf32>
    %42 = vector.extract_strided_slice %39 {offsets = [0, 16], sizes = [1, 8], strides = [1, 1]} : vector<1x32xf32> to vector<1x8xf32>
    %cst_20 = arith.constant 2.000000e+00 : f32
    %43 = vector.broadcast %cst_20 : f32 to vector<1x8xf32>
    %44 = arith.mulf %43, %42 : vector<1x8xf32>
    %cst_21 = arith.constant 1.000000e+00 : f32
    %45 = vector.broadcast %cst_21 : f32 to vector<1x8xf32>
    %46 = arith.subf %44, %45 : vector<1x8xf32>
    %47 = vector.extract_strided_slice %39 {offsets = [0, 24], sizes = [1, 8], strides = [1, 1]} : vector<1x32xf32> to vector<1x8xf32>
    %48 = arith.mulf %41, %13 : vector<1x8xf32>
    %49 = arith.mulf %40, %46 : vector<1x8xf32>
    %50 = arith.addf %48, %49 : vector<1x8xf32>
    %51 = math.tanh %50 : vector<1x8xf32>
    %52 = arith.mulf %47, %51 : vector<1x8xf32>
    %c1_22 = arith.constant 1 : index
    %c0_23 = arith.constant 0 : index
    %53 = vector.load %arg8[%c1_22, %c0_23] : memref<30x32xf32, #tpu.memory_space<vmem>>, vector<1x32xf32>
    %54 = vector.extract_strided_slice %52 {offsets = [0, 0], sizes = [1, 1], strides = [1, 1]} : vector<1x8xf32> to vector<1x1xf32>
    %55 = vector.broadcast %54 : vector<1x1xf32> to vector<1x32xf32>
    %56 = arith.mulf %7, %55 : vector<1x32xf32>
    %57 = vector.extract_strided_slice %52 {offsets = [0, 1], sizes = [1, 1], strides = [1, 1]} : vector<1x8xf32> to vector<1x1xf32>
    %58 = vector.broadcast %57 : vector<1x1xf32> to vector<1x32xf32>
    %59 = arith.mulf %8, %58 : vector<1x32xf32>
    %60 = arith.addf %56, %59 : vector<1x32xf32>
    %61 = vector.extract_strided_slice %52 {offsets = [0, 2], sizes = [1, 1], strides = [1, 1]} : vector<1x8xf32> to vector<1x1xf32>
    %62 = vector.broadcast %61 : vector<1x1xf32> to vector<1x32xf32>
    %63 = arith.mulf %9, %62 : vector<1x32xf32>
    %64 = vector.extract_strided_slice %52 {offsets = [0, 3], sizes = [1, 1], strides = [1, 1]} : vector<1x8xf32> to vector<1x1xf32>
    %65 = vector.broadcast %64 : vector<1x1xf32> to vector<1x32xf32>
    %66 = arith.mulf %10, %65 : vector<1x32xf32>
    %67 = arith.addf %63, %66 : vector<1x32xf32>
    %68 = arith.addf %60, %67 : vector<1x32xf32>
    %69 = vector.extract_strided_slice %52 {offsets = [0, 4], sizes = [1, 1], strides = [1, 1]} : vector<1x8xf32> to vector<1x1xf32>
    %70 = vector.broadcast %69 : vector<1x1xf32> to vector<1x32xf32>
    %71 = arith.mulf %11, %70 : vector<1x32xf32>
    %72 = arith.addf %68, %71 : vector<1x32xf32>
    %73 = arith.addf %53, %72 : vector<1x32xf32>
    %74 = arith.negf %73 : vector<1x32xf32>
    %75 = math.exp %74 : vector<1x32xf32>
    %cst_24 = arith.constant 1.000000e+00 : f32
    %76 = vector.broadcast %cst_24 : f32 to vector<1x32xf32>
    %77 = arith.addf %76, %75 : vector<1x32xf32>
    %78 = arith.divf %76, %77 : vector<1x32xf32>
    %79 = vector.extract_strided_slice %78 {offsets = [0, 0], sizes = [1, 8], strides = [1, 1]} : vector<1x32xf32> to vector<1x8xf32>
    %80 = vector.extract_strided_slice %78 {offsets = [0, 8], sizes = [1, 8], strides = [1, 1]} : vector<1x32xf32> to vector<1x8xf32>
    %81 = vector.extract_strided_slice %78 {offsets = [0, 16], sizes = [1, 8], strides = [1, 1]} : vector<1x32xf32> to vector<1x8xf32>
    %cst_25 = arith.constant 2.000000e+00 : f32
    %82 = vector.broadcast %cst_25 : f32 to vector<1x8xf32>
    %83 = arith.mulf %82, %81 : vector<1x8xf32>
    %cst_26 = arith.constant 1.000000e+00 : f32
    %84 = vector.broadcast %cst_26 : f32 to vector<1x8xf32>
    %85 = arith.subf %83, %84 : vector<1x8xf32>
    %86 = vector.extract_strided_slice %78 {offsets = [0, 24], sizes = [1, 8], strides = [1, 1]} : vector<1x32xf32> to vector<1x8xf32>
    %87 = arith.mulf %80, %50 : vector<1x8xf32>
    %88 = arith.mulf %79, %85 : vector<1x8xf32>
    %89 = arith.addf %87, %88 : vector<1x8xf32>
    %90 = math.tanh %89 : vector<1x8xf32>
    %91 = arith.mulf %86, %90 : vector<1x8xf32>
    %c2_27 = arith.constant 2 : index
    %c0_28 = arith.constant 0 : index
    %92 = vector.load %arg8[%c2_27, %c0_28] : memref<30x32xf32, #tpu.memory_space<vmem>>, vector<1x32xf32>
    %93 = vector.extract_strided_slice %91 {offsets = [0, 0], sizes = [1, 1], strides = [1, 1]} : vector<1x8xf32> to vector<1x1xf32>
    %94 = vector.broadcast %93 : vector<1x1xf32> to vector<1x32xf32>
    %95 = arith.mulf %7, %94 : vector<1x32xf32>
    %96 = vector.extract_strided_slice %91 {offsets = [0, 1], sizes = [1, 1], strides = [1, 1]} : vector<1x8xf32> to vector<1x1xf32>
    %97 = vector.broadcast %96 : vector<1x1xf32> to vector<1x32xf32>
    %98 = arith.mulf %8, %97 : vector<1x32xf32>
    %99 = arith.addf %95, %98 : vector<1x32xf32>
    %100 = vector.extract_strided_slice %91 {offsets = [0, 2], sizes = [1, 1], strides = [1, 1]} : vector<1x8xf32> to vector<1x1xf32>
    %101 = vector.broadcast %100 : vector<1x1xf32> to vector<1x32xf32>
    %102 = arith.mulf %9, %101 : vector<1x32xf32>
    %103 = vector.extract_strided_slice %91 {offsets = [0, 3], sizes = [1, 1], strides = [1, 1]} : vector<1x8xf32> to vector<1x1xf32>
    %104 = vector.broadcast %103 : vector<1x1xf32> to vector<1x32xf32>
    %105 = arith.mulf %10, %104 : vector<1x32xf32>
    %106 = arith.addf %102, %105 : vector<1x32xf32>
    %107 = arith.addf %99, %106 : vector<1x32xf32>
    %108 = vector.extract_strided_slice %91 {offsets = [0, 4], sizes = [1, 1], strides = [1, 1]} : vector<1x8xf32> to vector<1x1xf32>
    %109 = vector.broadcast %108 : vector<1x1xf32> to vector<1x32xf32>
    %110 = arith.mulf %11, %109 : vector<1x32xf32>
    %111 = arith.addf %107, %110 : vector<1x32xf32>
    %112 = arith.addf %92, %111 : vector<1x32xf32>
    %113 = arith.negf %112 : vector<1x32xf32>
    %114 = math.exp %113 : vector<1x32xf32>
    %cst_29 = arith.constant 1.000000e+00 : f32
    %115 = vector.broadcast %cst_29 : f32 to vector<1x32xf32>
    %116 = arith.addf %115, %114 : vector<1x32xf32>
    %117 = arith.divf %115, %116 : vector<1x32xf32>
    %118 = vector.extract_strided_slice %117 {offsets = [0, 0], sizes = [1, 8], strides = [1, 1]} : vector<1x32xf32> to vector<1x8xf32>
    %119 = vector.extract_strided_slice %117 {offsets = [0, 8], sizes = [1, 8], strides = [1, 1]} : vector<1x32xf32> to vector<1x8xf32>
    %120 = vector.extract_strided_slice %117 {offsets = [0, 16], sizes = [1, 8], strides = [1, 1]} : vector<1x32xf32> to vector<1x8xf32>
    %cst_30 = arith.constant 2.000000e+00 : f32
    %121 = vector.broadcast %cst_30 : f32 to vector<1x8xf32>
    %122 = arith.mulf %121, %120 : vector<1x8xf32>
    %cst_31 = arith.constant 1.000000e+00 : f32
    %123 = vector.broadcast %cst_31 : f32 to vector<1x8xf32>
    %124 = arith.subf %122, %123 : vector<1x8xf32>
    %125 = vector.extract_strided_slice %117 {offsets = [0, 24], sizes = [1, 8], strides = [1, 1]} : vector<1x32xf32> to vector<1x8xf32>
    %126 = arith.mulf %119, %89 : vector<1x8xf32>
    %127 = arith.mulf %118, %124 : vector<1x8xf32>
    %128 = arith.addf %126, %127 : vector<1x8xf32>
    %129 = math.tanh %128 : vector<1x8xf32>
    %130 = arith.mulf %125, %129 : vector<1x8xf32>
    %c3_32 = arith.constant 3 : index
    %c0_33 = arith.constant 0 : index
    %131 = vector.load %arg8[%c3_32, %c0_33] : memref<30x32xf32, #tpu.memory_space<vmem>>, vector<1x32xf32>
    %132 = vector.extract_strided_slice %130 {offsets = [0, 0], sizes = [1, 1], strides = [1, 1]} : vector<1x8xf32> to vector<1x1xf32>
    %133 = vector.broadcast %132 : vector<1x1xf32> to vector<1x32xf32>
    %134 = arith.mulf %7, %133 : vector<1x32xf32>
    %135 = vector.extract_strided_slice %130 {offsets = [0, 1], sizes = [1, 1], strides = [1, 1]} : vector<1x8xf32> to vector<1x1xf32>
    %136 = vector.broadcast %135 : vector<1x1xf32> to vector<1x32xf32>
    %137 = arith.mulf %8, %136 : vector<1x32xf32>
    %138 = arith.addf %134, %137 : vector<1x32xf32>
    %139 = vector.extract_strided_slice %130 {offsets = [0, 2], sizes = [1, 1], strides = [1, 1]} : vector<1x8xf32> to vector<1x1xf32>
    %140 = vector.broadcast %139 : vector<1x1xf32> to vector<1x32xf32>
    %141 = arith.mulf %9, %140 : vector<1x32xf32>
    %142 = vector.extract_strided_slice %130 {offsets = [0, 3], sizes = [1, 1], strides = [1, 1]} : vector<1x8xf32> to vector<1x1xf32>
    %143 = vector.broadcast %142 : vector<1x1xf32> to vector<1x32xf32>
    %144 = arith.mulf %10, %143 : vector<1x32xf32>
    %145 = arith.addf %141, %144 : vector<1x32xf32>
    %146 = arith.addf %138, %145 : vector<1x32xf32>
    %147 = vector.extract_strided_slice %130 {offsets = [0, 4], sizes = [1, 1], strides = [1, 1]} : vector<1x8xf32> to vector<1x1xf32>
    %148 = vector.broadcast %147 : vector<1x1xf32> to vector<1x32xf32>
    %149 = arith.mulf %11, %148 : vector<1x32xf32>
    %150 = arith.addf %146, %149 : vector<1x32xf32>
    %151 = arith.addf %131, %150 : vector<1x32xf32>
    %152 = arith.negf %151 : vector<1x32xf32>
    %153 = math.exp %152 : vector<1x32xf32>
    %cst_34 = arith.constant 1.000000e+00 : f32
    %154 = vector.broadcast %cst_34 : f32 to vector<1x32xf32>
    %155 = arith.addf %154, %153 : vector<1x32xf32>
    %156 = arith.divf %154, %155 : vector<1x32xf32>
    %157 = vector.extract_strided_slice %156 {offsets = [0, 0], sizes = [1, 8], strides = [1, 1]} : vector<1x32xf32> to vector<1x8xf32>
    %158 = vector.extract_strided_slice %156 {offsets = [0, 8], sizes = [1, 8], strides = [1, 1]} : vector<1x32xf32> to vector<1x8xf32>
    %159 = vector.extract_strided_slice %156 {offsets = [0, 16], sizes = [1, 8], strides = [1, 1]} : vector<1x32xf32> to vector<1x8xf32>
    %cst_35 = arith.constant 2.000000e+00 : f32
    %160 = vector.broadcast %cst_35 : f32 to vector<1x8xf32>
    %161 = arith.mulf %160, %159 : vector<1x8xf32>
    %cst_36 = arith.constant 1.000000e+00 : f32
    %162 = vector.broadcast %cst_36 : f32 to vector<1x8xf32>
    %163 = arith.subf %161, %162 : vector<1x8xf32>
    %164 = vector.extract_strided_slice %156 {offsets = [0, 24], sizes = [1, 8], strides = [1, 1]} : vector<1x32xf32> to vector<1x8xf32>
    %165 = arith.mulf %158, %128 : vector<1x8xf32>
    %166 = arith.mulf %157, %163 : vector<1x8xf32>
    %167 = arith.addf %165, %166 : vector<1x8xf32>
    %168 = math.tanh %167 : vector<1x8xf32>
    %169 = arith.mulf %164, %168 : vector<1x8xf32>
    %c4_37 = arith.constant 4 : index
    %c0_38 = arith.constant 0 : index
    %170 = vector.load %arg8[%c4_37, %c0_38] : memref<30x32xf32, #tpu.memory_space<vmem>>, vector<1x32xf32>
    %171 = vector.extract_strided_slice %169 {offsets = [0, 0], sizes = [1, 1], strides = [1, 1]} : vector<1x8xf32> to vector<1x1xf32>
    %172 = vector.broadcast %171 : vector<1x1xf32> to vector<1x32xf32>
    %173 = arith.mulf %7, %172 : vector<1x32xf32>
    %174 = vector.extract_strided_slice %169 {offsets = [0, 1], sizes = [1, 1], strides = [1, 1]} : vector<1x8xf32> to vector<1x1xf32>
    %175 = vector.broadcast %174 : vector<1x1xf32> to vector<1x32xf32>
    %176 = arith.mulf %8, %175 : vector<1x32xf32>
    %177 = arith.addf %173, %176 : vector<1x32xf32>
    %178 = vector.extract_strided_slice %169 {offsets = [0, 2], sizes = [1, 1], strides = [1, 1]} : vector<1x8xf32> to vector<1x1xf32>
    %179 = vector.broadcast %178 : vector<1x1xf32> to vector<1x32xf32>
    %180 = arith.mulf %9, %179 : vector<1x32xf32>
    %181 = vector.extract_strided_slice %169 {offsets = [0, 3], sizes = [1, 1], strides = [1, 1]} : vector<1x8xf32> to vector<1x1xf32>
    %182 = vector.broadcast %181 : vector<1x1xf32> to vector<1x32xf32>
    %183 = arith.mulf %10, %182 : vector<1x32xf32>
    %184 = arith.addf %180, %183 : vector<1x32xf32>
    %185 = arith.addf %177, %184 : vector<1x32xf32>
    %186 = vector.extract_strided_slice %169 {offsets = [0, 4], sizes = [1, 1], strides = [1, 1]} : vector<1x8xf32> to vector<1x1xf32>
    %187 = vector.broadcast %186 : vector<1x1xf32> to vector<1x32xf32>
    %188 = arith.mulf %11, %187 : vector<1x32xf32>
    %189 = arith.addf %185, %188 : vector<1x32xf32>
    %190 = arith.addf %170, %189 : vector<1x32xf32>
    %191 = arith.negf %190 : vector<1x32xf32>
    %192 = math.exp %191 : vector<1x32xf32>
    %cst_39 = arith.constant 1.000000e+00 : f32
    %193 = vector.broadcast %cst_39 : f32 to vector<1x32xf32>
    %194 = arith.addf %193, %192 : vector<1x32xf32>
    %195 = arith.divf %193, %194 : vector<1x32xf32>
    %196 = vector.extract_strided_slice %195 {offsets = [0, 0], sizes = [1, 8], strides = [1, 1]} : vector<1x32xf32> to vector<1x8xf32>
    %197 = vector.extract_strided_slice %195 {offsets = [0, 8], sizes = [1, 8], strides = [1, 1]} : vector<1x32xf32> to vector<1x8xf32>
    %198 = vector.extract_strided_slice %195 {offsets = [0, 16], sizes = [1, 8], strides = [1, 1]} : vector<1x32xf32> to vector<1x8xf32>
    %cst_40 = arith.constant 2.000000e+00 : f32
    %199 = vector.broadcast %cst_40 : f32 to vector<1x8xf32>
    %200 = arith.mulf %199, %198 : vector<1x8xf32>
    %cst_41 = arith.constant 1.000000e+00 : f32
    %201 = vector.broadcast %cst_41 : f32 to vector<1x8xf32>
    %202 = arith.subf %200, %201 : vector<1x8xf32>
    %203 = vector.extract_strided_slice %195 {offsets = [0, 24], sizes = [1, 8], strides = [1, 1]} : vector<1x32xf32> to vector<1x8xf32>
    %204 = arith.mulf %197, %167 : vector<1x8xf32>
    %205 = arith.mulf %196, %202 : vector<1x8xf32>
    %206 = arith.addf %204, %205 : vector<1x8xf32>
    %207 = math.tanh %206 : vector<1x8xf32>
    %208 = arith.mulf %203, %207 : vector<1x8xf32>
    %c5 = arith.constant 5 : index
    %c0_42 = arith.constant 0 : index
    %209 = vector.load %arg8[%c5, %c0_42] : memref<30x32xf32, #tpu.memory_space<vmem>>, vector<1x32xf32>
    %210 = vector.extract_strided_slice %208 {offsets = [0, 0], sizes = [1, 1], strides = [1, 1]} : vector<1x8xf32> to vector<1x1xf32>
    %211 = vector.broadcast %210 : vector<1x1xf32> to vector<1x32xf32>
    %212 = arith.mulf %7, %211 : vector<1x32xf32>
    %213 = vector.extract_strided_slice %208 {offsets = [0, 1], sizes = [1, 1], strides = [1, 1]} : vector<1x8xf32> to vector<1x1xf32>
    %214 = vector.broadcast %213 : vector<1x1xf32> to vector<1x32xf32>
    %215 = arith.mulf %8, %214 : vector<1x32xf32>
    %216 = arith.addf %212, %215 : vector<1x32xf32>
    %217 = vector.extract_strided_slice %208 {offsets = [0, 2], sizes = [1, 1], strides = [1, 1]} : vector<1x8xf32> to vector<1x1xf32>
    %218 = vector.broadcast %217 : vector<1x1xf32> to vector<1x32xf32>
    %219 = arith.mulf %9, %218 : vector<1x32xf32>
    %220 = vector.extract_strided_slice %208 {offsets = [0, 3], sizes = [1, 1], strides = [1, 1]} : vector<1x8xf32> to vector<1x1xf32>
    %221 = vector.broadcast %220 : vector<1x1xf32> to vector<1x32xf32>
    %222 = arith.mulf %10, %221 : vector<1x32xf32>
    %223 = arith.addf %219, %222 : vector<1x32xf32>
    %224 = arith.addf %216, %223 : vector<1x32xf32>
    %225 = vector.extract_strided_slice %208 {offsets = [0, 4], sizes = [1, 1], strides = [1, 1]} : vector<1x8xf32> to vector<1x1xf32>
    %226 = vector.broadcast %225 : vector<1x1xf32> to vector<1x32xf32>
    %227 = arith.mulf %11, %226 : vector<1x32xf32>
    %228 = arith.addf %224, %227 : vector<1x32xf32>
    %229 = arith.addf %209, %228 : vector<1x32xf32>
    %230 = arith.negf %229 : vector<1x32xf32>
    %231 = math.exp %230 : vector<1x32xf32>
    %cst_43 = arith.constant 1.000000e+00 : f32
    %232 = vector.broadcast %cst_43 : f32 to vector<1x32xf32>
    %233 = arith.addf %232, %231 : vector<1x32xf32>
    %234 = arith.divf %232, %233 : vector<1x32xf32>
    %235 = vector.extract_strided_slice %234 {offsets = [0, 0], sizes = [1, 8], strides = [1, 1]} : vector<1x32xf32> to vector<1x8xf32>
    %236 = vector.extract_strided_slice %234 {offsets = [0, 8], sizes = [1, 8], strides = [1, 1]} : vector<1x32xf32> to vector<1x8xf32>
    %237 = vector.extract_strided_slice %234 {offsets = [0, 16], sizes = [1, 8], strides = [1, 1]} : vector<1x32xf32> to vector<1x8xf32>
    %cst_44 = arith.constant 2.000000e+00 : f32
    %238 = vector.broadcast %cst_44 : f32 to vector<1x8xf32>
    %239 = arith.mulf %238, %237 : vector<1x8xf32>
    %cst_45 = arith.constant 1.000000e+00 : f32
    %240 = vector.broadcast %cst_45 : f32 to vector<1x8xf32>
    %241 = arith.subf %239, %240 : vector<1x8xf32>
    %242 = vector.extract_strided_slice %234 {offsets = [0, 24], sizes = [1, 8], strides = [1, 1]} : vector<1x32xf32> to vector<1x8xf32>
    %243 = arith.mulf %236, %206 : vector<1x8xf32>
    %244 = arith.mulf %235, %241 : vector<1x8xf32>
    %245 = arith.addf %243, %244 : vector<1x8xf32>
    %246 = math.tanh %245 : vector<1x8xf32>
    %247 = arith.mulf %242, %246 : vector<1x8xf32>
    %c6 = arith.constant 6 : index
    %c0_46 = arith.constant 0 : index
    %248 = vector.load %arg8[%c6, %c0_46] : memref<30x32xf32, #tpu.memory_space<vmem>>, vector<1x32xf32>
    %249 = vector.extract_strided_slice %247 {offsets = [0, 0], sizes = [1, 1], strides = [1, 1]} : vector<1x8xf32> to vector<1x1xf32>
    %250 = vector.broadcast %249 : vector<1x1xf32> to vector<1x32xf32>
    %251 = arith.mulf %7, %250 : vector<1x32xf32>
    %252 = vector.extract_strided_slice %247 {offsets = [0, 1], sizes = [1, 1], strides = [1, 1]} : vector<1x8xf32> to vector<1x1xf32>
    %253 = vector.broadcast %252 : vector<1x1xf32> to vector<1x32xf32>
    %254 = arith.mulf %8, %253 : vector<1x32xf32>
    %255 = arith.addf %251, %254 : vector<1x32xf32>
    %256 = vector.extract_strided_slice %247 {offsets = [0, 2], sizes = [1, 1], strides = [1, 1]} : vector<1x8xf32> to vector<1x1xf32>
    %257 = vector.broadcast %256 : vector<1x1xf32> to vector<1x32xf32>
    %258 = arith.mulf %9, %257 : vector<1x32xf32>
    %259 = vector.extract_strided_slice %247 {offsets = [0, 3], sizes = [1, 1], strides = [1, 1]} : vector<1x8xf32> to vector<1x1xf32>
    %260 = vector.broadcast %259 : vector<1x1xf32> to vector<1x32xf32>
    %261 = arith.mulf %10, %260 : vector<1x32xf32>
    %262 = arith.addf %258, %261 : vector<1x32xf32>
    %263 = arith.addf %255, %262 : vector<1x32xf32>
    %264 = vector.extract_strided_slice %247 {offsets = [0, 4], sizes = [1, 1], strides = [1, 1]} : vector<1x8xf32> to vector<1x1xf32>
    %265 = vector.broadcast %264 : vector<1x1xf32> to vector<1x32xf32>
    %266 = arith.mulf %11, %265 : vector<1x32xf32>
    %267 = arith.addf %263, %266 : vector<1x32xf32>
    %268 = arith.addf %248, %267 : vector<1x32xf32>
    %269 = arith.negf %268 : vector<1x32xf32>
    %270 = math.exp %269 : vector<1x32xf32>
    %cst_47 = arith.constant 1.000000e+00 : f32
    %271 = vector.broadcast %cst_47 : f32 to vector<1x32xf32>
    %272 = arith.addf %271, %270 : vector<1x32xf32>
    %273 = arith.divf %271, %272 : vector<1x32xf32>
    %274 = vector.extract_strided_slice %273 {offsets = [0, 0], sizes = [1, 8], strides = [1, 1]} : vector<1x32xf32> to vector<1x8xf32>
    %275 = vector.extract_strided_slice %273 {offsets = [0, 8], sizes = [1, 8], strides = [1, 1]} : vector<1x32xf32> to vector<1x8xf32>
    %276 = vector.extract_strided_slice %273 {offsets = [0, 16], sizes = [1, 8], strides = [1, 1]} : vector<1x32xf32> to vector<1x8xf32>
    %cst_48 = arith.constant 2.000000e+00 : f32
    %277 = vector.broadcast %cst_48 : f32 to vector<1x8xf32>
    %278 = arith.mulf %277, %276 : vector<1x8xf32>
    %cst_49 = arith.constant 1.000000e+00 : f32
    %279 = vector.broadcast %cst_49 : f32 to vector<1x8xf32>
    %280 = arith.subf %278, %279 : vector<1x8xf32>
    %281 = vector.extract_strided_slice %273 {offsets = [0, 24], sizes = [1, 8], strides = [1, 1]} : vector<1x32xf32> to vector<1x8xf32>
    %282 = arith.mulf %275, %245 : vector<1x8xf32>
    %283 = arith.mulf %274, %280 : vector<1x8xf32>
    %284 = arith.addf %282, %283 : vector<1x8xf32>
    %285 = math.tanh %284 : vector<1x8xf32>
    %286 = arith.mulf %281, %285 : vector<1x8xf32>
    %c7 = arith.constant 7 : index
    %c0_50 = arith.constant 0 : index
    %287 = vector.load %arg8[%c7, %c0_50] : memref<30x32xf32, #tpu.memory_space<vmem>>, vector<1x32xf32>
    %288 = vector.extract_strided_slice %286 {offsets = [0, 0], sizes = [1, 1], strides = [1, 1]} : vector<1x8xf32> to vector<1x1xf32>
    %289 = vector.broadcast %288 : vector<1x1xf32> to vector<1x32xf32>
    %290 = arith.mulf %7, %289 : vector<1x32xf32>
    %291 = vector.extract_strided_slice %286 {offsets = [0, 1], sizes = [1, 1], strides = [1, 1]} : vector<1x8xf32> to vector<1x1xf32>
    %292 = vector.broadcast %291 : vector<1x1xf32> to vector<1x32xf32>
    %293 = arith.mulf %8, %292 : vector<1x32xf32>
    %294 = arith.addf %290, %293 : vector<1x32xf32>
    %295 = vector.extract_strided_slice %286 {offsets = [0, 2], sizes = [1, 1], strides = [1, 1]} : vector<1x8xf32> to vector<1x1xf32>
    %296 = vector.broadcast %295 : vector<1x1xf32> to vector<1x32xf32>
    %297 = arith.mulf %9, %296 : vector<1x32xf32>
    %298 = vector.extract_strided_slice %286 {offsets = [0, 3], sizes = [1, 1], strides = [1, 1]} : vector<1x8xf32> to vector<1x1xf32>
    %299 = vector.broadcast %298 : vector<1x1xf32> to vector<1x32xf32>
    %300 = arith.mulf %10, %299 : vector<1x32xf32>
    %301 = arith.addf %297, %300 : vector<1x32xf32>
    %302 = arith.addf %294, %301 : vector<1x32xf32>
    %303 = vector.extract_strided_slice %286 {offsets = [0, 4], sizes = [1, 1], strides = [1, 1]} : vector<1x8xf32> to vector<1x1xf32>
    %304 = vector.broadcast %303 : vector<1x1xf32> to vector<1x32xf32>
    %305 = arith.mulf %11, %304 : vector<1x32xf32>
    %306 = arith.addf %302, %305 : vector<1x32xf32>
    %307 = arith.addf %287, %306 : vector<1x32xf32>
    %308 = arith.negf %307 : vector<1x32xf32>
    %309 = math.exp %308 : vector<1x32xf32>
    %cst_51 = arith.constant 1.000000e+00 : f32
    %310 = vector.broadcast %cst_51 : f32 to vector<1x32xf32>
    %311 = arith.addf %310, %309 : vector<1x32xf32>
    %312 = arith.divf %310, %311 : vector<1x32xf32>
    %313 = vector.extract_strided_slice %312 {offsets = [0, 0], sizes = [1, 8], strides = [1, 1]} : vector<1x32xf32> to vector<1x8xf32>
    %314 = vector.extract_strided_slice %312 {offsets = [0, 8], sizes = [1, 8], strides = [1, 1]} : vector<1x32xf32> to vector<1x8xf32>
    %315 = vector.extract_strided_slice %312 {offsets = [0, 16], sizes = [1, 8], strides = [1, 1]} : vector<1x32xf32> to vector<1x8xf32>
    %cst_52 = arith.constant 2.000000e+00 : f32
    %316 = vector.broadcast %cst_52 : f32 to vector<1x8xf32>
    %317 = arith.mulf %316, %315 : vector<1x8xf32>
    %cst_53 = arith.constant 1.000000e+00 : f32
    %318 = vector.broadcast %cst_53 : f32 to vector<1x8xf32>
    %319 = arith.subf %317, %318 : vector<1x8xf32>
    %320 = vector.extract_strided_slice %312 {offsets = [0, 24], sizes = [1, 8], strides = [1, 1]} : vector<1x32xf32> to vector<1x8xf32>
    %321 = arith.mulf %314, %284 : vector<1x8xf32>
    %322 = arith.mulf %313, %319 : vector<1x8xf32>
    %323 = arith.addf %321, %322 : vector<1x8xf32>
    %324 = math.tanh %323 : vector<1x8xf32>
    %325 = arith.mulf %320, %324 : vector<1x8xf32>
    %c8 = arith.constant 8 : index
    %c0_54 = arith.constant 0 : index
    %326 = vector.load %arg8[%c8, %c0_54] : memref<30x32xf32, #tpu.memory_space<vmem>>, vector<1x32xf32>
    %327 = vector.extract_strided_slice %325 {offsets = [0, 0], sizes = [1, 1], strides = [1, 1]} : vector<1x8xf32> to vector<1x1xf32>
    %328 = vector.broadcast %327 : vector<1x1xf32> to vector<1x32xf32>
    %329 = arith.mulf %7, %328 : vector<1x32xf32>
    %330 = vector.extract_strided_slice %325 {offsets = [0, 1], sizes = [1, 1], strides = [1, 1]} : vector<1x8xf32> to vector<1x1xf32>
    %331 = vector.broadcast %330 : vector<1x1xf32> to vector<1x32xf32>
    %332 = arith.mulf %8, %331 : vector<1x32xf32>
    %333 = arith.addf %329, %332 : vector<1x32xf32>
    %334 = vector.extract_strided_slice %325 {offsets = [0, 2], sizes = [1, 1], strides = [1, 1]} : vector<1x8xf32> to vector<1x1xf32>
    %335 = vector.broadcast %334 : vector<1x1xf32> to vector<1x32xf32>
    %336 = arith.mulf %9, %335 : vector<1x32xf32>
    %337 = vector.extract_strided_slice %325 {offsets = [0, 3], sizes = [1, 1], strides = [1, 1]} : vector<1x8xf32> to vector<1x1xf32>
    %338 = vector.broadcast %337 : vector<1x1xf32> to vector<1x32xf32>
    %339 = arith.mulf %10, %338 : vector<1x32xf32>
    %340 = arith.addf %336, %339 : vector<1x32xf32>
    %341 = arith.addf %333, %340 : vector<1x32xf32>
    %342 = vector.extract_strided_slice %325 {offsets = [0, 4], sizes = [1, 1], strides = [1, 1]} : vector<1x8xf32> to vector<1x1xf32>
    %343 = vector.broadcast %342 : vector<1x1xf32> to vector<1x32xf32>
    %344 = arith.mulf %11, %343 : vector<1x32xf32>
    %345 = arith.addf %341, %344 : vector<1x32xf32>
    %346 = arith.addf %326, %345 : vector<1x32xf32>
    %347 = arith.negf %346 : vector<1x32xf32>
    %348 = math.exp %347 : vector<1x32xf32>
    %cst_55 = arith.constant 1.000000e+00 : f32
    %349 = vector.broadcast %cst_55 : f32 to vector<1x32xf32>
    %350 = arith.addf %349, %348 : vector<1x32xf32>
    %351 = arith.divf %349, %350 : vector<1x32xf32>
    %352 = vector.extract_strided_slice %351 {offsets = [0, 0], sizes = [1, 8], strides = [1, 1]} : vector<1x32xf32> to vector<1x8xf32>
    %353 = vector.extract_strided_slice %351 {offsets = [0, 8], sizes = [1, 8], strides = [1, 1]} : vector<1x32xf32> to vector<1x8xf32>
    %354 = vector.extract_strided_slice %351 {offsets = [0, 16], sizes = [1, 8], strides = [1, 1]} : vector<1x32xf32> to vector<1x8xf32>
    %cst_56 = arith.constant 2.000000e+00 : f32
    %355 = vector.broadcast %cst_56 : f32 to vector<1x8xf32>
    %356 = arith.mulf %355, %354 : vector<1x8xf32>
    %cst_57 = arith.constant 1.000000e+00 : f32
    %357 = vector.broadcast %cst_57 : f32 to vector<1x8xf32>
    %358 = arith.subf %356, %357 : vector<1x8xf32>
    %359 = vector.extract_strided_slice %351 {offsets = [0, 24], sizes = [1, 8], strides = [1, 1]} : vector<1x32xf32> to vector<1x8xf32>
    %360 = arith.mulf %353, %323 : vector<1x8xf32>
    %361 = arith.mulf %352, %358 : vector<1x8xf32>
    %362 = arith.addf %360, %361 : vector<1x8xf32>
    %363 = math.tanh %362 : vector<1x8xf32>
    %364 = arith.mulf %359, %363 : vector<1x8xf32>
    %c9 = arith.constant 9 : index
    %c0_58 = arith.constant 0 : index
    %365 = vector.load %arg8[%c9, %c0_58] : memref<30x32xf32, #tpu.memory_space<vmem>>, vector<1x32xf32>
    %366 = vector.extract_strided_slice %364 {offsets = [0, 0], sizes = [1, 1], strides = [1, 1]} : vector<1x8xf32> to vector<1x1xf32>
    %367 = vector.broadcast %366 : vector<1x1xf32> to vector<1x32xf32>
    %368 = arith.mulf %7, %367 : vector<1x32xf32>
    %369 = vector.extract_strided_slice %364 {offsets = [0, 1], sizes = [1, 1], strides = [1, 1]} : vector<1x8xf32> to vector<1x1xf32>
    %370 = vector.broadcast %369 : vector<1x1xf32> to vector<1x32xf32>
    %371 = arith.mulf %8, %370 : vector<1x32xf32>
    %372 = arith.addf %368, %371 : vector<1x32xf32>
    %373 = vector.extract_strided_slice %364 {offsets = [0, 2], sizes = [1, 1], strides = [1, 1]} : vector<1x8xf32> to vector<1x1xf32>
    %374 = vector.broadcast %373 : vector<1x1xf32> to vector<1x32xf32>
    %375 = arith.mulf %9, %374 : vector<1x32xf32>
    %376 = vector.extract_strided_slice %364 {offsets = [0, 3], sizes = [1, 1], strides = [1, 1]} : vector<1x8xf32> to vector<1x1xf32>
    %377 = vector.broadcast %376 : vector<1x1xf32> to vector<1x32xf32>
    %378 = arith.mulf %10, %377 : vector<1x32xf32>
    %379 = arith.addf %375, %378 : vector<1x32xf32>
    %380 = arith.addf %372, %379 : vector<1x32xf32>
    %381 = vector.extract_strided_slice %364 {offsets = [0, 4], sizes = [1, 1], strides = [1, 1]} : vector<1x8xf32> to vector<1x1xf32>
    %382 = vector.broadcast %381 : vector<1x1xf32> to vector<1x32xf32>
    %383 = arith.mulf %11, %382 : vector<1x32xf32>
    %384 = arith.addf %380, %383 : vector<1x32xf32>
    %385 = arith.addf %365, %384 : vector<1x32xf32>
    %386 = arith.negf %385 : vector<1x32xf32>
    %387 = math.exp %386 : vector<1x32xf32>
    %cst_59 = arith.constant 1.000000e+00 : f32
    %388 = vector.broadcast %cst_59 : f32 to vector<1x32xf32>
    %389 = arith.addf %388, %387 : vector<1x32xf32>
    %390 = arith.divf %388, %389 : vector<1x32xf32>
    %391 = vector.extract_strided_slice %390 {offsets = [0, 0], sizes = [1, 8], strides = [1, 1]} : vector<1x32xf32> to vector<1x8xf32>
    %392 = vector.extract_strided_slice %390 {offsets = [0, 8], sizes = [1, 8], strides = [1, 1]} : vector<1x32xf32> to vector<1x8xf32>
    %393 = vector.extract_strided_slice %390 {offsets = [0, 16], sizes = [1, 8], strides = [1, 1]} : vector<1x32xf32> to vector<1x8xf32>
    %cst_60 = arith.constant 2.000000e+00 : f32
    %394 = vector.broadcast %cst_60 : f32 to vector<1x8xf32>
    %395 = arith.mulf %394, %393 : vector<1x8xf32>
    %cst_61 = arith.constant 1.000000e+00 : f32
    %396 = vector.broadcast %cst_61 : f32 to vector<1x8xf32>
    %397 = arith.subf %395, %396 : vector<1x8xf32>
    %398 = vector.extract_strided_slice %390 {offsets = [0, 24], sizes = [1, 8], strides = [1, 1]} : vector<1x32xf32> to vector<1x8xf32>
    %399 = arith.mulf %392, %362 : vector<1x8xf32>
    %400 = arith.mulf %391, %397 : vector<1x8xf32>
    %401 = arith.addf %399, %400 : vector<1x8xf32>
    %402 = math.tanh %401 : vector<1x8xf32>
    %403 = arith.mulf %398, %402 : vector<1x8xf32>
    %c10 = arith.constant 10 : index
    %c0_62 = arith.constant 0 : index
    %404 = vector.load %arg8[%c10, %c0_62] : memref<30x32xf32, #tpu.memory_space<vmem>>, vector<1x32xf32>
    %405 = vector.extract_strided_slice %403 {offsets = [0, 0], sizes = [1, 1], strides = [1, 1]} : vector<1x8xf32> to vector<1x1xf32>
    %406 = vector.broadcast %405 : vector<1x1xf32> to vector<1x32xf32>
    %407 = arith.mulf %7, %406 : vector<1x32xf32>
    %408 = vector.extract_strided_slice %403 {offsets = [0, 1], sizes = [1, 1], strides = [1, 1]} : vector<1x8xf32> to vector<1x1xf32>
    %409 = vector.broadcast %408 : vector<1x1xf32> to vector<1x32xf32>
    %410 = arith.mulf %8, %409 : vector<1x32xf32>
    %411 = arith.addf %407, %410 : vector<1x32xf32>
    %412 = vector.extract_strided_slice %403 {offsets = [0, 2], sizes = [1, 1], strides = [1, 1]} : vector<1x8xf32> to vector<1x1xf32>
    %413 = vector.broadcast %412 : vector<1x1xf32> to vector<1x32xf32>
    %414 = arith.mulf %9, %413 : vector<1x32xf32>
    %415 = vector.extract_strided_slice %403 {offsets = [0, 3], sizes = [1, 1], strides = [1, 1]} : vector<1x8xf32> to vector<1x1xf32>
    %416 = vector.broadcast %415 : vector<1x1xf32> to vector<1x32xf32>
    %417 = arith.mulf %10, %416 : vector<1x32xf32>
    %418 = arith.addf %414, %417 : vector<1x32xf32>
    %419 = arith.addf %411, %418 : vector<1x32xf32>
    %420 = vector.extract_strided_slice %403 {offsets = [0, 4], sizes = [1, 1], strides = [1, 1]} : vector<1x8xf32> to vector<1x1xf32>
    %421 = vector.broadcast %420 : vector<1x1xf32> to vector<1x32xf32>
    %422 = arith.mulf %11, %421 : vector<1x32xf32>
    %423 = arith.addf %419, %422 : vector<1x32xf32>
    %424 = arith.addf %404, %423 : vector<1x32xf32>
    %425 = arith.negf %424 : vector<1x32xf32>
    %426 = math.exp %425 : vector<1x32xf32>
    %cst_63 = arith.constant 1.000000e+00 : f32
    %427 = vector.broadcast %cst_63 : f32 to vector<1x32xf32>
    %428 = arith.addf %427, %426 : vector<1x32xf32>
    %429 = arith.divf %427, %428 : vector<1x32xf32>
    %430 = vector.extract_strided_slice %429 {offsets = [0, 0], sizes = [1, 8], strides = [1, 1]} : vector<1x32xf32> to vector<1x8xf32>
    %431 = vector.extract_strided_slice %429 {offsets = [0, 8], sizes = [1, 8], strides = [1, 1]} : vector<1x32xf32> to vector<1x8xf32>
    %432 = vector.extract_strided_slice %429 {offsets = [0, 16], sizes = [1, 8], strides = [1, 1]} : vector<1x32xf32> to vector<1x8xf32>
    %cst_64 = arith.constant 2.000000e+00 : f32
    %433 = vector.broadcast %cst_64 : f32 to vector<1x8xf32>
    %434 = arith.mulf %433, %432 : vector<1x8xf32>
    %cst_65 = arith.constant 1.000000e+00 : f32
    %435 = vector.broadcast %cst_65 : f32 to vector<1x8xf32>
    %436 = arith.subf %434, %435 : vector<1x8xf32>
    %437 = vector.extract_strided_slice %429 {offsets = [0, 24], sizes = [1, 8], strides = [1, 1]} : vector<1x32xf32> to vector<1x8xf32>
    %438 = arith.mulf %431, %401 : vector<1x8xf32>
    %439 = arith.mulf %430, %436 : vector<1x8xf32>
    %440 = arith.addf %438, %439 : vector<1x8xf32>
    %441 = math.tanh %440 : vector<1x8xf32>
    %442 = arith.mulf %437, %441 : vector<1x8xf32>
    %c11 = arith.constant 11 : index
    %c0_66 = arith.constant 0 : index
    %443 = vector.load %arg8[%c11, %c0_66] : memref<30x32xf32, #tpu.memory_space<vmem>>, vector<1x32xf32>
    %444 = vector.extract_strided_slice %442 {offsets = [0, 0], sizes = [1, 1], strides = [1, 1]} : vector<1x8xf32> to vector<1x1xf32>
    %445 = vector.broadcast %444 : vector<1x1xf32> to vector<1x32xf32>
    %446 = arith.mulf %7, %445 : vector<1x32xf32>
    %447 = vector.extract_strided_slice %442 {offsets = [0, 1], sizes = [1, 1], strides = [1, 1]} : vector<1x8xf32> to vector<1x1xf32>
    %448 = vector.broadcast %447 : vector<1x1xf32> to vector<1x32xf32>
    %449 = arith.mulf %8, %448 : vector<1x32xf32>
    %450 = arith.addf %446, %449 : vector<1x32xf32>
    %451 = vector.extract_strided_slice %442 {offsets = [0, 2], sizes = [1, 1], strides = [1, 1]} : vector<1x8xf32> to vector<1x1xf32>
    %452 = vector.broadcast %451 : vector<1x1xf32> to vector<1x32xf32>
    %453 = arith.mulf %9, %452 : vector<1x32xf32>
    %454 = vector.extract_strided_slice %442 {offsets = [0, 3], sizes = [1, 1], strides = [1, 1]} : vector<1x8xf32> to vector<1x1xf32>
    %455 = vector.broadcast %454 : vector<1x1xf32> to vector<1x32xf32>
    %456 = arith.mulf %10, %455 : vector<1x32xf32>
    %457 = arith.addf %453, %456 : vector<1x32xf32>
    %458 = arith.addf %450, %457 : vector<1x32xf32>
    %459 = vector.extract_strided_slice %442 {offsets = [0, 4], sizes = [1, 1], strides = [1, 1]} : vector<1x8xf32> to vector<1x1xf32>
    %460 = vector.broadcast %459 : vector<1x1xf32> to vector<1x32xf32>
    %461 = arith.mulf %11, %460 : vector<1x32xf32>
    %462 = arith.addf %458, %461 : vector<1x32xf32>
    %463 = arith.addf %443, %462 : vector<1x32xf32>
    %464 = arith.negf %463 : vector<1x32xf32>
    %465 = math.exp %464 : vector<1x32xf32>
    %cst_67 = arith.constant 1.000000e+00 : f32
    %466 = vector.broadcast %cst_67 : f32 to vector<1x32xf32>
    %467 = arith.addf %466, %465 : vector<1x32xf32>
    %468 = arith.divf %466, %467 : vector<1x32xf32>
    %469 = vector.extract_strided_slice %468 {offsets = [0, 0], sizes = [1, 8], strides = [1, 1]} : vector<1x32xf32> to vector<1x8xf32>
    %470 = vector.extract_strided_slice %468 {offsets = [0, 8], sizes = [1, 8], strides = [1, 1]} : vector<1x32xf32> to vector<1x8xf32>
    %471 = vector.extract_strided_slice %468 {offsets = [0, 16], sizes = [1, 8], strides = [1, 1]} : vector<1x32xf32> to vector<1x8xf32>
    %cst_68 = arith.constant 2.000000e+00 : f32
    %472 = vector.broadcast %cst_68 : f32 to vector<1x8xf32>
    %473 = arith.mulf %472, %471 : vector<1x8xf32>
    %cst_69 = arith.constant 1.000000e+00 : f32
    %474 = vector.broadcast %cst_69 : f32 to vector<1x8xf32>
    %475 = arith.subf %473, %474 : vector<1x8xf32>
    %476 = vector.extract_strided_slice %468 {offsets = [0, 24], sizes = [1, 8], strides = [1, 1]} : vector<1x32xf32> to vector<1x8xf32>
    %477 = arith.mulf %470, %440 : vector<1x8xf32>
    %478 = arith.mulf %469, %475 : vector<1x8xf32>
    %479 = arith.addf %477, %478 : vector<1x8xf32>
    %480 = math.tanh %479 : vector<1x8xf32>
    %481 = arith.mulf %476, %480 : vector<1x8xf32>
    %c12 = arith.constant 12 : index
    %c0_70 = arith.constant 0 : index
    %482 = vector.load %arg8[%c12, %c0_70] : memref<30x32xf32, #tpu.memory_space<vmem>>, vector<1x32xf32>
    %483 = vector.extract_strided_slice %481 {offsets = [0, 0], sizes = [1, 1], strides = [1, 1]} : vector<1x8xf32> to vector<1x1xf32>
    %484 = vector.broadcast %483 : vector<1x1xf32> to vector<1x32xf32>
    %485 = arith.mulf %7, %484 : vector<1x32xf32>
    %486 = vector.extract_strided_slice %481 {offsets = [0, 1], sizes = [1, 1], strides = [1, 1]} : vector<1x8xf32> to vector<1x1xf32>
    %487 = vector.broadcast %486 : vector<1x1xf32> to vector<1x32xf32>
    %488 = arith.mulf %8, %487 : vector<1x32xf32>
    %489 = arith.addf %485, %488 : vector<1x32xf32>
    %490 = vector.extract_strided_slice %481 {offsets = [0, 2], sizes = [1, 1], strides = [1, 1]} : vector<1x8xf32> to vector<1x1xf32>
    %491 = vector.broadcast %490 : vector<1x1xf32> to vector<1x32xf32>
    %492 = arith.mulf %9, %491 : vector<1x32xf32>
    %493 = vector.extract_strided_slice %481 {offsets = [0, 3], sizes = [1, 1], strides = [1, 1]} : vector<1x8xf32> to vector<1x1xf32>
    %494 = vector.broadcast %493 : vector<1x1xf32> to vector<1x32xf32>
    %495 = arith.mulf %10, %494 : vector<1x32xf32>
    %496 = arith.addf %492, %495 : vector<1x32xf32>
    %497 = arith.addf %489, %496 : vector<1x32xf32>
    %498 = vector.extract_strided_slice %481 {offsets = [0, 4], sizes = [1, 1], strides = [1, 1]} : vector<1x8xf32> to vector<1x1xf32>
    %499 = vector.broadcast %498 : vector<1x1xf32> to vector<1x32xf32>
    %500 = arith.mulf %11, %499 : vector<1x32xf32>
    %501 = arith.addf %497, %500 : vector<1x32xf32>
    %502 = arith.addf %482, %501 : vector<1x32xf32>
    %503 = arith.negf %502 : vector<1x32xf32>
    %504 = math.exp %503 : vector<1x32xf32>
    %cst_71 = arith.constant 1.000000e+00 : f32
    %505 = vector.broadcast %cst_71 : f32 to vector<1x32xf32>
    %506 = arith.addf %505, %504 : vector<1x32xf32>
    %507 = arith.divf %505, %506 : vector<1x32xf32>
    %508 = vector.extract_strided_slice %507 {offsets = [0, 0], sizes = [1, 8], strides = [1, 1]} : vector<1x32xf32> to vector<1x8xf32>
    %509 = vector.extract_strided_slice %507 {offsets = [0, 8], sizes = [1, 8], strides = [1, 1]} : vector<1x32xf32> to vector<1x8xf32>
    %510 = vector.extract_strided_slice %507 {offsets = [0, 16], sizes = [1, 8], strides = [1, 1]} : vector<1x32xf32> to vector<1x8xf32>
    %cst_72 = arith.constant 2.000000e+00 : f32
    %511 = vector.broadcast %cst_72 : f32 to vector<1x8xf32>
    %512 = arith.mulf %511, %510 : vector<1x8xf32>
    %cst_73 = arith.constant 1.000000e+00 : f32
    %513 = vector.broadcast %cst_73 : f32 to vector<1x8xf32>
    %514 = arith.subf %512, %513 : vector<1x8xf32>
    %515 = vector.extract_strided_slice %507 {offsets = [0, 24], sizes = [1, 8], strides = [1, 1]} : vector<1x32xf32> to vector<1x8xf32>
    %516 = arith.mulf %509, %479 : vector<1x8xf32>
    %517 = arith.mulf %508, %514 : vector<1x8xf32>
    %518 = arith.addf %516, %517 : vector<1x8xf32>
    %519 = math.tanh %518 : vector<1x8xf32>
    %520 = arith.mulf %515, %519 : vector<1x8xf32>
    %c13 = arith.constant 13 : index
    %c0_74 = arith.constant 0 : index
    %521 = vector.load %arg8[%c13, %c0_74] : memref<30x32xf32, #tpu.memory_space<vmem>>, vector<1x32xf32>
    %522 = vector.extract_strided_slice %520 {offsets = [0, 0], sizes = [1, 1], strides = [1, 1]} : vector<1x8xf32> to vector<1x1xf32>
    %523 = vector.broadcast %522 : vector<1x1xf32> to vector<1x32xf32>
    %524 = arith.mulf %7, %523 : vector<1x32xf32>
    %525 = vector.extract_strided_slice %520 {offsets = [0, 1], sizes = [1, 1], strides = [1, 1]} : vector<1x8xf32> to vector<1x1xf32>
    %526 = vector.broadcast %525 : vector<1x1xf32> to vector<1x32xf32>
    %527 = arith.mulf %8, %526 : vector<1x32xf32>
    %528 = arith.addf %524, %527 : vector<1x32xf32>
    %529 = vector.extract_strided_slice %520 {offsets = [0, 2], sizes = [1, 1], strides = [1, 1]} : vector<1x8xf32> to vector<1x1xf32>
    %530 = vector.broadcast %529 : vector<1x1xf32> to vector<1x32xf32>
    %531 = arith.mulf %9, %530 : vector<1x32xf32>
    %532 = vector.extract_strided_slice %520 {offsets = [0, 3], sizes = [1, 1], strides = [1, 1]} : vector<1x8xf32> to vector<1x1xf32>
    %533 = vector.broadcast %532 : vector<1x1xf32> to vector<1x32xf32>
    %534 = arith.mulf %10, %533 : vector<1x32xf32>
    %535 = arith.addf %531, %534 : vector<1x32xf32>
    %536 = arith.addf %528, %535 : vector<1x32xf32>
    %537 = vector.extract_strided_slice %520 {offsets = [0, 4], sizes = [1, 1], strides = [1, 1]} : vector<1x8xf32> to vector<1x1xf32>
    %538 = vector.broadcast %537 : vector<1x1xf32> to vector<1x32xf32>
    %539 = arith.mulf %11, %538 : vector<1x32xf32>
    %540 = arith.addf %536, %539 : vector<1x32xf32>
    %541 = arith.addf %521, %540 : vector<1x32xf32>
    %542 = arith.negf %541 : vector<1x32xf32>
    %543 = math.exp %542 : vector<1x32xf32>
    %cst_75 = arith.constant 1.000000e+00 : f32
    %544 = vector.broadcast %cst_75 : f32 to vector<1x32xf32>
    %545 = arith.addf %544, %543 : vector<1x32xf32>
    %546 = arith.divf %544, %545 : vector<1x32xf32>
    %547 = vector.extract_strided_slice %546 {offsets = [0, 0], sizes = [1, 8], strides = [1, 1]} : vector<1x32xf32> to vector<1x8xf32>
    %548 = vector.extract_strided_slice %546 {offsets = [0, 8], sizes = [1, 8], strides = [1, 1]} : vector<1x32xf32> to vector<1x8xf32>
    %549 = vector.extract_strided_slice %546 {offsets = [0, 16], sizes = [1, 8], strides = [1, 1]} : vector<1x32xf32> to vector<1x8xf32>
    %cst_76 = arith.constant 2.000000e+00 : f32
    %550 = vector.broadcast %cst_76 : f32 to vector<1x8xf32>
    %551 = arith.mulf %550, %549 : vector<1x8xf32>
    %cst_77 = arith.constant 1.000000e+00 : f32
    %552 = vector.broadcast %cst_77 : f32 to vector<1x8xf32>
    %553 = arith.subf %551, %552 : vector<1x8xf32>
    %554 = vector.extract_strided_slice %546 {offsets = [0, 24], sizes = [1, 8], strides = [1, 1]} : vector<1x32xf32> to vector<1x8xf32>
    %555 = arith.mulf %548, %518 : vector<1x8xf32>
    %556 = arith.mulf %547, %553 : vector<1x8xf32>
    %557 = arith.addf %555, %556 : vector<1x8xf32>
    %558 = math.tanh %557 : vector<1x8xf32>
    %559 = arith.mulf %554, %558 : vector<1x8xf32>
    %c14 = arith.constant 14 : index
    %c0_78 = arith.constant 0 : index
    %560 = vector.load %arg8[%c14, %c0_78] : memref<30x32xf32, #tpu.memory_space<vmem>>, vector<1x32xf32>
    %561 = vector.extract_strided_slice %559 {offsets = [0, 0], sizes = [1, 1], strides = [1, 1]} : vector<1x8xf32> to vector<1x1xf32>
    %562 = vector.broadcast %561 : vector<1x1xf32> to vector<1x32xf32>
    %563 = arith.mulf %7, %562 : vector<1x32xf32>
    %564 = vector.extract_strided_slice %559 {offsets = [0, 1], sizes = [1, 1], strides = [1, 1]} : vector<1x8xf32> to vector<1x1xf32>
    %565 = vector.broadcast %564 : vector<1x1xf32> to vector<1x32xf32>
    %566 = arith.mulf %8, %565 : vector<1x32xf32>
    %567 = arith.addf %563, %566 : vector<1x32xf32>
    %568 = vector.extract_strided_slice %559 {offsets = [0, 2], sizes = [1, 1], strides = [1, 1]} : vector<1x8xf32> to vector<1x1xf32>
    %569 = vector.broadcast %568 : vector<1x1xf32> to vector<1x32xf32>
    %570 = arith.mulf %9, %569 : vector<1x32xf32>
    %571 = vector.extract_strided_slice %559 {offsets = [0, 3], sizes = [1, 1], strides = [1, 1]} : vector<1x8xf32> to vector<1x1xf32>
    %572 = vector.broadcast %571 : vector<1x1xf32> to vector<1x32xf32>
    %573 = arith.mulf %10, %572 : vector<1x32xf32>
    %574 = arith.addf %570, %573 : vector<1x32xf32>
    %575 = arith.addf %567, %574 : vector<1x32xf32>
    %576 = vector.extract_strided_slice %559 {offsets = [0, 4], sizes = [1, 1], strides = [1, 1]} : vector<1x8xf32> to vector<1x1xf32>
    %577 = vector.broadcast %576 : vector<1x1xf32> to vector<1x32xf32>
    %578 = arith.mulf %11, %577 : vector<1x32xf32>
    %579 = arith.addf %575, %578 : vector<1x32xf32>
    %580 = arith.addf %560, %579 : vector<1x32xf32>
    %581 = arith.negf %580 : vector<1x32xf32>
    %582 = math.exp %581 : vector<1x32xf32>
    %cst_79 = arith.constant 1.000000e+00 : f32
    %583 = vector.broadcast %cst_79 : f32 to vector<1x32xf32>
    %584 = arith.addf %583, %582 : vector<1x32xf32>
    %585 = arith.divf %583, %584 : vector<1x32xf32>
    %586 = vector.extract_strided_slice %585 {offsets = [0, 0], sizes = [1, 8], strides = [1, 1]} : vector<1x32xf32> to vector<1x8xf32>
    %587 = vector.extract_strided_slice %585 {offsets = [0, 8], sizes = [1, 8], strides = [1, 1]} : vector<1x32xf32> to vector<1x8xf32>
    %588 = vector.extract_strided_slice %585 {offsets = [0, 16], sizes = [1, 8], strides = [1, 1]} : vector<1x32xf32> to vector<1x8xf32>
    %cst_80 = arith.constant 2.000000e+00 : f32
    %589 = vector.broadcast %cst_80 : f32 to vector<1x8xf32>
    %590 = arith.mulf %589, %588 : vector<1x8xf32>
    %cst_81 = arith.constant 1.000000e+00 : f32
    %591 = vector.broadcast %cst_81 : f32 to vector<1x8xf32>
    %592 = arith.subf %590, %591 : vector<1x8xf32>
    %593 = vector.extract_strided_slice %585 {offsets = [0, 24], sizes = [1, 8], strides = [1, 1]} : vector<1x32xf32> to vector<1x8xf32>
    %594 = arith.mulf %587, %557 : vector<1x8xf32>
    %595 = arith.mulf %586, %592 : vector<1x8xf32>
    %596 = arith.addf %594, %595 : vector<1x8xf32>
    %597 = math.tanh %596 : vector<1x8xf32>
    %598 = arith.mulf %593, %597 : vector<1x8xf32>
    %c15 = arith.constant 15 : index
    %c0_82 = arith.constant 0 : index
    %599 = vector.load %arg8[%c15, %c0_82] : memref<30x32xf32, #tpu.memory_space<vmem>>, vector<1x32xf32>
    %600 = vector.extract_strided_slice %598 {offsets = [0, 0], sizes = [1, 1], strides = [1, 1]} : vector<1x8xf32> to vector<1x1xf32>
    %601 = vector.broadcast %600 : vector<1x1xf32> to vector<1x32xf32>
    %602 = arith.mulf %7, %601 : vector<1x32xf32>
    %603 = vector.extract_strided_slice %598 {offsets = [0, 1], sizes = [1, 1], strides = [1, 1]} : vector<1x8xf32> to vector<1x1xf32>
    %604 = vector.broadcast %603 : vector<1x1xf32> to vector<1x32xf32>
    %605 = arith.mulf %8, %604 : vector<1x32xf32>
    %606 = arith.addf %602, %605 : vector<1x32xf32>
    %607 = vector.extract_strided_slice %598 {offsets = [0, 2], sizes = [1, 1], strides = [1, 1]} : vector<1x8xf32> to vector<1x1xf32>
    %608 = vector.broadcast %607 : vector<1x1xf32> to vector<1x32xf32>
    %609 = arith.mulf %9, %608 : vector<1x32xf32>
    %610 = vector.extract_strided_slice %598 {offsets = [0, 3], sizes = [1, 1], strides = [1, 1]} : vector<1x8xf32> to vector<1x1xf32>
    %611 = vector.broadcast %610 : vector<1x1xf32> to vector<1x32xf32>
    %612 = arith.mulf %10, %611 : vector<1x32xf32>
    %613 = arith.addf %609, %612 : vector<1x32xf32>
    %614 = arith.addf %606, %613 : vector<1x32xf32>
    %615 = vector.extract_strided_slice %598 {offsets = [0, 4], sizes = [1, 1], strides = [1, 1]} : vector<1x8xf32> to vector<1x1xf32>
    %616 = vector.broadcast %615 : vector<1x1xf32> to vector<1x32xf32>
    %617 = arith.mulf %11, %616 : vector<1x32xf32>
    %618 = arith.addf %614, %617 : vector<1x32xf32>
    %619 = arith.addf %599, %618 : vector<1x32xf32>
    %620 = arith.negf %619 : vector<1x32xf32>
    %621 = math.exp %620 : vector<1x32xf32>
    %cst_83 = arith.constant 1.000000e+00 : f32
    %622 = vector.broadcast %cst_83 : f32 to vector<1x32xf32>
    %623 = arith.addf %622, %621 : vector<1x32xf32>
    %624 = arith.divf %622, %623 : vector<1x32xf32>
    %625 = vector.extract_strided_slice %624 {offsets = [0, 0], sizes = [1, 8], strides = [1, 1]} : vector<1x32xf32> to vector<1x8xf32>
    %626 = vector.extract_strided_slice %624 {offsets = [0, 8], sizes = [1, 8], strides = [1, 1]} : vector<1x32xf32> to vector<1x8xf32>
    %627 = vector.extract_strided_slice %624 {offsets = [0, 16], sizes = [1, 8], strides = [1, 1]} : vector<1x32xf32> to vector<1x8xf32>
    %cst_84 = arith.constant 2.000000e+00 : f32
    %628 = vector.broadcast %cst_84 : f32 to vector<1x8xf32>
    %629 = arith.mulf %628, %627 : vector<1x8xf32>
    %cst_85 = arith.constant 1.000000e+00 : f32
    %630 = vector.broadcast %cst_85 : f32 to vector<1x8xf32>
    %631 = arith.subf %629, %630 : vector<1x8xf32>
    %632 = vector.extract_strided_slice %624 {offsets = [0, 24], sizes = [1, 8], strides = [1, 1]} : vector<1x32xf32> to vector<1x8xf32>
    %633 = arith.mulf %626, %596 : vector<1x8xf32>
    %634 = arith.mulf %625, %631 : vector<1x8xf32>
    %635 = arith.addf %633, %634 : vector<1x8xf32>
    %636 = math.tanh %635 : vector<1x8xf32>
    %637 = arith.mulf %632, %636 : vector<1x8xf32>
    %c16 = arith.constant 16 : index
    %c0_86 = arith.constant 0 : index
    %638 = vector.load %arg8[%c16, %c0_86] : memref<30x32xf32, #tpu.memory_space<vmem>>, vector<1x32xf32>
    %639 = vector.extract_strided_slice %637 {offsets = [0, 0], sizes = [1, 1], strides = [1, 1]} : vector<1x8xf32> to vector<1x1xf32>
    %640 = vector.broadcast %639 : vector<1x1xf32> to vector<1x32xf32>
    %641 = arith.mulf %7, %640 : vector<1x32xf32>
    %642 = vector.extract_strided_slice %637 {offsets = [0, 1], sizes = [1, 1], strides = [1, 1]} : vector<1x8xf32> to vector<1x1xf32>
    %643 = vector.broadcast %642 : vector<1x1xf32> to vector<1x32xf32>
    %644 = arith.mulf %8, %643 : vector<1x32xf32>
    %645 = arith.addf %641, %644 : vector<1x32xf32>
    %646 = vector.extract_strided_slice %637 {offsets = [0, 2], sizes = [1, 1], strides = [1, 1]} : vector<1x8xf32> to vector<1x1xf32>
    %647 = vector.broadcast %646 : vector<1x1xf32> to vector<1x32xf32>
    %648 = arith.mulf %9, %647 : vector<1x32xf32>
    %649 = vector.extract_strided_slice %637 {offsets = [0, 3], sizes = [1, 1], strides = [1, 1]} : vector<1x8xf32> to vector<1x1xf32>
    %650 = vector.broadcast %649 : vector<1x1xf32> to vector<1x32xf32>
    %651 = arith.mulf %10, %650 : vector<1x32xf32>
    %652 = arith.addf %648, %651 : vector<1x32xf32>
    %653 = arith.addf %645, %652 : vector<1x32xf32>
    %654 = vector.extract_strided_slice %637 {offsets = [0, 4], sizes = [1, 1], strides = [1, 1]} : vector<1x8xf32> to vector<1x1xf32>
    %655 = vector.broadcast %654 : vector<1x1xf32> to vector<1x32xf32>
    %656 = arith.mulf %11, %655 : vector<1x32xf32>
    %657 = arith.addf %653, %656 : vector<1x32xf32>
    %658 = arith.addf %638, %657 : vector<1x32xf32>
    %659 = arith.negf %658 : vector<1x32xf32>
    %660 = math.exp %659 : vector<1x32xf32>
    %cst_87 = arith.constant 1.000000e+00 : f32
    %661 = vector.broadcast %cst_87 : f32 to vector<1x32xf32>
    %662 = arith.addf %661, %660 : vector<1x32xf32>
    %663 = arith.divf %661, %662 : vector<1x32xf32>
    %664 = vector.extract_strided_slice %663 {offsets = [0, 0], sizes = [1, 8], strides = [1, 1]} : vector<1x32xf32> to vector<1x8xf32>
    %665 = vector.extract_strided_slice %663 {offsets = [0, 8], sizes = [1, 8], strides = [1, 1]} : vector<1x32xf32> to vector<1x8xf32>
    %666 = vector.extract_strided_slice %663 {offsets = [0, 16], sizes = [1, 8], strides = [1, 1]} : vector<1x32xf32> to vector<1x8xf32>
    %cst_88 = arith.constant 2.000000e+00 : f32
    %667 = vector.broadcast %cst_88 : f32 to vector<1x8xf32>
    %668 = arith.mulf %667, %666 : vector<1x8xf32>
    %cst_89 = arith.constant 1.000000e+00 : f32
    %669 = vector.broadcast %cst_89 : f32 to vector<1x8xf32>
    %670 = arith.subf %668, %669 : vector<1x8xf32>
    %671 = vector.extract_strided_slice %663 {offsets = [0, 24], sizes = [1, 8], strides = [1, 1]} : vector<1x32xf32> to vector<1x8xf32>
    %672 = arith.mulf %665, %635 : vector<1x8xf32>
    %673 = arith.mulf %664, %670 : vector<1x8xf32>
    %674 = arith.addf %672, %673 : vector<1x8xf32>
    %675 = math.tanh %674 : vector<1x8xf32>
    %676 = arith.mulf %671, %675 : vector<1x8xf32>
    %c17 = arith.constant 17 : index
    %c0_90 = arith.constant 0 : index
    %677 = vector.load %arg8[%c17, %c0_90] : memref<30x32xf32, #tpu.memory_space<vmem>>, vector<1x32xf32>
    %678 = vector.extract_strided_slice %676 {offsets = [0, 0], sizes = [1, 1], strides = [1, 1]} : vector<1x8xf32> to vector<1x1xf32>
    %679 = vector.broadcast %678 : vector<1x1xf32> to vector<1x32xf32>
    %680 = arith.mulf %7, %679 : vector<1x32xf32>
    %681 = vector.extract_strided_slice %676 {offsets = [0, 1], sizes = [1, 1], strides = [1, 1]} : vector<1x8xf32> to vector<1x1xf32>
    %682 = vector.broadcast %681 : vector<1x1xf32> to vector<1x32xf32>
    %683 = arith.mulf %8, %682 : vector<1x32xf32>
    %684 = arith.addf %680, %683 : vector<1x32xf32>
    %685 = vector.extract_strided_slice %676 {offsets = [0, 2], sizes = [1, 1], strides = [1, 1]} : vector<1x8xf32> to vector<1x1xf32>
    %686 = vector.broadcast %685 : vector<1x1xf32> to vector<1x32xf32>
    %687 = arith.mulf %9, %686 : vector<1x32xf32>
    %688 = vector.extract_strided_slice %676 {offsets = [0, 3], sizes = [1, 1], strides = [1, 1]} : vector<1x8xf32> to vector<1x1xf32>
    %689 = vector.broadcast %688 : vector<1x1xf32> to vector<1x32xf32>
    %690 = arith.mulf %10, %689 : vector<1x32xf32>
    %691 = arith.addf %687, %690 : vector<1x32xf32>
    %692 = arith.addf %684, %691 : vector<1x32xf32>
    %693 = vector.extract_strided_slice %676 {offsets = [0, 4], sizes = [1, 1], strides = [1, 1]} : vector<1x8xf32> to vector<1x1xf32>
    %694 = vector.broadcast %693 : vector<1x1xf32> to vector<1x32xf32>
    %695 = arith.mulf %11, %694 : vector<1x32xf32>
    %696 = arith.addf %692, %695 : vector<1x32xf32>
    %697 = arith.addf %677, %696 : vector<1x32xf32>
    %698 = arith.negf %697 : vector<1x32xf32>
    %699 = math.exp %698 : vector<1x32xf32>
    %cst_91 = arith.constant 1.000000e+00 : f32
    %700 = vector.broadcast %cst_91 : f32 to vector<1x32xf32>
    %701 = arith.addf %700, %699 : vector<1x32xf32>
    %702 = arith.divf %700, %701 : vector<1x32xf32>
    %703 = vector.extract_strided_slice %702 {offsets = [0, 0], sizes = [1, 8], strides = [1, 1]} : vector<1x32xf32> to vector<1x8xf32>
    %704 = vector.extract_strided_slice %702 {offsets = [0, 8], sizes = [1, 8], strides = [1, 1]} : vector<1x32xf32> to vector<1x8xf32>
    %705 = vector.extract_strided_slice %702 {offsets = [0, 16], sizes = [1, 8], strides = [1, 1]} : vector<1x32xf32> to vector<1x8xf32>
    %cst_92 = arith.constant 2.000000e+00 : f32
    %706 = vector.broadcast %cst_92 : f32 to vector<1x8xf32>
    %707 = arith.mulf %706, %705 : vector<1x8xf32>
    %cst_93 = arith.constant 1.000000e+00 : f32
    %708 = vector.broadcast %cst_93 : f32 to vector<1x8xf32>
    %709 = arith.subf %707, %708 : vector<1x8xf32>
    %710 = vector.extract_strided_slice %702 {offsets = [0, 24], sizes = [1, 8], strides = [1, 1]} : vector<1x32xf32> to vector<1x8xf32>
    %711 = arith.mulf %704, %674 : vector<1x8xf32>
    %712 = arith.mulf %703, %709 : vector<1x8xf32>
    %713 = arith.addf %711, %712 : vector<1x8xf32>
    %714 = math.tanh %713 : vector<1x8xf32>
    %715 = arith.mulf %710, %714 : vector<1x8xf32>
    %c18 = arith.constant 18 : index
    %c0_94 = arith.constant 0 : index
    %716 = vector.load %arg8[%c18, %c0_94] : memref<30x32xf32, #tpu.memory_space<vmem>>, vector<1x32xf32>
    %717 = vector.extract_strided_slice %715 {offsets = [0, 0], sizes = [1, 1], strides = [1, 1]} : vector<1x8xf32> to vector<1x1xf32>
    %718 = vector.broadcast %717 : vector<1x1xf32> to vector<1x32xf32>
    %719 = arith.mulf %7, %718 : vector<1x32xf32>
    %720 = vector.extract_strided_slice %715 {offsets = [0, 1], sizes = [1, 1], strides = [1, 1]} : vector<1x8xf32> to vector<1x1xf32>
    %721 = vector.broadcast %720 : vector<1x1xf32> to vector<1x32xf32>
    %722 = arith.mulf %8, %721 : vector<1x32xf32>
    %723 = arith.addf %719, %722 : vector<1x32xf32>
    %724 = vector.extract_strided_slice %715 {offsets = [0, 2], sizes = [1, 1], strides = [1, 1]} : vector<1x8xf32> to vector<1x1xf32>
    %725 = vector.broadcast %724 : vector<1x1xf32> to vector<1x32xf32>
    %726 = arith.mulf %9, %725 : vector<1x32xf32>
    %727 = vector.extract_strided_slice %715 {offsets = [0, 3], sizes = [1, 1], strides = [1, 1]} : vector<1x8xf32> to vector<1x1xf32>
    %728 = vector.broadcast %727 : vector<1x1xf32> to vector<1x32xf32>
    %729 = arith.mulf %10, %728 : vector<1x32xf32>
    %730 = arith.addf %726, %729 : vector<1x32xf32>
    %731 = arith.addf %723, %730 : vector<1x32xf32>
    %732 = vector.extract_strided_slice %715 {offsets = [0, 4], sizes = [1, 1], strides = [1, 1]} : vector<1x8xf32> to vector<1x1xf32>
    %733 = vector.broadcast %732 : vector<1x1xf32> to vector<1x32xf32>
    %734 = arith.mulf %11, %733 : vector<1x32xf32>
    %735 = arith.addf %731, %734 : vector<1x32xf32>
    %736 = arith.addf %716, %735 : vector<1x32xf32>
    %737 = arith.negf %736 : vector<1x32xf32>
    %738 = math.exp %737 : vector<1x32xf32>
    %cst_95 = arith.constant 1.000000e+00 : f32
    %739 = vector.broadcast %cst_95 : f32 to vector<1x32xf32>
    %740 = arith.addf %739, %738 : vector<1x32xf32>
    %741 = arith.divf %739, %740 : vector<1x32xf32>
    %742 = vector.extract_strided_slice %741 {offsets = [0, 0], sizes = [1, 8], strides = [1, 1]} : vector<1x32xf32> to vector<1x8xf32>
    %743 = vector.extract_strided_slice %741 {offsets = [0, 8], sizes = [1, 8], strides = [1, 1]} : vector<1x32xf32> to vector<1x8xf32>
    %744 = vector.extract_strided_slice %741 {offsets = [0, 16], sizes = [1, 8], strides = [1, 1]} : vector<1x32xf32> to vector<1x8xf32>
    %cst_96 = arith.constant 2.000000e+00 : f32
    %745 = vector.broadcast %cst_96 : f32 to vector<1x8xf32>
    %746 = arith.mulf %745, %744 : vector<1x8xf32>
    %cst_97 = arith.constant 1.000000e+00 : f32
    %747 = vector.broadcast %cst_97 : f32 to vector<1x8xf32>
    %748 = arith.subf %746, %747 : vector<1x8xf32>
    %749 = vector.extract_strided_slice %741 {offsets = [0, 24], sizes = [1, 8], strides = [1, 1]} : vector<1x32xf32> to vector<1x8xf32>
    %750 = arith.mulf %743, %713 : vector<1x8xf32>
    %751 = arith.mulf %742, %748 : vector<1x8xf32>
    %752 = arith.addf %750, %751 : vector<1x8xf32>
    %753 = math.tanh %752 : vector<1x8xf32>
    %754 = arith.mulf %749, %753 : vector<1x8xf32>
    %c19 = arith.constant 19 : index
    %c0_98 = arith.constant 0 : index
    %755 = vector.load %arg8[%c19, %c0_98] : memref<30x32xf32, #tpu.memory_space<vmem>>, vector<1x32xf32>
    %756 = vector.extract_strided_slice %754 {offsets = [0, 0], sizes = [1, 1], strides = [1, 1]} : vector<1x8xf32> to vector<1x1xf32>
    %757 = vector.broadcast %756 : vector<1x1xf32> to vector<1x32xf32>
    %758 = arith.mulf %7, %757 : vector<1x32xf32>
    %759 = vector.extract_strided_slice %754 {offsets = [0, 1], sizes = [1, 1], strides = [1, 1]} : vector<1x8xf32> to vector<1x1xf32>
    %760 = vector.broadcast %759 : vector<1x1xf32> to vector<1x32xf32>
    %761 = arith.mulf %8, %760 : vector<1x32xf32>
    %762 = arith.addf %758, %761 : vector<1x32xf32>
    %763 = vector.extract_strided_slice %754 {offsets = [0, 2], sizes = [1, 1], strides = [1, 1]} : vector<1x8xf32> to vector<1x1xf32>
    %764 = vector.broadcast %763 : vector<1x1xf32> to vector<1x32xf32>
    %765 = arith.mulf %9, %764 : vector<1x32xf32>
    %766 = vector.extract_strided_slice %754 {offsets = [0, 3], sizes = [1, 1], strides = [1, 1]} : vector<1x8xf32> to vector<1x1xf32>
    %767 = vector.broadcast %766 : vector<1x1xf32> to vector<1x32xf32>
    %768 = arith.mulf %10, %767 : vector<1x32xf32>
    %769 = arith.addf %765, %768 : vector<1x32xf32>
    %770 = arith.addf %762, %769 : vector<1x32xf32>
    %771 = vector.extract_strided_slice %754 {offsets = [0, 4], sizes = [1, 1], strides = [1, 1]} : vector<1x8xf32> to vector<1x1xf32>
    %772 = vector.broadcast %771 : vector<1x1xf32> to vector<1x32xf32>
    %773 = arith.mulf %11, %772 : vector<1x32xf32>
    %774 = arith.addf %770, %773 : vector<1x32xf32>
    %775 = arith.addf %755, %774 : vector<1x32xf32>
    %776 = arith.negf %775 : vector<1x32xf32>
    %777 = math.exp %776 : vector<1x32xf32>
    %cst_99 = arith.constant 1.000000e+00 : f32
    %778 = vector.broadcast %cst_99 : f32 to vector<1x32xf32>
    %779 = arith.addf %778, %777 : vector<1x32xf32>
    %780 = arith.divf %778, %779 : vector<1x32xf32>
    %781 = vector.extract_strided_slice %780 {offsets = [0, 0], sizes = [1, 8], strides = [1, 1]} : vector<1x32xf32> to vector<1x8xf32>
    %782 = vector.extract_strided_slice %780 {offsets = [0, 8], sizes = [1, 8], strides = [1, 1]} : vector<1x32xf32> to vector<1x8xf32>
    %783 = vector.extract_strided_slice %780 {offsets = [0, 16], sizes = [1, 8], strides = [1, 1]} : vector<1x32xf32> to vector<1x8xf32>
    %cst_100 = arith.constant 2.000000e+00 : f32
    %784 = vector.broadcast %cst_100 : f32 to vector<1x8xf32>
    %785 = arith.mulf %784, %783 : vector<1x8xf32>
    %cst_101 = arith.constant 1.000000e+00 : f32
    %786 = vector.broadcast %cst_101 : f32 to vector<1x8xf32>
    %787 = arith.subf %785, %786 : vector<1x8xf32>
    %788 = vector.extract_strided_slice %780 {offsets = [0, 24], sizes = [1, 8], strides = [1, 1]} : vector<1x32xf32> to vector<1x8xf32>
    %789 = arith.mulf %782, %752 : vector<1x8xf32>
    %790 = arith.mulf %781, %787 : vector<1x8xf32>
    %791 = arith.addf %789, %790 : vector<1x8xf32>
    %792 = math.tanh %791 : vector<1x8xf32>
    %793 = arith.mulf %788, %792 : vector<1x8xf32>
    %c20 = arith.constant 20 : index
    %c0_102 = arith.constant 0 : index
    %794 = vector.load %arg8[%c20, %c0_102] : memref<30x32xf32, #tpu.memory_space<vmem>>, vector<1x32xf32>
    %795 = vector.extract_strided_slice %793 {offsets = [0, 0], sizes = [1, 1], strides = [1, 1]} : vector<1x8xf32> to vector<1x1xf32>
    %796 = vector.broadcast %795 : vector<1x1xf32> to vector<1x32xf32>
    %797 = arith.mulf %7, %796 : vector<1x32xf32>
    %798 = vector.extract_strided_slice %793 {offsets = [0, 1], sizes = [1, 1], strides = [1, 1]} : vector<1x8xf32> to vector<1x1xf32>
    %799 = vector.broadcast %798 : vector<1x1xf32> to vector<1x32xf32>
    %800 = arith.mulf %8, %799 : vector<1x32xf32>
    %801 = arith.addf %797, %800 : vector<1x32xf32>
    %802 = vector.extract_strided_slice %793 {offsets = [0, 2], sizes = [1, 1], strides = [1, 1]} : vector<1x8xf32> to vector<1x1xf32>
    %803 = vector.broadcast %802 : vector<1x1xf32> to vector<1x32xf32>
    %804 = arith.mulf %9, %803 : vector<1x32xf32>
    %805 = vector.extract_strided_slice %793 {offsets = [0, 3], sizes = [1, 1], strides = [1, 1]} : vector<1x8xf32> to vector<1x1xf32>
    %806 = vector.broadcast %805 : vector<1x1xf32> to vector<1x32xf32>
    %807 = arith.mulf %10, %806 : vector<1x32xf32>
    %808 = arith.addf %804, %807 : vector<1x32xf32>
    %809 = arith.addf %801, %808 : vector<1x32xf32>
    %810 = vector.extract_strided_slice %793 {offsets = [0, 4], sizes = [1, 1], strides = [1, 1]} : vector<1x8xf32> to vector<1x1xf32>
    %811 = vector.broadcast %810 : vector<1x1xf32> to vector<1x32xf32>
    %812 = arith.mulf %11, %811 : vector<1x32xf32>
    %813 = arith.addf %809, %812 : vector<1x32xf32>
    %814 = arith.addf %794, %813 : vector<1x32xf32>
    %815 = arith.negf %814 : vector<1x32xf32>
    %816 = math.exp %815 : vector<1x32xf32>
    %cst_103 = arith.constant 1.000000e+00 : f32
    %817 = vector.broadcast %cst_103 : f32 to vector<1x32xf32>
    %818 = arith.addf %817, %816 : vector<1x32xf32>
    %819 = arith.divf %817, %818 : vector<1x32xf32>
    %820 = vector.extract_strided_slice %819 {offsets = [0, 0], sizes = [1, 8], strides = [1, 1]} : vector<1x32xf32> to vector<1x8xf32>
    %821 = vector.extract_strided_slice %819 {offsets = [0, 8], sizes = [1, 8], strides = [1, 1]} : vector<1x32xf32> to vector<1x8xf32>
    %822 = vector.extract_strided_slice %819 {offsets = [0, 16], sizes = [1, 8], strides = [1, 1]} : vector<1x32xf32> to vector<1x8xf32>
    %cst_104 = arith.constant 2.000000e+00 : f32
    %823 = vector.broadcast %cst_104 : f32 to vector<1x8xf32>
    %824 = arith.mulf %823, %822 : vector<1x8xf32>
    %cst_105 = arith.constant 1.000000e+00 : f32
    %825 = vector.broadcast %cst_105 : f32 to vector<1x8xf32>
    %826 = arith.subf %824, %825 : vector<1x8xf32>
    %827 = vector.extract_strided_slice %819 {offsets = [0, 24], sizes = [1, 8], strides = [1, 1]} : vector<1x32xf32> to vector<1x8xf32>
    %828 = arith.mulf %821, %791 : vector<1x8xf32>
    %829 = arith.mulf %820, %826 : vector<1x8xf32>
    %830 = arith.addf %828, %829 : vector<1x8xf32>
    %831 = math.tanh %830 : vector<1x8xf32>
    %832 = arith.mulf %827, %831 : vector<1x8xf32>
    %c21 = arith.constant 21 : index
    %c0_106 = arith.constant 0 : index
    %833 = vector.load %arg8[%c21, %c0_106] : memref<30x32xf32, #tpu.memory_space<vmem>>, vector<1x32xf32>
    %834 = vector.extract_strided_slice %832 {offsets = [0, 0], sizes = [1, 1], strides = [1, 1]} : vector<1x8xf32> to vector<1x1xf32>
    %835 = vector.broadcast %834 : vector<1x1xf32> to vector<1x32xf32>
    %836 = arith.mulf %7, %835 : vector<1x32xf32>
    %837 = vector.extract_strided_slice %832 {offsets = [0, 1], sizes = [1, 1], strides = [1, 1]} : vector<1x8xf32> to vector<1x1xf32>
    %838 = vector.broadcast %837 : vector<1x1xf32> to vector<1x32xf32>
    %839 = arith.mulf %8, %838 : vector<1x32xf32>
    %840 = arith.addf %836, %839 : vector<1x32xf32>
    %841 = vector.extract_strided_slice %832 {offsets = [0, 2], sizes = [1, 1], strides = [1, 1]} : vector<1x8xf32> to vector<1x1xf32>
    %842 = vector.broadcast %841 : vector<1x1xf32> to vector<1x32xf32>
    %843 = arith.mulf %9, %842 : vector<1x32xf32>
    %844 = vector.extract_strided_slice %832 {offsets = [0, 3], sizes = [1, 1], strides = [1, 1]} : vector<1x8xf32> to vector<1x1xf32>
    %845 = vector.broadcast %844 : vector<1x1xf32> to vector<1x32xf32>
    %846 = arith.mulf %10, %845 : vector<1x32xf32>
    %847 = arith.addf %843, %846 : vector<1x32xf32>
    %848 = arith.addf %840, %847 : vector<1x32xf32>
    %849 = vector.extract_strided_slice %832 {offsets = [0, 4], sizes = [1, 1], strides = [1, 1]} : vector<1x8xf32> to vector<1x1xf32>
    %850 = vector.broadcast %849 : vector<1x1xf32> to vector<1x32xf32>
    %851 = arith.mulf %11, %850 : vector<1x32xf32>
    %852 = arith.addf %848, %851 : vector<1x32xf32>
    %853 = arith.addf %833, %852 : vector<1x32xf32>
    %854 = arith.negf %853 : vector<1x32xf32>
    %855 = math.exp %854 : vector<1x32xf32>
    %cst_107 = arith.constant 1.000000e+00 : f32
    %856 = vector.broadcast %cst_107 : f32 to vector<1x32xf32>
    %857 = arith.addf %856, %855 : vector<1x32xf32>
    %858 = arith.divf %856, %857 : vector<1x32xf32>
    %859 = vector.extract_strided_slice %858 {offsets = [0, 0], sizes = [1, 8], strides = [1, 1]} : vector<1x32xf32> to vector<1x8xf32>
    %860 = vector.extract_strided_slice %858 {offsets = [0, 8], sizes = [1, 8], strides = [1, 1]} : vector<1x32xf32> to vector<1x8xf32>
    %861 = vector.extract_strided_slice %858 {offsets = [0, 16], sizes = [1, 8], strides = [1, 1]} : vector<1x32xf32> to vector<1x8xf32>
    %cst_108 = arith.constant 2.000000e+00 : f32
    %862 = vector.broadcast %cst_108 : f32 to vector<1x8xf32>
    %863 = arith.mulf %862, %861 : vector<1x8xf32>
    %cst_109 = arith.constant 1.000000e+00 : f32
    %864 = vector.broadcast %cst_109 : f32 to vector<1x8xf32>
    %865 = arith.subf %863, %864 : vector<1x8xf32>
    %866 = vector.extract_strided_slice %858 {offsets = [0, 24], sizes = [1, 8], strides = [1, 1]} : vector<1x32xf32> to vector<1x8xf32>
    %867 = arith.mulf %860, %830 : vector<1x8xf32>
    %868 = arith.mulf %859, %865 : vector<1x8xf32>
    %869 = arith.addf %867, %868 : vector<1x8xf32>
    %870 = math.tanh %869 : vector<1x8xf32>
    %871 = arith.mulf %866, %870 : vector<1x8xf32>
    %c22 = arith.constant 22 : index
    %c0_110 = arith.constant 0 : index
    %872 = vector.load %arg8[%c22, %c0_110] : memref<30x32xf32, #tpu.memory_space<vmem>>, vector<1x32xf32>
    %873 = vector.extract_strided_slice %871 {offsets = [0, 0], sizes = [1, 1], strides = [1, 1]} : vector<1x8xf32> to vector<1x1xf32>
    %874 = vector.broadcast %873 : vector<1x1xf32> to vector<1x32xf32>
    %875 = arith.mulf %7, %874 : vector<1x32xf32>
    %876 = vector.extract_strided_slice %871 {offsets = [0, 1], sizes = [1, 1], strides = [1, 1]} : vector<1x8xf32> to vector<1x1xf32>
    %877 = vector.broadcast %876 : vector<1x1xf32> to vector<1x32xf32>
    %878 = arith.mulf %8, %877 : vector<1x32xf32>
    %879 = arith.addf %875, %878 : vector<1x32xf32>
    %880 = vector.extract_strided_slice %871 {offsets = [0, 2], sizes = [1, 1], strides = [1, 1]} : vector<1x8xf32> to vector<1x1xf32>
    %881 = vector.broadcast %880 : vector<1x1xf32> to vector<1x32xf32>
    %882 = arith.mulf %9, %881 : vector<1x32xf32>
    %883 = vector.extract_strided_slice %871 {offsets = [0, 3], sizes = [1, 1], strides = [1, 1]} : vector<1x8xf32> to vector<1x1xf32>
    %884 = vector.broadcast %883 : vector<1x1xf32> to vector<1x32xf32>
    %885 = arith.mulf %10, %884 : vector<1x32xf32>
    %886 = arith.addf %882, %885 : vector<1x32xf32>
    %887 = arith.addf %879, %886 : vector<1x32xf32>
    %888 = vector.extract_strided_slice %871 {offsets = [0, 4], sizes = [1, 1], strides = [1, 1]} : vector<1x8xf32> to vector<1x1xf32>
    %889 = vector.broadcast %888 : vector<1x1xf32> to vector<1x32xf32>
    %890 = arith.mulf %11, %889 : vector<1x32xf32>
    %891 = arith.addf %887, %890 : vector<1x32xf32>
    %892 = arith.addf %872, %891 : vector<1x32xf32>
    %893 = arith.negf %892 : vector<1x32xf32>
    %894 = math.exp %893 : vector<1x32xf32>
    %cst_111 = arith.constant 1.000000e+00 : f32
    %895 = vector.broadcast %cst_111 : f32 to vector<1x32xf32>
    %896 = arith.addf %895, %894 : vector<1x32xf32>
    %897 = arith.divf %895, %896 : vector<1x32xf32>
    %898 = vector.extract_strided_slice %897 {offsets = [0, 0], sizes = [1, 8], strides = [1, 1]} : vector<1x32xf32> to vector<1x8xf32>
    %899 = vector.extract_strided_slice %897 {offsets = [0, 8], sizes = [1, 8], strides = [1, 1]} : vector<1x32xf32> to vector<1x8xf32>
    %900 = vector.extract_strided_slice %897 {offsets = [0, 16], sizes = [1, 8], strides = [1, 1]} : vector<1x32xf32> to vector<1x8xf32>
    %cst_112 = arith.constant 2.000000e+00 : f32
    %901 = vector.broadcast %cst_112 : f32 to vector<1x8xf32>
    %902 = arith.mulf %901, %900 : vector<1x8xf32>
    %cst_113 = arith.constant 1.000000e+00 : f32
    %903 = vector.broadcast %cst_113 : f32 to vector<1x8xf32>
    %904 = arith.subf %902, %903 : vector<1x8xf32>
    %905 = vector.extract_strided_slice %897 {offsets = [0, 24], sizes = [1, 8], strides = [1, 1]} : vector<1x32xf32> to vector<1x8xf32>
    %906 = arith.mulf %899, %869 : vector<1x8xf32>
    %907 = arith.mulf %898, %904 : vector<1x8xf32>
    %908 = arith.addf %906, %907 : vector<1x8xf32>
    %909 = math.tanh %908 : vector<1x8xf32>
    %910 = arith.mulf %905, %909 : vector<1x8xf32>
    %c23 = arith.constant 23 : index
    %c0_114 = arith.constant 0 : index
    %911 = vector.load %arg8[%c23, %c0_114] : memref<30x32xf32, #tpu.memory_space<vmem>>, vector<1x32xf32>
    %912 = vector.extract_strided_slice %910 {offsets = [0, 0], sizes = [1, 1], strides = [1, 1]} : vector<1x8xf32> to vector<1x1xf32>
    %913 = vector.broadcast %912 : vector<1x1xf32> to vector<1x32xf32>
    %914 = arith.mulf %7, %913 : vector<1x32xf32>
    %915 = vector.extract_strided_slice %910 {offsets = [0, 1], sizes = [1, 1], strides = [1, 1]} : vector<1x8xf32> to vector<1x1xf32>
    %916 = vector.broadcast %915 : vector<1x1xf32> to vector<1x32xf32>
    %917 = arith.mulf %8, %916 : vector<1x32xf32>
    %918 = arith.addf %914, %917 : vector<1x32xf32>
    %919 = vector.extract_strided_slice %910 {offsets = [0, 2], sizes = [1, 1], strides = [1, 1]} : vector<1x8xf32> to vector<1x1xf32>
    %920 = vector.broadcast %919 : vector<1x1xf32> to vector<1x32xf32>
    %921 = arith.mulf %9, %920 : vector<1x32xf32>
    %922 = vector.extract_strided_slice %910 {offsets = [0, 3], sizes = [1, 1], strides = [1, 1]} : vector<1x8xf32> to vector<1x1xf32>
    %923 = vector.broadcast %922 : vector<1x1xf32> to vector<1x32xf32>
    %924 = arith.mulf %10, %923 : vector<1x32xf32>
    %925 = arith.addf %921, %924 : vector<1x32xf32>
    %926 = arith.addf %918, %925 : vector<1x32xf32>
    %927 = vector.extract_strided_slice %910 {offsets = [0, 4], sizes = [1, 1], strides = [1, 1]} : vector<1x8xf32> to vector<1x1xf32>
    %928 = vector.broadcast %927 : vector<1x1xf32> to vector<1x32xf32>
    %929 = arith.mulf %11, %928 : vector<1x32xf32>
    %930 = arith.addf %926, %929 : vector<1x32xf32>
    %931 = arith.addf %911, %930 : vector<1x32xf32>
    %932 = arith.negf %931 : vector<1x32xf32>
    %933 = math.exp %932 : vector<1x32xf32>
    %cst_115 = arith.constant 1.000000e+00 : f32
    %934 = vector.broadcast %cst_115 : f32 to vector<1x32xf32>
    %935 = arith.addf %934, %933 : vector<1x32xf32>
    %936 = arith.divf %934, %935 : vector<1x32xf32>
    %937 = vector.extract_strided_slice %936 {offsets = [0, 0], sizes = [1, 8], strides = [1, 1]} : vector<1x32xf32> to vector<1x8xf32>
    %938 = vector.extract_strided_slice %936 {offsets = [0, 8], sizes = [1, 8], strides = [1, 1]} : vector<1x32xf32> to vector<1x8xf32>
    %939 = vector.extract_strided_slice %936 {offsets = [0, 16], sizes = [1, 8], strides = [1, 1]} : vector<1x32xf32> to vector<1x8xf32>
    %cst_116 = arith.constant 2.000000e+00 : f32
    %940 = vector.broadcast %cst_116 : f32 to vector<1x8xf32>
    %941 = arith.mulf %940, %939 : vector<1x8xf32>
    %cst_117 = arith.constant 1.000000e+00 : f32
    %942 = vector.broadcast %cst_117 : f32 to vector<1x8xf32>
    %943 = arith.subf %941, %942 : vector<1x8xf32>
    %944 = vector.extract_strided_slice %936 {offsets = [0, 24], sizes = [1, 8], strides = [1, 1]} : vector<1x32xf32> to vector<1x8xf32>
    %945 = arith.mulf %938, %908 : vector<1x8xf32>
    %946 = arith.mulf %937, %943 : vector<1x8xf32>
    %947 = arith.addf %945, %946 : vector<1x8xf32>
    %948 = math.tanh %947 : vector<1x8xf32>
    %949 = arith.mulf %944, %948 : vector<1x8xf32>
    %c24 = arith.constant 24 : index
    %c0_118 = arith.constant 0 : index
    %950 = vector.load %arg8[%c24, %c0_118] : memref<30x32xf32, #tpu.memory_space<vmem>>, vector<1x32xf32>
    %951 = vector.extract_strided_slice %949 {offsets = [0, 0], sizes = [1, 1], strides = [1, 1]} : vector<1x8xf32> to vector<1x1xf32>
    %952 = vector.broadcast %951 : vector<1x1xf32> to vector<1x32xf32>
    %953 = arith.mulf %7, %952 : vector<1x32xf32>
    %954 = vector.extract_strided_slice %949 {offsets = [0, 1], sizes = [1, 1], strides = [1, 1]} : vector<1x8xf32> to vector<1x1xf32>
    %955 = vector.broadcast %954 : vector<1x1xf32> to vector<1x32xf32>
    %956 = arith.mulf %8, %955 : vector<1x32xf32>
    %957 = arith.addf %953, %956 : vector<1x32xf32>
    %958 = vector.extract_strided_slice %949 {offsets = [0, 2], sizes = [1, 1], strides = [1, 1]} : vector<1x8xf32> to vector<1x1xf32>
    %959 = vector.broadcast %958 : vector<1x1xf32> to vector<1x32xf32>
    %960 = arith.mulf %9, %959 : vector<1x32xf32>
    %961 = vector.extract_strided_slice %949 {offsets = [0, 3], sizes = [1, 1], strides = [1, 1]} : vector<1x8xf32> to vector<1x1xf32>
    %962 = vector.broadcast %961 : vector<1x1xf32> to vector<1x32xf32>
    %963 = arith.mulf %10, %962 : vector<1x32xf32>
    %964 = arith.addf %960, %963 : vector<1x32xf32>
    %965 = arith.addf %957, %964 : vector<1x32xf32>
    %966 = vector.extract_strided_slice %949 {offsets = [0, 4], sizes = [1, 1], strides = [1, 1]} : vector<1x8xf32> to vector<1x1xf32>
    %967 = vector.broadcast %966 : vector<1x1xf32> to vector<1x32xf32>
    %968 = arith.mulf %11, %967 : vector<1x32xf32>
    %969 = arith.addf %965, %968 : vector<1x32xf32>
    %970 = arith.addf %950, %969 : vector<1x32xf32>
    %971 = arith.negf %970 : vector<1x32xf32>
    %972 = math.exp %971 : vector<1x32xf32>
    %cst_119 = arith.constant 1.000000e+00 : f32
    %973 = vector.broadcast %cst_119 : f32 to vector<1x32xf32>
    %974 = arith.addf %973, %972 : vector<1x32xf32>
    %975 = arith.divf %973, %974 : vector<1x32xf32>
    %976 = vector.extract_strided_slice %975 {offsets = [0, 0], sizes = [1, 8], strides = [1, 1]} : vector<1x32xf32> to vector<1x8xf32>
    %977 = vector.extract_strided_slice %975 {offsets = [0, 8], sizes = [1, 8], strides = [1, 1]} : vector<1x32xf32> to vector<1x8xf32>
    %978 = vector.extract_strided_slice %975 {offsets = [0, 16], sizes = [1, 8], strides = [1, 1]} : vector<1x32xf32> to vector<1x8xf32>
    %cst_120 = arith.constant 2.000000e+00 : f32
    %979 = vector.broadcast %cst_120 : f32 to vector<1x8xf32>
    %980 = arith.mulf %979, %978 : vector<1x8xf32>
    %cst_121 = arith.constant 1.000000e+00 : f32
    %981 = vector.broadcast %cst_121 : f32 to vector<1x8xf32>
    %982 = arith.subf %980, %981 : vector<1x8xf32>
    %983 = vector.extract_strided_slice %975 {offsets = [0, 24], sizes = [1, 8], strides = [1, 1]} : vector<1x32xf32> to vector<1x8xf32>
    %984 = arith.mulf %977, %947 : vector<1x8xf32>
    %985 = arith.mulf %976, %982 : vector<1x8xf32>
    %986 = arith.addf %984, %985 : vector<1x8xf32>
    %987 = math.tanh %986 : vector<1x8xf32>
    %988 = arith.mulf %983, %987 : vector<1x8xf32>
    %c25 = arith.constant 25 : index
    %c0_122 = arith.constant 0 : index
    %989 = vector.load %arg8[%c25, %c0_122] : memref<30x32xf32, #tpu.memory_space<vmem>>, vector<1x32xf32>
    %990 = vector.extract_strided_slice %988 {offsets = [0, 0], sizes = [1, 1], strides = [1, 1]} : vector<1x8xf32> to vector<1x1xf32>
    %991 = vector.broadcast %990 : vector<1x1xf32> to vector<1x32xf32>
    %992 = arith.mulf %7, %991 : vector<1x32xf32>
    %993 = vector.extract_strided_slice %988 {offsets = [0, 1], sizes = [1, 1], strides = [1, 1]} : vector<1x8xf32> to vector<1x1xf32>
    %994 = vector.broadcast %993 : vector<1x1xf32> to vector<1x32xf32>
    %995 = arith.mulf %8, %994 : vector<1x32xf32>
    %996 = arith.addf %992, %995 : vector<1x32xf32>
    %997 = vector.extract_strided_slice %988 {offsets = [0, 2], sizes = [1, 1], strides = [1, 1]} : vector<1x8xf32> to vector<1x1xf32>
    %998 = vector.broadcast %997 : vector<1x1xf32> to vector<1x32xf32>
    %999 = arith.mulf %9, %998 : vector<1x32xf32>
    %1000 = vector.extract_strided_slice %988 {offsets = [0, 3], sizes = [1, 1], strides = [1, 1]} : vector<1x8xf32> to vector<1x1xf32>
    %1001 = vector.broadcast %1000 : vector<1x1xf32> to vector<1x32xf32>
    %1002 = arith.mulf %10, %1001 : vector<1x32xf32>
    %1003 = arith.addf %999, %1002 : vector<1x32xf32>
    %1004 = arith.addf %996, %1003 : vector<1x32xf32>
    %1005 = vector.extract_strided_slice %988 {offsets = [0, 4], sizes = [1, 1], strides = [1, 1]} : vector<1x8xf32> to vector<1x1xf32>
    %1006 = vector.broadcast %1005 : vector<1x1xf32> to vector<1x32xf32>
    %1007 = arith.mulf %11, %1006 : vector<1x32xf32>
    %1008 = arith.addf %1004, %1007 : vector<1x32xf32>
    %1009 = arith.addf %989, %1008 : vector<1x32xf32>
    %1010 = arith.negf %1009 : vector<1x32xf32>
    %1011 = math.exp %1010 : vector<1x32xf32>
    %cst_123 = arith.constant 1.000000e+00 : f32
    %1012 = vector.broadcast %cst_123 : f32 to vector<1x32xf32>
    %1013 = arith.addf %1012, %1011 : vector<1x32xf32>
    %1014 = arith.divf %1012, %1013 : vector<1x32xf32>
    %1015 = vector.extract_strided_slice %1014 {offsets = [0, 0], sizes = [1, 8], strides = [1, 1]} : vector<1x32xf32> to vector<1x8xf32>
    %1016 = vector.extract_strided_slice %1014 {offsets = [0, 8], sizes = [1, 8], strides = [1, 1]} : vector<1x32xf32> to vector<1x8xf32>
    %1017 = vector.extract_strided_slice %1014 {offsets = [0, 16], sizes = [1, 8], strides = [1, 1]} : vector<1x32xf32> to vector<1x8xf32>
    %cst_124 = arith.constant 2.000000e+00 : f32
    %1018 = vector.broadcast %cst_124 : f32 to vector<1x8xf32>
    %1019 = arith.mulf %1018, %1017 : vector<1x8xf32>
    %cst_125 = arith.constant 1.000000e+00 : f32
    %1020 = vector.broadcast %cst_125 : f32 to vector<1x8xf32>
    %1021 = arith.subf %1019, %1020 : vector<1x8xf32>
    %1022 = vector.extract_strided_slice %1014 {offsets = [0, 24], sizes = [1, 8], strides = [1, 1]} : vector<1x32xf32> to vector<1x8xf32>
    %1023 = arith.mulf %1016, %986 : vector<1x8xf32>
    %1024 = arith.mulf %1015, %1021 : vector<1x8xf32>
    %1025 = arith.addf %1023, %1024 : vector<1x8xf32>
    %1026 = math.tanh %1025 : vector<1x8xf32>
    %1027 = arith.mulf %1022, %1026 : vector<1x8xf32>
    %c26 = arith.constant 26 : index
    %c0_126 = arith.constant 0 : index
    %1028 = vector.load %arg8[%c26, %c0_126] : memref<30x32xf32, #tpu.memory_space<vmem>>, vector<1x32xf32>
    %1029 = vector.extract_strided_slice %1027 {offsets = [0, 0], sizes = [1, 1], strides = [1, 1]} : vector<1x8xf32> to vector<1x1xf32>
    %1030 = vector.broadcast %1029 : vector<1x1xf32> to vector<1x32xf32>
    %1031 = arith.mulf %7, %1030 : vector<1x32xf32>
    %1032 = vector.extract_strided_slice %1027 {offsets = [0, 1], sizes = [1, 1], strides = [1, 1]} : vector<1x8xf32> to vector<1x1xf32>
    %1033 = vector.broadcast %1032 : vector<1x1xf32> to vector<1x32xf32>
    %1034 = arith.mulf %8, %1033 : vector<1x32xf32>
    %1035 = arith.addf %1031, %1034 : vector<1x32xf32>
    %1036 = vector.extract_strided_slice %1027 {offsets = [0, 2], sizes = [1, 1], strides = [1, 1]} : vector<1x8xf32> to vector<1x1xf32>
    %1037 = vector.broadcast %1036 : vector<1x1xf32> to vector<1x32xf32>
    %1038 = arith.mulf %9, %1037 : vector<1x32xf32>
    %1039 = vector.extract_strided_slice %1027 {offsets = [0, 3], sizes = [1, 1], strides = [1, 1]} : vector<1x8xf32> to vector<1x1xf32>
    %1040 = vector.broadcast %1039 : vector<1x1xf32> to vector<1x32xf32>
    %1041 = arith.mulf %10, %1040 : vector<1x32xf32>
    %1042 = arith.addf %1038, %1041 : vector<1x32xf32>
    %1043 = arith.addf %1035, %1042 : vector<1x32xf32>
    %1044 = vector.extract_strided_slice %1027 {offsets = [0, 4], sizes = [1, 1], strides = [1, 1]} : vector<1x8xf32> to vector<1x1xf32>
    %1045 = vector.broadcast %1044 : vector<1x1xf32> to vector<1x32xf32>
    %1046 = arith.mulf %11, %1045 : vector<1x32xf32>
    %1047 = arith.addf %1043, %1046 : vector<1x32xf32>
    %1048 = arith.addf %1028, %1047 : vector<1x32xf32>
    %1049 = arith.negf %1048 : vector<1x32xf32>
    %1050 = math.exp %1049 : vector<1x32xf32>
    %cst_127 = arith.constant 1.000000e+00 : f32
    %1051 = vector.broadcast %cst_127 : f32 to vector<1x32xf32>
    %1052 = arith.addf %1051, %1050 : vector<1x32xf32>
    %1053 = arith.divf %1051, %1052 : vector<1x32xf32>
    %1054 = vector.extract_strided_slice %1053 {offsets = [0, 0], sizes = [1, 8], strides = [1, 1]} : vector<1x32xf32> to vector<1x8xf32>
    %1055 = vector.extract_strided_slice %1053 {offsets = [0, 8], sizes = [1, 8], strides = [1, 1]} : vector<1x32xf32> to vector<1x8xf32>
    %1056 = vector.extract_strided_slice %1053 {offsets = [0, 16], sizes = [1, 8], strides = [1, 1]} : vector<1x32xf32> to vector<1x8xf32>
    %cst_128 = arith.constant 2.000000e+00 : f32
    %1057 = vector.broadcast %cst_128 : f32 to vector<1x8xf32>
    %1058 = arith.mulf %1057, %1056 : vector<1x8xf32>
    %cst_129 = arith.constant 1.000000e+00 : f32
    %1059 = vector.broadcast %cst_129 : f32 to vector<1x8xf32>
    %1060 = arith.subf %1058, %1059 : vector<1x8xf32>
    %1061 = vector.extract_strided_slice %1053 {offsets = [0, 24], sizes = [1, 8], strides = [1, 1]} : vector<1x32xf32> to vector<1x8xf32>
    %1062 = arith.mulf %1055, %1025 : vector<1x8xf32>
    %1063 = arith.mulf %1054, %1060 : vector<1x8xf32>
    %1064 = arith.addf %1062, %1063 : vector<1x8xf32>
    %1065 = math.tanh %1064 : vector<1x8xf32>
    %1066 = arith.mulf %1061, %1065 : vector<1x8xf32>
    %c27 = arith.constant 27 : index
    %c0_130 = arith.constant 0 : index
    %1067 = vector.load %arg8[%c27, %c0_130] : memref<30x32xf32, #tpu.memory_space<vmem>>, vector<1x32xf32>
    %1068 = vector.extract_strided_slice %1066 {offsets = [0, 0], sizes = [1, 1], strides = [1, 1]} : vector<1x8xf32> to vector<1x1xf32>
    %1069 = vector.broadcast %1068 : vector<1x1xf32> to vector<1x32xf32>
    %1070 = arith.mulf %7, %1069 : vector<1x32xf32>
    %1071 = vector.extract_strided_slice %1066 {offsets = [0, 1], sizes = [1, 1], strides = [1, 1]} : vector<1x8xf32> to vector<1x1xf32>
    %1072 = vector.broadcast %1071 : vector<1x1xf32> to vector<1x32xf32>
    %1073 = arith.mulf %8, %1072 : vector<1x32xf32>
    %1074 = arith.addf %1070, %1073 : vector<1x32xf32>
    %1075 = vector.extract_strided_slice %1066 {offsets = [0, 2], sizes = [1, 1], strides = [1, 1]} : vector<1x8xf32> to vector<1x1xf32>
    %1076 = vector.broadcast %1075 : vector<1x1xf32> to vector<1x32xf32>
    %1077 = arith.mulf %9, %1076 : vector<1x32xf32>
    %1078 = vector.extract_strided_slice %1066 {offsets = [0, 3], sizes = [1, 1], strides = [1, 1]} : vector<1x8xf32> to vector<1x1xf32>
    %1079 = vector.broadcast %1078 : vector<1x1xf32> to vector<1x32xf32>
    %1080 = arith.mulf %10, %1079 : vector<1x32xf32>
    %1081 = arith.addf %1077, %1080 : vector<1x32xf32>
    %1082 = arith.addf %1074, %1081 : vector<1x32xf32>
    %1083 = vector.extract_strided_slice %1066 {offsets = [0, 4], sizes = [1, 1], strides = [1, 1]} : vector<1x8xf32> to vector<1x1xf32>
    %1084 = vector.broadcast %1083 : vector<1x1xf32> to vector<1x32xf32>
    %1085 = arith.mulf %11, %1084 : vector<1x32xf32>
    %1086 = arith.addf %1082, %1085 : vector<1x32xf32>
    %1087 = arith.addf %1067, %1086 : vector<1x32xf32>
    %1088 = arith.negf %1087 : vector<1x32xf32>
    %1089 = math.exp %1088 : vector<1x32xf32>
    %cst_131 = arith.constant 1.000000e+00 : f32
    %1090 = vector.broadcast %cst_131 : f32 to vector<1x32xf32>
    %1091 = arith.addf %1090, %1089 : vector<1x32xf32>
    %1092 = arith.divf %1090, %1091 : vector<1x32xf32>
    %1093 = vector.extract_strided_slice %1092 {offsets = [0, 0], sizes = [1, 8], strides = [1, 1]} : vector<1x32xf32> to vector<1x8xf32>
    %1094 = vector.extract_strided_slice %1092 {offsets = [0, 8], sizes = [1, 8], strides = [1, 1]} : vector<1x32xf32> to vector<1x8xf32>
    %1095 = vector.extract_strided_slice %1092 {offsets = [0, 16], sizes = [1, 8], strides = [1, 1]} : vector<1x32xf32> to vector<1x8xf32>
    %cst_132 = arith.constant 2.000000e+00 : f32
    %1096 = vector.broadcast %cst_132 : f32 to vector<1x8xf32>
    %1097 = arith.mulf %1096, %1095 : vector<1x8xf32>
    %cst_133 = arith.constant 1.000000e+00 : f32
    %1098 = vector.broadcast %cst_133 : f32 to vector<1x8xf32>
    %1099 = arith.subf %1097, %1098 : vector<1x8xf32>
    %1100 = vector.extract_strided_slice %1092 {offsets = [0, 24], sizes = [1, 8], strides = [1, 1]} : vector<1x32xf32> to vector<1x8xf32>
    %1101 = arith.mulf %1094, %1064 : vector<1x8xf32>
    %1102 = arith.mulf %1093, %1099 : vector<1x8xf32>
    %1103 = arith.addf %1101, %1102 : vector<1x8xf32>
    %1104 = math.tanh %1103 : vector<1x8xf32>
    %1105 = arith.mulf %1100, %1104 : vector<1x8xf32>
    %c28 = arith.constant 28 : index
    %c0_134 = arith.constant 0 : index
    %1106 = vector.load %arg8[%c28, %c0_134] : memref<30x32xf32, #tpu.memory_space<vmem>>, vector<1x32xf32>
    %1107 = vector.extract_strided_slice %1105 {offsets = [0, 0], sizes = [1, 1], strides = [1, 1]} : vector<1x8xf32> to vector<1x1xf32>
    %1108 = vector.broadcast %1107 : vector<1x1xf32> to vector<1x32xf32>
    %1109 = arith.mulf %7, %1108 : vector<1x32xf32>
    %1110 = vector.extract_strided_slice %1105 {offsets = [0, 1], sizes = [1, 1], strides = [1, 1]} : vector<1x8xf32> to vector<1x1xf32>
    %1111 = vector.broadcast %1110 : vector<1x1xf32> to vector<1x32xf32>
    %1112 = arith.mulf %8, %1111 : vector<1x32xf32>
    %1113 = arith.addf %1109, %1112 : vector<1x32xf32>
    %1114 = vector.extract_strided_slice %1105 {offsets = [0, 2], sizes = [1, 1], strides = [1, 1]} : vector<1x8xf32> to vector<1x1xf32>
    %1115 = vector.broadcast %1114 : vector<1x1xf32> to vector<1x32xf32>
    %1116 = arith.mulf %9, %1115 : vector<1x32xf32>
    %1117 = vector.extract_strided_slice %1105 {offsets = [0, 3], sizes = [1, 1], strides = [1, 1]} : vector<1x8xf32> to vector<1x1xf32>
    %1118 = vector.broadcast %1117 : vector<1x1xf32> to vector<1x32xf32>
    %1119 = arith.mulf %10, %1118 : vector<1x32xf32>
    %1120 = arith.addf %1116, %1119 : vector<1x32xf32>
    %1121 = arith.addf %1113, %1120 : vector<1x32xf32>
    %1122 = vector.extract_strided_slice %1105 {offsets = [0, 4], sizes = [1, 1], strides = [1, 1]} : vector<1x8xf32> to vector<1x1xf32>
    %1123 = vector.broadcast %1122 : vector<1x1xf32> to vector<1x32xf32>
    %1124 = arith.mulf %11, %1123 : vector<1x32xf32>
    %1125 = arith.addf %1121, %1124 : vector<1x32xf32>
    %1126 = arith.addf %1106, %1125 : vector<1x32xf32>
    %1127 = arith.negf %1126 : vector<1x32xf32>
    %1128 = math.exp %1127 : vector<1x32xf32>
    %cst_135 = arith.constant 1.000000e+00 : f32
    %1129 = vector.broadcast %cst_135 : f32 to vector<1x32xf32>
    %1130 = arith.addf %1129, %1128 : vector<1x32xf32>
    %1131 = arith.divf %1129, %1130 : vector<1x32xf32>
    %1132 = vector.extract_strided_slice %1131 {offsets = [0, 0], sizes = [1, 8], strides = [1, 1]} : vector<1x32xf32> to vector<1x8xf32>
    %1133 = vector.extract_strided_slice %1131 {offsets = [0, 8], sizes = [1, 8], strides = [1, 1]} : vector<1x32xf32> to vector<1x8xf32>
    %1134 = vector.extract_strided_slice %1131 {offsets = [0, 16], sizes = [1, 8], strides = [1, 1]} : vector<1x32xf32> to vector<1x8xf32>
    %cst_136 = arith.constant 2.000000e+00 : f32
    %1135 = vector.broadcast %cst_136 : f32 to vector<1x8xf32>
    %1136 = arith.mulf %1135, %1134 : vector<1x8xf32>
    %cst_137 = arith.constant 1.000000e+00 : f32
    %1137 = vector.broadcast %cst_137 : f32 to vector<1x8xf32>
    %1138 = arith.subf %1136, %1137 : vector<1x8xf32>
    %1139 = vector.extract_strided_slice %1131 {offsets = [0, 24], sizes = [1, 8], strides = [1, 1]} : vector<1x32xf32> to vector<1x8xf32>
    %1140 = arith.mulf %1133, %1103 : vector<1x8xf32>
    %1141 = arith.mulf %1132, %1138 : vector<1x8xf32>
    %1142 = arith.addf %1140, %1141 : vector<1x8xf32>
    %1143 = math.tanh %1142 : vector<1x8xf32>
    %1144 = arith.mulf %1139, %1143 : vector<1x8xf32>
    %c29 = arith.constant 29 : index
    %c0_138 = arith.constant 0 : index
    %1145 = vector.load %arg8[%c29, %c0_138] : memref<30x32xf32, #tpu.memory_space<vmem>>, vector<1x32xf32>
    %1146 = vector.extract_strided_slice %1144 {offsets = [0, 0], sizes = [1, 1], strides = [1, 1]} : vector<1x8xf32> to vector<1x1xf32>
    %1147 = vector.broadcast %1146 : vector<1x1xf32> to vector<1x32xf32>
    %1148 = arith.mulf %7, %1147 : vector<1x32xf32>
    %1149 = vector.extract_strided_slice %1144 {offsets = [0, 1], sizes = [1, 1], strides = [1, 1]} : vector<1x8xf32> to vector<1x1xf32>
    %1150 = vector.broadcast %1149 : vector<1x1xf32> to vector<1x32xf32>
    %1151 = arith.mulf %8, %1150 : vector<1x32xf32>
    %1152 = arith.addf %1148, %1151 : vector<1x32xf32>
    %1153 = vector.extract_strided_slice %1144 {offsets = [0, 2], sizes = [1, 1], strides = [1, 1]} : vector<1x8xf32> to vector<1x1xf32>
    %1154 = vector.broadcast %1153 : vector<1x1xf32> to vector<1x32xf32>
    %1155 = arith.mulf %9, %1154 : vector<1x32xf32>
    %1156 = vector.extract_strided_slice %1144 {offsets = [0, 3], sizes = [1, 1], strides = [1, 1]} : vector<1x8xf32> to vector<1x1xf32>
    %1157 = vector.broadcast %1156 : vector<1x1xf32> to vector<1x32xf32>
    %1158 = arith.mulf %10, %1157 : vector<1x32xf32>
    %1159 = arith.addf %1155, %1158 : vector<1x32xf32>
    %1160 = arith.addf %1152, %1159 : vector<1x32xf32>
    %1161 = vector.extract_strided_slice %1144 {offsets = [0, 4], sizes = [1, 1], strides = [1, 1]} : vector<1x8xf32> to vector<1x1xf32>
    %1162 = vector.broadcast %1161 : vector<1x1xf32> to vector<1x32xf32>
    %1163 = arith.mulf %11, %1162 : vector<1x32xf32>
    %1164 = arith.addf %1160, %1163 : vector<1x32xf32>
    %1165 = arith.addf %1145, %1164 : vector<1x32xf32>
    %1166 = arith.negf %1165 : vector<1x32xf32>
    %1167 = math.exp %1166 : vector<1x32xf32>
    %cst_139 = arith.constant 1.000000e+00 : f32
    %1168 = vector.broadcast %cst_139 : f32 to vector<1x32xf32>
    %1169 = arith.addf %1168, %1167 : vector<1x32xf32>
    %1170 = arith.divf %1168, %1169 : vector<1x32xf32>
    %1171 = vector.extract_strided_slice %1170 {offsets = [0, 0], sizes = [1, 8], strides = [1, 1]} : vector<1x32xf32> to vector<1x8xf32>
    %1172 = vector.extract_strided_slice %1170 {offsets = [0, 8], sizes = [1, 8], strides = [1, 1]} : vector<1x32xf32> to vector<1x8xf32>
    %1173 = vector.extract_strided_slice %1170 {offsets = [0, 16], sizes = [1, 8], strides = [1, 1]} : vector<1x32xf32> to vector<1x8xf32>
    %cst_140 = arith.constant 2.000000e+00 : f32
    %1174 = vector.broadcast %cst_140 : f32 to vector<1x8xf32>
    %1175 = arith.mulf %1174, %1173 : vector<1x8xf32>
    %cst_141 = arith.constant 1.000000e+00 : f32
    %1176 = vector.broadcast %cst_141 : f32 to vector<1x8xf32>
    %1177 = arith.subf %1175, %1176 : vector<1x8xf32>
    %1178 = vector.extract_strided_slice %1170 {offsets = [0, 24], sizes = [1, 8], strides = [1, 1]} : vector<1x32xf32> to vector<1x8xf32>
    %1179 = arith.mulf %1172, %1142 : vector<1x8xf32>
    %1180 = arith.mulf %1171, %1177 : vector<1x8xf32>
    %1181 = arith.addf %1179, %1180 : vector<1x8xf32>
    %1182 = math.tanh %1181 : vector<1x8xf32>
    %1183 = arith.mulf %1178, %1182 : vector<1x8xf32>
    %c0_142 = arith.constant 0 : index
    %c0_143 = arith.constant 0 : index
    %1184 = vector.load %arg5[%c0_142, %c0_143] : memref<35x32xf32, #tpu.memory_space<vmem>>, vector<8x32xf32>
    %cst_144 = arith.constant dense<0.000000e+00> : vector<1x32xf32>
    %1185 = tpu.matmul %1183, %1184, %cst_144 {dimension_numbers = #tpu.dot_dimension_numbers<[1], [0], [0], [1], [0, 0, 1, 1], [], []>} : vector<1x8xf32>, vector<8x32xf32>, vector<1x32xf32> -> vector<1x32xf32>
    %c0_145 = arith.constant 0 : index
    %c0_146 = arith.constant 0 : index
    %1186 = vector.load %arg1[%c0_145, %c0_146] : memref<1x27xf32, #tpu.memory_space<vmem>>, vector<1x27xf32>
    %c8_147 = arith.constant 8 : index
    %c0_148 = arith.constant 0 : index
    %1187 = vector.load %arg5[%c8_147, %c0_148] : memref<35x32xf32, #tpu.memory_space<vmem>>, vector<27x32xf32>
    %cst_149 = arith.constant dense<0.000000e+00> : vector<1x32xf32>
    %1188 = tpu.matmul %1186, %1187, %cst_149 {dimension_numbers = #tpu.dot_dimension_numbers<[1], [0], [0], [1], [0, 0, 1, 1], [], []>} : vector<1x27xf32>, vector<27x32xf32>, vector<1x32xf32> -> vector<1x32xf32>
    %1189 = arith.addf %1185, %1188 : vector<1x32xf32>
    %c1_150 = arith.constant 1 : index
    %c0_151 = arith.constant 0 : index
    %1190 = vector.load %arg6[%c1_150, %c0_151] : memref<4x32xf32, #tpu.memory_space<vmem>>, vector<1x32xf32>
    %1191 = arith.addf %1189, %1190 : vector<1x32xf32>
    %1192 = arith.negf %1191 : vector<1x32xf32>
    %1193 = math.exp %1192 : vector<1x32xf32>
    %cst_152 = arith.constant 1.000000e+00 : f32
    %1194 = vector.broadcast %cst_152 : f32 to vector<1x32xf32>
    %1195 = arith.addf %1194, %1193 : vector<1x32xf32>
    %1196 = arith.divf %1194, %1195 : vector<1x32xf32>
    %c2_153 = arith.constant 2 : index
    %c0_154 = arith.constant 0 : index
    %1197 = vector.load %arg6[%c2_153, %c0_154] : memref<4x32xf32, #tpu.memory_space<vmem>>, vector<1x32xf32>
    %1198 = arith.mulf %1196, %1197 : vector<1x32xf32>
    %cst_155 = arith.constant dense<0.000000e+00> : vector<1xf32>
    %1199 = vector.multi_reduction <add>, %1198, %cst_155 [1] : vector<1x32xf32> to vector<1xf32>
    %1200 = vector.shape_cast %1199 : vector<1xf32> to vector<1x1xf32>
    %c3_156 = arith.constant 3 : index
    %c0_157 = arith.constant 0 : index
    %1201 = vector.load %arg6[%c3_156, %c0_157] : memref<4x32xf32, #tpu.memory_space<vmem>>, vector<1x1xf32>
    %1202 = arith.addf %1200, %1201 : vector<1x1xf32>
    %c0_158 = arith.constant 0 : index
    %c0_159 = arith.constant 0 : index
    %1203 = vector.load %arg7[%c0_158, %c0_159] : memref<1x1xf32, #tpu.memory_space<vmem>>, vector<1x1xf32>
    tpu.vector_store %arg7[%c0_158, %c0_159], %1202 {strides = array<i32>} : memref<1x1xf32, #tpu.memory_space<vmem>>, vector<1x1xf32>,
    return
  }
}

</mosaic_0001>

<bundles_post_ra>
// kernel: tpu_custom_call.1
= control target key start
LH: loop header
LB: loop body
LE: loop exit
PB: predicated region body
PF: predicated region fallthrough
CT: control target
= control target key end

     0   :  { %v3122_v3 = vmov 2   ;;  %v3123_v4 = vmov 0   ;;  %v3124_v8 = vmov 4   ;;  %s3802_s0 = inlined_call_operand.vmem [shape: bf16[30,384], index: 0, kind: input, shape index: {}]   ;;  %s3803_s1 = inlined_call_operand.vmem [shape: f32[1,27], index: 1, kind: input, shape index: {}]   ;;  %s3804_s2 = inlined_call_operand.vmem [shape: f32[2,8], index: 2, kind: input, shape index: {}]   ;;  %s3805_s3 = inlined_call_operand.vmem [shape: bf16[384,32], index: 3, kind: input, shape index: {}]   ;;  %s3806_s4 = inlined_call_operand.vmem [shape: f32[5,32], index: 4, kind: input, shape index: {}]   ;;  %s3807_s5 = inlined_call_operand.vmem [shape: f32[35,32], index: 5, kind: input, shape index: {}]   ;;  %s3808_s6 = inlined_call_operand.vmem [shape: f32[4,32], index: 6, kind: input, shape index: {}]   ;;  %s3809_s7 = inlined_call_operand.hbm [shape: f32[1,1], index: 7, kind: output, shape index: {}]  }
   0x1   :  { %v2739_v0 = vld [vmem:[%s3805_s3 + $0x38] sm:$0xff]  ;;  %2773 = vset.pattern.permute.xlu1 %v3122_v3  ;;  %2771 = vset.pattern.permute.xlu0 %v3123_v4  ;;  %v2738_v5 = vld [vmem:[%s3805_s3 + $0x30] sm:$0xff]  ;;  %v2737_v9 = vld [vmem:[%s3805_s3 + $0x28] sm:$0xff] }
   0x2   :  { %v2747_v1 = vld [vmem:[%s3805_s3 + $0x78] sm:$0xff]  ;;  %261 = vmatpush.bf16.msra.mxu0 %v2739_v0  ;;  %v2746_v6 = vld [vmem:[%s3805_s3 + $0x70] sm:$0xff]  ;;  %2775 = vset.pattern.permute.xlu2 %v3124_v8  ;;  %v2745_v10 = vld [vmem:[%s3805_s3 + $0x68] sm:$0xff] }
   0x3   :  { %v2755_v2 = vld [vmem:[%s3805_s3 + $0xb8] sm:$0xff]  ;;  %280 = vmatpush.bf16.msra.mxu1 %v2747_v1  ;;  %v2754_v7 = vld [vmem:[%s3805_s3 + $0xb0] sm:$0xff]  ;;  %v2753_v11 = vld [vmem:[%s3805_s3 + $0xa8] sm:$0xff] }
   0x4   :  { %299 = vmatpush.bf16.msra.mxu2 %v2755_v2  ;;  %v2736_v12 = vld [vmem:[%s3805_s3 + $0x20] sm:$0xff] }
   0x5   :  { %v2744_v13 = vld [vmem:[%s3805_s3 + $0x60] sm:$0xff] }
   0x6   :  { %262 = vmatpush.bf16.msra.mxu0 %v2738_v5  ;;  %v329_v14 = vld [vmem:[%s3804_s2] sm:$0x1] }
   0x7   :  { %281 = vmatpush.bf16.msra.mxu1 %v2746_v6  ;;  %v2752_v15 = vld [vmem:[%s3805_s3 + $0xa0] sm:$0xff]  ;;  %345 = vperm.xlu1 %2773, %v329_v14  }
   0x8   :  { %300 = vmatpush.bf16.msra.mxu2 %v2754_v7 }
   0xa   :  { %263 = vmatpush.bf16.msra.mxu0 %v2737_v9 }
   0xb   :  { %282 = vmatpush.bf16.msra.mxu1 %v2745_v10 }
   0xc   :  { %301 = vmatpush.bf16.msra.mxu2 %v2753_v11 }
   0xd   :  { %12 = vsyncpa [#allocation4], 0  ;;  %334 = vperm.xlu0 %2771, %v329_v14   ;;  %357 = vperm.xlu2 %2775, %v329_v14   ;;  %v2735_v16 = vld [vmem:[%s3805_s3 + $0x18] sm:$0xff]  ;;  %v2734_v19 = vld [vmem:[%s3805_s3 + $0x10] sm:$0xff]  ;;  %v3125_v22 = vmov 3   ;;  %v3126_v23 = vmov 1  }
   0xe   :  { %264 = vmatpush.bf16.msra.mxu0 %v2736_v12  ;;  %v2743_v17 = vld [vmem:[%s3805_s3 + $0x58] sm:$0xff]  ;;  %v2742_v20 = vld [vmem:[%s3805_s3 + $0x50] sm:$0xff]  ;;  %v2733_v24 = vld [vmem:[%s3805_s3 + $0x8] sm:$0xff]  ;;  %s3127_s18 = smov 8   ;;  %vm318_vm0 = vcmask 261120   ;;  %s3128_s30 = smov 112  }
   0xf   :  { %283 = vmatpush.bf16.msra.mxu1 %v2744_v13  ;;  %v2751_v18 = vld [vmem:[%s3805_s3 + $0x98] sm:$0xff]  ;;  %v2750_v21 = vld [vmem:[%s3805_s3 + $0x90] sm:$0xff]  ;;  %2774 = vset.pattern.permute.xlu1 %v3125_v22  ;;  %v2741_v25 = vld [vmem:[%s3805_s3 + $0x48] sm:$0xff]  ;;  %s3129_s8 = smov 16   ;;  %s3136_s19 = smov [#allocation3]  }
  0x10   :  { %302 = vmatpush.bf16.msra.mxu2 %v2752_v15  ;;  %350 = vperm.xlu1 %2774, %v329_v14   ;;  %v2749_v26 = vld [vmem:[%s3805_s3 + $0x88] sm:$0xff]  ;;  %v2732_v27 = vld [vmem:[%s3805_s3] sm:$0xff]  ;;  %v2546_v33 = vld [vmem:[%s3802_s0 + $0xc] sm:$0xf0]  ;;  %s2531_s20 = sshll.u32 %s3136_s19, 4  ;;  %s2533_s23 = sshll.u32 %s3809_s7, 4  ;;  %s2532_s20 = int_to_ptr.vmem [resolvable:$true] %s2531_s20  ;;  %s2534_s23 = int_to_ptr.hbm [resolvable:$true] %s2533_s23 }
  0x11   :  { %v2740_v28 = vld [vmem:[%s3805_s3 + $0x40] sm:$0xff]  ;;  %v2727_v31 = vld [vmem:[%s3802_s0 + $0x8] sm:$0xf0]  ;;  %v2552_v35 = vld [vmem:[%s3802_s0 + $0x8] sm:$0xf] }
  0x12   :  { %265 = vmatpush.bf16.msra.mxu0 %v2735_v16  ;;  %v2544_v29 = vld [vmem:[%s3802_s0] sm:$0xf]  ;;  %v2726_v32 = vld [vmem:[%s3802_s0 + $0x4] sm:$0xf]  ;;  %v2728_v36 = vld [vmem:[%s3802_s0 + $0x10] sm:$0xf0] }
  0x13   :  { %284 = vmatpush.bf16.msra.mxu1 %v2743_v17  ;;  %v330_v30 = vld [vmem:[%s3804_s2 + $0x1] sm:$0x1]  ;;  %v2545_v37 = vor.u32 %v2727_v31, %v2544_v29  ;;  %v2549_v38 = vor.u32 %v2726_v32, %v2546_v33  ;;  %v2553_v39 = vor.u32 %v2728_v36, %v2552_v35  ;;  %v2895_v42 = vld [vmem:[%s3808_s6] ss:$0 sm:$0xff]  ;;  %v3280_v43 = vld [vmem:[%s3806_s4 + $0x2] sm:$0x1] }
  0x14   :  { %303 = vmatpush.bf16.msra.mxu2 %v2751_v18  ;;  %v2748_v34 = vld [vmem:[%s3805_s3 + $0x80] sm:$0xff]  ;;  %v3130_v32 = vmov 25   ;;  %v3131_v33 = vmov 24   ;;  %s3135_s2 = smov 104  }
  0x15   :  { %2772 = vset.pattern.permute.xlu0 %v3126_v23  ;;  %v3285_v45 = vld [vmem:[%s3806_s4] sm:$0x1]  ;;  %v3290_v47 = vld [vmem:[%s3806_s4 + $0x3] sm:$0x1]  ;;  %v3295_v49 = vld [vmem:[%s3806_s4 + $0x1] sm:$0x1]  ;;  %2777 = vset.pattern.permute.xlu2 %v3130_v32 }
  0x16   :  { %339 = vperm.xlu0 %2772, %v329_v14   ;;  %266 = vmatpush.bf16.msra.mxu0 %v2734_v19  ;;  %v3304_v63 = vld [vmem:[%s3806_s4 + $0x4] sm:$0x1] }
  0x17   :  { %285 = vmatpush.bf16.msra.mxu1 %v2742_v20 }
  0x18   :  { %304 = vmatpush.bf16.msra.mxu2 %v2750_v21  ;;  %385 = vrot.lane.b32.xlu1 %v330_v30, %s3127_s18 }
  0x19   :  { %2776 = vset.pattern.permute.xlu1 %v3131_v33 }
  0x1a   :  { %267 = vmatpush.bf16.msra.mxu0 %v2733_v24 }
  0x1b   :  { %286 = vmatpush.bf16.msra.mxu1 %v2741_v25 }
  0x1c   :  { %305 = vmatpush.bf16.msra.mxu2 %v2749_v26 }
  0x1e   :  { %268 = vmatpush.bf16.msra.mxu0 %v2732_v27 }
  0x1f   :  { %287 = vmatpush.bf16.msra.mxu1 %v2740_v28 }
  0x20   :  { %306 = vmatpush.bf16.msra.mxu2 %v2748_v34  ;;  %v3132_v34 = vmov 26  }
  0x21   :  { %269 = vmatmul.bf16.vlgmr.msra.gmra.mxu0 %v2545_v37  ;;  %2778 = vset.pattern.permute.xlu0 %v3132_v34  ;;  %v3133_v37 = vmov 28  }
  0x22   :  { %288 = vmatmul.bf16.vlgmr.msra.gmra.mxu1 %v2549_v38  ;;  %v3134_v38 = vmov 27  }
  0x23   :  { %307 = vmatmul.bf16.vlgmr.msra.gmra.mxu2 %v2553_v39 }
  0x67   :  { %v358_v62 = vpop.permute.xlu2 %357 }
  0x68   :  { %v360_v2 = vmul.f32 %v358_v62, %v3304_v63 }
  0x79   :  { %v346_v40 = vpop.permute.xlu1 %345 }
  0x7a   :  { %v348_v51 = vmul.f32 %v346_v40, %v3280_v43 }
  0x7f   :  { %v335_v41 = vpop.permute.xlu0 %334 }
  0x80   :  { %v337_v53 = vmul.f32 %v335_v41, %v3285_v45 }
  0x82   :  { %v351_v46 = vpop.permute.xlu1 %350 }
  0x83   :  { %v353_v54 = vmul.f32 %v351_v46, %v3290_v47 }
  0x85   :  { %v354_v58 = vadd.f32 %v353_v54, %v348_v51 }
  0x88   :  { %v340_v48 = vpop.permute.xlu0 %339 }
  0x89   :  { %v342_v55 = vmul.f32 %v340_v48, %v3295_v49 }
  0x8a   :  { %v386_v27 = vpop.permute.xlu1 %385 }
  0x8b   :  { %v343_v59 = vadd.f32 %v342_v55, %v337_v53 }
  0x8d   :  { %v355_v1 = vadd.f32 %v354_v58, %v343_v59 }
  0x8f   :  { %v361_v6 = vadd.f32 %v360_v2, %v355_v1 }
  0x9e   :  { %v270_v44 = vpop.f32.mrf.mxu0 }
  0x9f   :  { %v271_v50 = vadd.f32 %v2895_v42, %v270_v44  ;;  %v289_v52 = vpop.f32.mrf.mxu1 }
  0xa1   :  { %v290_v56 = vadd.f32 %v289_v52, %v271_v50 }
  0xa6   :  { %v308_v57 = vpop.f32.mrf.mxu2  ;;  %v272_v61 = vpop.f32.mrf.mxu0 }
  0xa7   :  { %v309_v60 = vadd.f32 %v308_v57, %v290_v56  ;;  %v273_v0 = vadd.f32 %v2895_v42, %v272_v61  ;;  %v291_v3 = vpop.f32.mrf.mxu1 }
  0xa9   :  { %319 = vst.msk [vmem:[#allocation2] sm:$0xff] %vm318_vm0, %v309_v60  ;;  %v292_v4 = vadd.f32 %v291_v3, %v273_v0 }
  0xae   :  { %v310_v5 = vpop.f32.mrf.mxu2 }
  0xaf   :  { %v311_v7 = vadd.f32 %v310_v5, %v292_v4 }
  0xb0   :  { %v331_v8 = vld [vmem:[#allocation2] sm:$0x1]  ;;  %v405_v57 = vld [vmem:[#allocation2 + $0x1] sm:$0x1] }
  0xb1   :  { %320 = vst.msk [vmem:[#allocation2 + $0x8] sm:$0xff] %vm318_vm0, %v311_v7  ;;  %v362_v9 = vadd.f32 %v361_v6, %v331_v8 }
  0xb3   :  { %v2662_v10 = vmul.f32 -1.442695, %v362_v9 }
  0xb5   :  { %2896 = vpow2.f32 %v2662_v10 }
  0xbb   :  { %v2897_v11 = vpop.eup %2896 }
  0xbc   :  { %v366_v12 = vadd.f32 1.0, %v2897_v11 }
  0xbe   :  { %2898 = vrcp.f32 %v366_v12  ;;  %v378_v16 = vand.u32 2147483648, %v366_v12  ;;  %v376_v18 = vand.u32 2147483647, %v366_v12  ;;  %vm372_vm2 = vweird.f32 %v366_v12 }
  0xc0   :  { %v379_v20 = vor.u32 1.1754944e-38, %v378_v16  ;;  %vm377_vm4 = vcmp.eq.f32.partialorder %v376_v18, 8.507059e+37 }
  0xc4   :  { %v2899_v13 = vpop.eup %2898 }
  0xc5   :  { %v368_v14 = vmul.f32 %v2899_v13, %v366_v12  ;;  %vm373_vm1 = vweird.f32 %v2899_v13 }
  0xc6   :  { %vm374_vm3 = vmor %vm372_vm2, %vm373_vm1 }
  0xc7   :  { %v369_v15 = vsub.f32 1.0, %v368_v14 }
  0xc9   :  { %v370_v17 = vmul.f32 %v2899_v13, %v369_v15 }
  0xcb   :  { %v371_v19 = vadd.f32 %v2899_v13, %v370_v17 }
  0xcd   :  { %v375_v21 = vsel %vm374_vm3, %v2899_v13, %v371_v19 }
  0xce   :  { %v380_v22 = vsel %vm377_vm4, %v379_v20, %v375_v21 }
  0xcf   :  { %v382_v23 = vmul.f32 2.0, %v380_v22  ;;  %v388_v28 = vmul.f32 %v386_v27, %v380_v22 }
  0xd1   :  { %v2663_v24 = vadd.f32 -1.0, %v382_v23 }
  0xd3   :  { %390 = vrot.lane.b32.xlu2 %v2663_v24, %s3128_s30 }
 0x12d   :  { %v391_v25 = vpop.permute.xlu2 %390 }
 0x12e   :  { %v393_v26 = vmul.f32 %v391_v25, %v380_v22 }
 0x130   :  { %395 = vrot.lane.b32.xlu2 %v393_v26, %s3127_s18 }
 0x18a   :  { %v396_v29 = vpop.permute.xlu2 %395 }
 0x18b   :  { %v3311_v30 = vadd.f32 %v396_v29, %v388_v28 }
 0x18d   :  { %2900 = vtanh.f32 %v3311_v30 }
 0x193   :  { %v2901_v31 = vpop.eup %2900 }
 0x194   :  { %401 = vrot.lane.b32.xlu0 %v2901_v31, %s3129_s8 }
 0x206   :  { %v402_v35 = vpop.permute.xlu0 %401 }
 0x207   :  { %v404_v36 = vmul.f32 %v402_v35, %v380_v22 }
 0x209   :  { %419 = vperm.xlu0 %2778, %v404_v36   ;;  %413 = vperm.xlu2 %2777, %v404_v36  }
 0x20a   :  { %408 = vperm.xlu1 %2776, %v404_v36  }
 0x211   :  { %2780 = vset.pattern.permute.xlu2 %v3133_v37 }
 0x212   :  { %2779 = vset.pattern.permute.xlu1 %v3134_v38  ;;  %431 = vperm.xlu2 %2780, %v404_v36  }
 0x213   :  { %424 = vperm.xlu1 %2779, %v404_v36   ;;  %v475_v36 = vld [vmem:[#allocation2 + $0x2] sm:$0x1] }
 0x21a   :  { %2782 = vset.pattern.permute.xlu2 %v3130_v32 }
 0x21b   :  { %2781 = vset.pattern.permute.xlu1 %v3131_v33 }
 0x263   :  { %v414_v40 = vpop.permute.xlu2 %413 }
 0x264   :  { %v416_v46 = vmul.f32 %v414_v40, %v3295_v49 }
 0x26c   :  { %v432_v51 = vpop.permute.xlu2 %431 }
 0x26d   :  { %v434_v54 = vmul.f32 %v432_v51, %v3304_v63 }
 0x27b   :  { %v420_v41 = vpop.permute.xlu0 %419 }
 0x27c   :  { %v409_v39 = vpop.permute.xlu1 %408  ;;  %v422_v48 = vmul.f32 %v420_v41, %v3280_v43 }
 0x27d   :  { %v411_v42 = vmul.f32 %v409_v39, %v3285_v45 }
 0x27f   :  { %v417_v52 = vadd.f32 %v416_v46, %v411_v42 }
 0x285   :  { %v425_v44 = vpop.permute.xlu1 %424 }
 0x286   :  { %v427_v50 = vmul.f32 %v425_v44, %v3290_v47 }
 0x288   :  { %v428_v53 = vadd.f32 %v427_v50, %v422_v48 }
 0x28a   :  { %v429_v55 = vadd.f32 %v428_v53, %v417_v52 }
 0x28c   :  { %v435_v56 = vadd.f32 %v434_v54, %v429_v55 }
 0x28e   :  { %v436_v58 = vadd.f32 %v435_v56, %v405_v57 }
 0x290   :  { %v2664_v59 = vmul.f32 -1.442695, %v436_v58 }
 0x292   :  { %2902 = vpow2.f32 %v2664_v59 }
 0x298   :  { %v2903_v60 = vpop.eup %2902 }
 0x299   :  { %v440_v61 = vadd.f32 1.0, %v2903_v60 }
 0x29b   :  { %2904 = vrcp.f32 %v440_v61  ;;  %v452_v2 = vand.u32 2147483648, %v440_v61  ;;  %v450_v4 = vand.u32 2147483647, %v440_v61  ;;  %vm446_vm6 = vweird.f32 %v440_v61 }
 0x29d   :  { %v453_v6 = vor.u32 1.1754944e-38, %v452_v2  ;;  %vm451_vm8 = vcmp.eq.f32.partialorder %v450_v4, 8.507059e+37 }
 0x2a1   :  { %v2905_v62 = vpop.eup %2904 }
 0x2a2   :  { %v442_v0 = vmul.f32 %v2905_v62, %v440_v61  ;;  %vm447_vm5 = vweird.f32 %v2905_v62 }
 0x2a3   :  { %vm448_vm7 = vmor %vm446_vm6, %vm447_vm5 }
 0x2a4   :  { %v443_v1 = vsub.f32 1.0, %v442_v0 }
 0x2a6   :  { %v444_v3 = vmul.f32 %v2905_v62, %v443_v1 }
 0x2a8   :  { %v445_v5 = vadd.f32 %v2905_v62, %v444_v3 }
 0x2aa   :  { %v449_v7 = vsel %vm448_vm7, %v2905_v62, %v445_v5 }
 0x2ab   :  { %v454_v8 = vsel %vm451_vm8, %v453_v6, %v449_v7 }
 0x2ac   :  { %v456_v9 = vmul.f32 2.0, %v454_v8  ;;  %v458_v13 = vmul.f32 %v454_v8, %v3311_v30 }
 0x2ae   :  { %v2665_v10 = vadd.f32 -1.0, %v456_v9 }
 0x2b0   :  { %460 = vrot.lane.b32.xlu1 %v2665_v10, %s3128_s30 }
 0x322   :  { %v461_v11 = vpop.permute.xlu1 %460 }
 0x323   :  { %v463_v12 = vmul.f32 %v461_v11, %v454_v8 }
 0x325   :  { %465 = vrot.lane.b32.xlu2 %v463_v12, %s3127_s18 }
 0x37f   :  { %v466_v14 = vpop.permute.xlu2 %465 }
 0x380   :  { %v468_v15 = vadd.f32 %v466_v14, %v458_v13 }
 0x382   :  { %2906 = vtanh.f32 %v468_v15 }
 0x388   :  { %v2907_v16 = vpop.eup %2906 }
 0x389   :  { %471 = vrot.lane.b32.xlu0 %v2907_v16, %s3129_s8 }
 0x3fb   :  { %v472_v17 = vpop.permute.xlu0 %471 }
 0x3fc   :  { %v474_v18 = vmul.f32 %v472_v17, %v454_v8 }
 0x3fe   :  { %489 = vperm.xlu0 %2778, %v474_v18   ;;  %483 = vperm.xlu2 %2782, %v474_v18  }
 0x3ff   :  { %478 = vperm.xlu1 %2781, %v474_v18  }
 0x406   :  { %2784 = vset.pattern.permute.xlu2 %v3133_v37  ;;  %2785 = vset.pattern.permute.xlu0 %v3131_v33 }
 0x407   :  { %2783 = vset.pattern.permute.xlu1 %v3134_v38  ;;  %501 = vperm.xlu2 %2784, %v474_v18  }
 0x408   :  { %494 = vperm.xlu1 %2783, %v474_v18   ;;  %v545_v18 = vld [vmem:[#allocation2 + $0x3] sm:$0x1] }
 0x40f   :  { %2787 = vset.pattern.permute.xlu2 %v3132_v34 }
 0x410   :  { %2786 = vset.pattern.permute.xlu1 %v3130_v32 }
 0x458   :  { %v484_v20 = vpop.permute.xlu2 %483 }
 0x459   :  { %v486_v24 = vmul.f32 %v484_v20, %v3295_v49 }
 0x461   :  { %v502_v27 = vpop.permute.xlu2 %501 }
 0x462   :  { %v504_v30 = vmul.f32 %v502_v27, %v3304_v63 }
 0x470   :  { %v490_v21 = vpop.permute.xlu0 %489 }
 0x471   :  { %v479_v19 = vpop.permute.xlu1 %478  ;;  %v492_v25 = vmul.f32 %v490_v21, %v3280_v43 }
 0x472   :  { %v481_v22 = vmul.f32 %v479_v19, %v3285_v45 }
 0x474   :  { %v487_v28 = vadd.f32 %v486_v24, %v481_v22 }
 0x47a   :  { %v495_v23 = vpop.permute.xlu1 %494 }
 0x47b   :  { %v497_v26 = vmul.f32 %v495_v23, %v3290_v47 }
 0x47d   :  { %v498_v29 = vadd.f32 %v497_v26, %v492_v25 }
 0x47f   :  { %v499_v31 = vadd.f32 %v498_v29, %v487_v28 }
 0x481   :  { %v505_v35 = vadd.f32 %v504_v30, %v499_v31 }
 0x483   :  { %v506_v39 = vadd.f32 %v505_v35, %v475_v36 }
 0x485   :  { %v2666_v40 = vmul.f32 -1.442695, %v506_v39 }
 0x487   :  { %2908 = vpow2.f32 %v2666_v40 }
 0x48d   :  { %v2909_v41 = vpop.eup %2908 }
 0x48e   :  { %v510_v42 = vadd.f32 1.0, %v2909_v41 }
 0x490   :  { %2910 = vrcp.f32 %v510_v42  ;;  %v522_v50 = vand.u32 2147483648, %v510_v42  ;;  %v520_v52 = vand.u32 2147483647, %v510_v42  ;;  %vm516_vm10 = vweird.f32 %v510_v42 }
 0x492   :  { %v523_v54 = vor.u32 1.1754944e-38, %v522_v50  ;;  %vm521_vm12 = vcmp.eq.f32.partialorder %v520_v52, 8.507059e+37 }
 0x496   :  { %v2911_v44 = vpop.eup %2910 }
 0x497   :  { %v512_v46 = vmul.f32 %v2911_v44, %v510_v42  ;;  %vm517_vm9 = vweird.f32 %v2911_v44 }
 0x498   :  { %vm518_vm11 = vmor %vm516_vm10, %vm517_vm9 }
 0x499   :  { %v513_v48 = vsub.f32 1.0, %v512_v46 }
 0x49b   :  { %v514_v51 = vmul.f32 %v2911_v44, %v513_v48 }
 0x49d   :  { %v515_v53 = vadd.f32 %v2911_v44, %v514_v51 }
 0x49f   :  { %v519_v55 = vsel %vm518_vm11, %v2911_v44, %v515_v53 }
 0x4a0   :  { %v524_v56 = vsel %vm521_vm12, %v523_v54, %v519_v55 }
 0x4a1   :  { %v526_v57 = vmul.f32 2.0, %v524_v56  ;;  %v528_v61 = vmul.f32 %v524_v56, %v468_v15 }
 0x4a3   :  { %v2667_v58 = vadd.f32 -1.0, %v526_v57 }
 0x4a5   :  { %530 = vrot.lane.b32.xlu0 %v2667_v58, %s3128_s30 }
 0x517   :  { %v531_v59 = vpop.permute.xlu0 %530 }
 0x518   :  { %v533_v60 = vmul.f32 %v531_v59, %v524_v56 }
 0x51a   :  { %535 = vrot.lane.b32.xlu1 %v533_v60, %s3127_s18 }
 0x58c   :  { %v536_v62 = vpop.permute.xlu1 %535 }
 0x58d   :  { %v538_v0 = vadd.f32 %v536_v62, %v528_v61 }
 0x58f   :  { %2912 = vtanh.f32 %v538_v0 }
 0x595   :  { %v2913_v1 = vpop.eup %2912 }
 0x596   :  { %541 = vrot.lane.b32.xlu2 %v2913_v1, %s3129_s8 }
 0x5f0   :  { %v542_v2 = vpop.permute.xlu2 %541 }
 0x5f1   :  { %v544_v3 = vmul.f32 %v542_v2, %v524_v56 }
 0x5f3   :  { %559 = vperm.xlu2 %2787, %v544_v3   ;;  %553 = vperm.xlu1 %2786, %v544_v3  }
 0x5f4   :  { %548 = vperm.xlu0 %2785, %v544_v3  }
 0x5fb   :  { %2789 = vset.pattern.permute.xlu2 %v3133_v37  ;;  %2788 = vset.pattern.permute.xlu1 %v3134_v38 }
 0x5fc   :  { %571 = vperm.xlu2 %2789, %v544_v3   ;;  %564 = vperm.xlu1 %2788, %v544_v3   ;;  %v615_v3 = vld [vmem:[#allocation2 + $0x4] sm:$0x1] }
 0x604   :  { %2791 = vset.pattern.permute.xlu2 %v3132_v34  ;;  %2790 = vset.pattern.permute.xlu1 %v3130_v32 }
 0x64d   :  { %v560_v5 = vpop.permute.xlu2 %559 }
 0x64e   :  { %v562_v10 = vmul.f32 %v560_v5, %v3280_v43 }
 0x656   :  { %v572_v12 = vpop.permute.xlu2 %571 }
 0x657   :  { %v574_v15 = vmul.f32 %v572_v12, %v3304_v63 }
 0x665   :  { %v554_v4 = vpop.permute.xlu1 %553 }
 0x666   :  { %v549_v6 = vpop.permute.xlu0 %548  ;;  %v556_v7 = vmul.f32 %v554_v4, %v3295_v49 }
 0x667   :  { %v551_v8 = vmul.f32 %v549_v6, %v3285_v45 }
 0x669   :  { %v557_v13 = vadd.f32 %v556_v7, %v551_v8 }
 0x66e   :  { %v565_v9 = vpop.permute.xlu1 %564 }
 0x66f   :  { %v567_v11 = vmul.f32 %v565_v9, %v3290_v47 }
 0x671   :  { %v568_v14 = vadd.f32 %v567_v11, %v562_v10 }
 0x673   :  { %v569_v16 = vadd.f32 %v568_v14, %v557_v13 }
 0x675   :  { %v575_v17 = vadd.f32 %v574_v15, %v569_v16 }
 0x677   :  { %v576_v19 = vadd.f32 %v575_v17, %v545_v18 }
 0x679   :  { %v2668_v20 = vmul.f32 -1.442695, %v576_v19 }
 0x67b   :  { %2914 = vpow2.f32 %v2668_v20 }
 0x681   :  { %v2915_v21 = vpop.eup %2914 }
 0x682   :  { %v580_v22 = vadd.f32 1.0, %v2915_v21 }
 0x684   :  { %2916 = vrcp.f32 %v580_v22  ;;  %v592_v26 = vand.u32 2147483648, %v580_v22  ;;  %v590_v28 = vand.u32 2147483647, %v580_v22  ;;  %vm586_vm14 = vweird.f32 %v580_v22 }
 0x686   :  { %v593_v30 = vor.u32 1.1754944e-38, %v592_v26  ;;  %vm591_vm1 = vcmp.eq.f32.partialorder %v590_v28, 8.507059e+37 }
 0x68a   :  { %v2917_v23 = vpop.eup %2916 }
 0x68b   :  { %v582_v24 = vmul.f32 %v2917_v23, %v580_v22  ;;  %vm587_vm13 = vweird.f32 %v2917_v23 }
 0x68c   :  { %vm588_vm15 = vmor %vm586_vm14, %vm587_vm13 }
 0x68d   :  { %v583_v25 = vsub.f32 1.0, %v582_v24 }
 0x68f   :  { %v584_v27 = vmul.f32 %v2917_v23, %v583_v25 }
 0x691   :  { %v585_v29 = vadd.f32 %v2917_v23, %v584_v27 }
 0x693   :  { %v589_v31 = vsel %vm588_vm15, %v2917_v23, %v585_v29 }
 0x694   :  { %v594_v35 = vsel %vm591_vm1, %v593_v30, %v589_v31 }
 0x695   :  { %v596_v36 = vmul.f32 2.0, %v594_v35  ;;  %v598_v42 = vmul.f32 %v594_v35, %v538_v0 }
 0x697   :  { %v2669_v39 = vadd.f32 -1.0, %v596_v36 }
 0x699   :  { %600 = vrot.lane.b32.xlu0 %v2669_v39, %s3128_s30 }
 0x70b   :  { %v601_v40 = vpop.permute.xlu0 %600 }
 0x70c   :  { %v603_v41 = vmul.f32 %v601_v40, %v594_v35 }
 0x70e   :  { %605 = vrot.lane.b32.xlu1 %v603_v41, %s3127_s18 }
 0x780   :  { %v606_v44 = vpop.permute.xlu1 %605 }
 0x781   :  { %v608_v46 = vadd.f32 %v606_v44, %v598_v42 }
 0x783   :  { %2918 = vtanh.f32 %v608_v46 }
 0x789   :  { %v2919_v48 = vpop.eup %2918 }
 0x78a   :  { %611 = vrot.lane.b32.xlu2 %v2919_v48, %s3129_s8 }
 0x7e4   :  { %v612_v50 = vpop.permute.xlu2 %611 }
 0x7e5   :  { %v614_v51 = vmul.f32 %v612_v50, %v594_v35 }
 0x7e7   :  { %629 = vperm.xlu2 %2791, %v614_v51   ;;  %623 = vperm.xlu1 %2790, %v614_v51  }
 0x7e8   :  { %618 = vperm.xlu0 %2785, %v614_v51  }
 0x7ef   :  { %2793 = vset.pattern.permute.xlu1 %v3133_v37 }
 0x7f0   :  { %2792 = vset.pattern.permute.xlu0 %v3134_v38  ;;  %641 = vperm.xlu1 %2793, %v614_v51  }
 0x7f1   :  { %634 = vperm.xlu0 %2792, %v614_v51   ;;  %v685_v51 = vld [vmem:[#allocation2 + $0x5] sm:$0x1] }
 0x7f8   :  { %2795 = vset.pattern.permute.xlu1 %v3130_v32 }
 0x7f9   :  { %2794 = vset.pattern.permute.xlu0 %v3131_v33 }
 0x841   :  { %v630_v54 = vpop.permute.xlu2 %629 }
 0x842   :  { %v632_v58 = vmul.f32 %v630_v54, %v3280_v43 }
 0x859   :  { %v624_v53 = vpop.permute.xlu1 %623 }
 0x85a   :  { %v619_v52 = vpop.permute.xlu0 %618  ;;  %v626_v55 = vmul.f32 %v624_v53, %v3295_v49 }
 0x85b   :  { %v621_v56 = vmul.f32 %v619_v52, %v3285_v45 }
 0x85d   :  { %v627_v61 = vadd.f32 %v626_v55, %v621_v56 }
 0x862   :  { %v642_v60 = vpop.permute.xlu1 %641 }
 0x863   :  { %v635_v57 = vpop.permute.xlu0 %634  ;;  %v644_v0 = vmul.f32 %v642_v60, %v3304_v63 }
 0x864   :  { %v637_v59 = vmul.f32 %v635_v57, %v3290_v47 }
 0x866   :  { %v638_v62 = vadd.f32 %v637_v59, %v632_v58 }
 0x868   :  { %v639_v1 = vadd.f32 %v638_v62, %v627_v61 }
 0x86a   :  { %v645_v2 = vadd.f32 %v644_v0, %v639_v1 }
 0x86c   :  { %v646_v4 = vadd.f32 %v645_v2, %v615_v3 }
 0x86e   :  { %v2670_v5 = vmul.f32 -1.442695, %v646_v4 }
 0x870   :  { %2920 = vpow2.f32 %v2670_v5 }
 0x876   :  { %v2921_v6 = vpop.eup %2920 }
 0x877   :  { %v650_v7 = vadd.f32 1.0, %v2921_v6 }
 0x879   :  { %2922 = vrcp.f32 %v650_v7  ;;  %v662_v11 = vand.u32 2147483648, %v650_v7  ;;  %v660_v13 = vand.u32 2147483647, %v650_v7  ;;  %vm656_vm3 = vweird.f32 %v650_v7 }
 0x87b   :  { %v663_v15 = vor.u32 1.1754944e-38, %v662_v11  ;;  %vm661_vm5 = vcmp.eq.f32.partialorder %v660_v13, 8.507059e+37 }
 0x87f   :  { %v2923_v8 = vpop.eup %2922 }
 0x880   :  { %v652_v9 = vmul.f32 %v2923_v8, %v650_v7  ;;  %vm657_vm2 = vweird.f32 %v2923_v8 }
 0x881   :  { %vm658_vm4 = vmor %vm656_vm3, %vm657_vm2 }
 0x882   :  { %v653_v10 = vsub.f32 1.0, %v652_v9 }
 0x884   :  { %v654_v12 = vmul.f32 %v2923_v8, %v653_v10 }
 0x886   :  { %v655_v14 = vadd.f32 %v2923_v8, %v654_v12 }
 0x888   :  { %v659_v16 = vsel %vm658_vm4, %v2923_v8, %v655_v14 }
 0x889   :  { %v664_v17 = vsel %vm661_vm5, %v663_v15, %v659_v16 }
 0x88a   :  { %v666_v18 = vmul.f32 2.0, %v664_v17  ;;  %v668_v22 = vmul.f32 %v664_v17, %v608_v46 }
 0x88c   :  { %v2671_v19 = vadd.f32 -1.0, %v666_v18 }
 0x88e   :  { %670 = vrot.lane.b32.xlu2 %v2671_v19, %s3128_s30 }
 0x8e8   :  { %v671_v20 = vpop.permute.xlu2 %670 }
 0x8e9   :  { %v673_v21 = vmul.f32 %v671_v20, %v664_v17 }
 0x8eb   :  { %675 = vrot.lane.b32.xlu1 %v673_v21, %s3127_s18 }
 0x95d   :  { %v676_v23 = vpop.permute.xlu1 %675 }
 0x95e   :  { %v678_v24 = vadd.f32 %v676_v23, %v668_v22 }
 0x960   :  { %2924 = vtanh.f32 %v678_v24 }
 0x966   :  { %v2925_v25 = vpop.eup %2924 }
 0x967   :  { %681 = vrot.lane.b32.xlu2 %v2925_v25, %s3129_s8 }
 0x9c1   :  { %v682_v26 = vpop.permute.xlu2 %681 }
 0x9c2   :  { %v684_v27 = vmul.f32 %v682_v26, %v664_v17 }
 0x9c4   :  { %699 = vperm.xlu2 %2791, %v684_v27   ;;  %693 = vperm.xlu1 %2795, %v684_v27  }
 0x9c5   :  { %688 = vperm.xlu0 %2794, %v684_v27  }
 0x9cc   :  { %2797 = vset.pattern.permute.xlu2 %v3133_v37  ;;  %2796 = vset.pattern.permute.xlu1 %v3134_v38 }
 0x9cd   :  { %711 = vperm.xlu2 %2797, %v684_v27   ;;  %704 = vperm.xlu1 %2796, %v684_v27   ;;  %v755_v27 = vld [vmem:[#allocation2 + $0x6] sm:$0x1] }
 0x9d5   :  { %2799 = vset.pattern.permute.xlu2 %v3132_v34  ;;  %2798 = vset.pattern.permute.xlu1 %v3130_v32 }
 0xa1e   :  { %v700_v29 = vpop.permute.xlu2 %699 }
 0xa1f   :  { %v702_v39 = vmul.f32 %v700_v29, %v3280_v43 }
 0xa27   :  { %v712_v41 = vpop.permute.xlu2 %711 }
 0xa28   :  { %v714_v46 = vmul.f32 %v712_v41, %v3304_v63 }
 0xa36   :  { %v694_v28 = vpop.permute.xlu1 %693 }
 0xa37   :  { %v689_v30 = vpop.permute.xlu0 %688  ;;  %v696_v31 = vmul.f32 %v694_v28, %v3295_v49 }
 0xa38   :  { %v691_v35 = vmul.f32 %v689_v30, %v3285_v45 }
 0xa3a   :  { %v697_v42 = vadd.f32 %v696_v31, %v691_v35 }
 0xa3f   :  { %v705_v36 = vpop.permute.xlu1 %704 }
 0xa40   :  { %v707_v40 = vmul.f32 %v705_v36, %v3290_v47 }
 0xa42   :  { %v708_v44 = vadd.f32 %v707_v40, %v702_v39 }
 0xa44   :  { %v709_v48 = vadd.f32 %v708_v44, %v697_v42 }
 0xa46   :  { %v715_v50 = vadd.f32 %v714_v46, %v709_v48 }
 0xa48   :  { %v716_v52 = vadd.f32 %v715_v50, %v685_v51 }
 0xa4a   :  { %v2672_v53 = vmul.f32 -1.442695, %v716_v52 }
 0xa4c   :  { %2926 = vpow2.f32 %v2672_v53 }
 0xa52   :  { %v2927_v54 = vpop.eup %2926 }
 0xa53   :  { %v720_v55 = vadd.f32 1.0, %v2927_v54 }
 0xa55   :  { %2928 = vrcp.f32 %v720_v55  ;;  %v732_v59 = vand.u32 2147483648, %v720_v55  ;;  %v730_v61 = vand.u32 2147483647, %v720_v55  ;;  %vm726_vm7 = vweird.f32 %v720_v55 }
 0xa57   :  { %v733_v0 = vor.u32 1.1754944e-38, %v732_v59  ;;  %vm731_vm9 = vcmp.eq.f32.partialorder %v730_v61, 8.507059e+37 }
 0xa5b   :  { %v2929_v56 = vpop.eup %2928 }
 0xa5c   :  { %v722_v57 = vmul.f32 %v2929_v56, %v720_v55  ;;  %vm727_vm6 = vweird.f32 %v2929_v56 }
 0xa5d   :  { %vm728_vm8 = vmor %vm726_vm7, %vm727_vm6 }
 0xa5e   :  { %v723_v58 = vsub.f32 1.0, %v722_v57 }
 0xa60   :  { %v724_v60 = vmul.f32 %v2929_v56, %v723_v58 }
 0xa62   :  { %v725_v62 = vadd.f32 %v2929_v56, %v724_v60 }
 0xa64   :  { %v729_v1 = vsel %vm728_vm8, %v2929_v56, %v725_v62 }
 0xa65   :  { %v734_v2 = vsel %vm731_vm9, %v733_v0, %v729_v1 }
 0xa66   :  { %v736_v3 = vmul.f32 2.0, %v734_v2  ;;  %v738_v7 = vmul.f32 %v734_v2, %v678_v24 }
 0xa68   :  { %v2673_v4 = vadd.f32 -1.0, %v736_v3 }
 0xa6a   :  { %740 = vrot.lane.b32.xlu0 %v2673_v4, %s3128_s30 }
 0xadc   :  { %v741_v5 = vpop.permute.xlu0 %740 }
 0xadd   :  { %v743_v6 = vmul.f32 %v741_v5, %v734_v2 }
 0xadf   :  { %745 = vrot.lane.b32.xlu1 %v743_v6, %s3127_s18 }
 0xb51   :  { %v746_v8 = vpop.permute.xlu1 %745 }
 0xb52   :  { %v748_v9 = vadd.f32 %v746_v8, %v738_v7 }
 0xb54   :  { %2930 = vtanh.f32 %v748_v9 }
 0xb5a   :  { %v2931_v10 = vpop.eup %2930 }
 0xb5b   :  { %751 = vrot.lane.b32.xlu2 %v2931_v10, %s3129_s8 }
 0xbb5   :  { %v752_v11 = vpop.permute.xlu2 %751 }
 0xbb6   :  { %v754_v12 = vmul.f32 %v752_v11, %v734_v2 }
 0xbb8   :  { %769 = vperm.xlu2 %2799, %v754_v12   ;;  %763 = vperm.xlu1 %2798, %v754_v12  }
 0xbb9   :  { %758 = vperm.xlu0 %2794, %v754_v12  }
 0xbc0   :  { %2801 = vset.pattern.permute.xlu1 %v3133_v37 }
 0xbc1   :  { %2800 = vset.pattern.permute.xlu0 %v3134_v38  ;;  %781 = vperm.xlu1 %2801, %v754_v12  }
 0xbc2   :  { %774 = vperm.xlu0 %2800, %v754_v12   ;;  %v825_v12 = vld [vmem:[#allocation2 + $0x7] sm:$0x1] }
 0xbc9   :  { %2803 = vset.pattern.permute.xlu1 %v3130_v32 }
 0xbca   :  { %2802 = vset.pattern.permute.xlu0 %v3131_v33 }
 0xc12   :  { %v770_v15 = vpop.permute.xlu2 %769 }
 0xc13   :  { %v772_v19 = vmul.f32 %v770_v15, %v3280_v43 }
 0xc2a   :  { %v764_v14 = vpop.permute.xlu1 %763 }
 0xc2b   :  { %v759_v13 = vpop.permute.xlu0 %758  ;;  %v766_v16 = vmul.f32 %v764_v14, %v3295_v49 }
 0xc2c   :  { %v761_v17 = vmul.f32 %v759_v13, %v3285_v45 }
 0xc2e   :  { %v767_v22 = vadd.f32 %v766_v16, %v761_v17 }
 0xc33   :  { %v782_v21 = vpop.permute.xlu1 %781 }
 0xc34   :  { %v775_v18 = vpop.permute.xlu0 %774  ;;  %v784_v24 = vmul.f32 %v782_v21, %v3304_v63 }
 0xc35   :  { %v777_v20 = vmul.f32 %v775_v18, %v3290_v47 }
 0xc37   :  { %v778_v23 = vadd.f32 %v777_v20, %v772_v19 }
 0xc39   :  { %v779_v25 = vadd.f32 %v778_v23, %v767_v22 }
 0xc3b   :  { %v785_v26 = vadd.f32 %v784_v24, %v779_v25 }
 0xc3d   :  { %v786_v28 = vadd.f32 %v785_v26, %v755_v27 }
 0xc3f   :  { %v2674_v29 = vmul.f32 -1.442695, %v786_v28 }
 0xc41   :  { %2932 = vpow2.f32 %v2674_v29 }
 0xc47   :  { %v2933_v30 = vpop.eup %2932 }
 0xc48   :  { %v790_v31 = vadd.f32 1.0, %v2933_v30 }
 0xc4a   :  { %2934 = vrcp.f32 %v790_v31  ;;  %v802_v40 = vand.u32 2147483648, %v790_v31  ;;  %v800_v42 = vand.u32 2147483647, %v790_v31  ;;  %vm796_vm11 = vweird.f32 %v790_v31 }
 0xc4c   :  { %v803_v46 = vor.u32 1.1754944e-38, %v802_v40  ;;  %vm801_vm13 = vcmp.eq.f32.partialorder %v800_v42, 8.507059e+37 }
 0xc50   :  { %v2935_v35 = vpop.eup %2934 }
 0xc51   :  { %v792_v36 = vmul.f32 %v2935_v35, %v790_v31  ;;  %vm797_vm10 = vweird.f32 %v2935_v35 }
 0xc52   :  { %vm798_vm12 = vmor %vm796_vm11, %vm797_vm10 }
 0xc53   :  { %v793_v39 = vsub.f32 1.0, %v792_v36 }
 0xc55   :  { %v794_v41 = vmul.f32 %v2935_v35, %v793_v39 }
 0xc57   :  { %v795_v44 = vadd.f32 %v2935_v35, %v794_v41 }
 0xc59   :  { %v799_v48 = vsel %vm798_vm12, %v2935_v35, %v795_v44 }
 0xc5a   :  { %v804_v50 = vsel %vm801_vm13, %v803_v46, %v799_v48 }
 0xc5b   :  { %v806_v51 = vmul.f32 2.0, %v804_v50  ;;  %v808_v55 = vmul.f32 %v804_v50, %v748_v9 }
 0xc5d   :  { %v2675_v52 = vadd.f32 -1.0, %v806_v51 }
 0xc5f   :  { %810 = vrot.lane.b32.xlu2 %v2675_v52, %s3128_s30 }
 0xcb9   :  { %v811_v53 = vpop.permute.xlu2 %810 }
 0xcba   :  { %v813_v54 = vmul.f32 %v811_v53, %v804_v50 }
 0xcbc   :  { %815 = vrot.lane.b32.xlu1 %v813_v54, %s3127_s18 }
 0xd2e   :  { %v816_v56 = vpop.permute.xlu1 %815 }
 0xd2f   :  { %v818_v57 = vadd.f32 %v816_v56, %v808_v55 }
 0xd31   :  { %2936 = vtanh.f32 %v818_v57 }
 0xd37   :  { %v2937_v58 = vpop.eup %2936 }
 0xd38   :  { %821 = vrot.lane.b32.xlu2 %v2937_v58, %s3129_s8 }
 0xd92   :  { %v822_v59 = vpop.permute.xlu2 %821 }
 0xd93   :  { %v824_v60 = vmul.f32 %v822_v59, %v804_v50 }
 0xd95   :  { %839 = vperm.xlu2 %2799, %v824_v60   ;;  %833 = vperm.xlu1 %2803, %v824_v60  }
 0xd96   :  { %828 = vperm.xlu0 %2802, %v824_v60  }
 0xd9d   :  { %2805 = vset.pattern.permute.xlu2 %v3133_v37  ;;  %2804 = vset.pattern.permute.xlu1 %v3134_v38 }
 0xd9e   :  { %851 = vperm.xlu2 %2805, %v824_v60   ;;  %844 = vperm.xlu1 %2804, %v824_v60   ;;  %v895_v60 = vld [vmem:[#allocation2 + $0x8] sm:$0x1] }
 0xda6   :  { %2807 = vset.pattern.permute.xlu2 %v3132_v34  ;;  %2806 = vset.pattern.permute.xlu1 %v3130_v32 }
 0xdef   :  { %v840_v62 = vpop.permute.xlu2 %839 }
 0xdf0   :  { %v842_v4 = vmul.f32 %v840_v62, %v3280_v43 }
 0xdf8   :  { %v852_v6 = vpop.permute.xlu2 %851 }
 0xdf9   :  { %v854_v9 = vmul.f32 %v852_v6, %v3304_v63 }
 0xe07   :  { %v834_v61 = vpop.permute.xlu1 %833 }
 0xe08   :  { %v829_v0 = vpop.permute.xlu0 %828  ;;  %v836_v1 = vmul.f32 %v834_v61, %v3295_v49 }
 0xe09   :  { %v831_v2 = vmul.f32 %v829_v0, %v3285_v45 }
 0xe0b   :  { %v837_v7 = vadd.f32 %v836_v1, %v831_v2 }
 0xe10   :  { %v845_v3 = vpop.permute.xlu1 %844 }
 0xe11   :  { %v847_v5 = vmul.f32 %v845_v3, %v3290_v47 }
 0xe13   :  { %v848_v8 = vadd.f32 %v847_v5, %v842_v4 }
 0xe15   :  { %v849_v10 = vadd.f32 %v848_v8, %v837_v7 }
 0xe17   :  { %v855_v11 = vadd.f32 %v854_v9, %v849_v10 }
 0xe19   :  { %v856_v13 = vadd.f32 %v855_v11, %v825_v12 }
 0xe1b   :  { %v2676_v14 = vmul.f32 -1.442695, %v856_v13 }
 0xe1d   :  { %2938 = vpow2.f32 %v2676_v14 }
 0xe23   :  { %v2939_v15 = vpop.eup %2938 }
 0xe24   :  { %v860_v16 = vadd.f32 1.0, %v2939_v15 }
 0xe26   :  { %2940 = vrcp.f32 %v860_v16  ;;  %v872_v20 = vand.u32 2147483648, %v860_v16  ;;  %v870_v22 = vand.u32 2147483647, %v860_v16  ;;  %vm866_vm15 = vweird.f32 %v860_v16 }
 0xe28   :  { %v873_v24 = vor.u32 1.1754944e-38, %v872_v20  ;;  %vm871_vm2 = vcmp.eq.f32.partialorder %v870_v22, 8.507059e+37  ;;  %v3423_v20 = vld [vmem:[%s3806_s4 + $0x1] sm:$0x1]  ;;  %v3429_v22 = vld [vmem:[%s3806_s4] sm:$0x1] }
 0xe2c   :  { %v2941_v17 = vpop.eup %2940 }
 0xe2d   :  { %v862_v18 = vmul.f32 %v2941_v17, %v860_v16  ;;  %vm867_vm14 = vweird.f32 %v2941_v17 }
 0xe2e   :  { %vm868_vm1 = vmor %vm866_vm15, %vm867_vm14 }
 0xe2f   :  { %v863_v19 = vsub.f32 1.0, %v862_v18 }
 0xe31   :  { %v864_v21 = vmul.f32 %v2941_v17, %v863_v19 }
 0xe33   :  { %v865_v23 = vadd.f32 %v2941_v17, %v864_v21 }
 0xe35   :  { %v869_v25 = vsel %vm868_vm1, %v2941_v17, %v865_v23 }
 0xe36   :  { %v874_v26 = vsel %vm871_vm2, %v873_v24, %v869_v25  ;;  %v3435_v25 = vld [vmem:[%s3806_s4 + $0x2] sm:$0x1] }
 0xe37   :  { %v876_v27 = vmul.f32 2.0, %v874_v26  ;;  %v878_v31 = vmul.f32 %v874_v26, %v818_v57 }
 0xe39   :  { %v2677_v28 = vadd.f32 -1.0, %v876_v27  ;;  %v3441_v27 = vld [vmem:[%s3806_s4 + $0x3] sm:$0x1] }
 0xe3b   :  { %880 = vrot.lane.b32.xlu0 %v2677_v28, %s3128_s30 }
 0xead   :  { %v881_v29 = vpop.permute.xlu0 %880 }
 0xeae   :  { %v883_v30 = vmul.f32 %v881_v29, %v874_v26 }
 0xeb0   :  { %885 = vrot.lane.b32.xlu1 %v883_v30, %s3127_s18 }
 0xf22   :  { %v886_v35 = vpop.permute.xlu1 %885 }
 0xf23   :  { %v888_v36 = vadd.f32 %v886_v35, %v878_v31  ;;  %v3447_v35 = vld [vmem:[%s3806_s4 + $0x4] sm:$0x1] }
 0xf25   :  { %2942 = vtanh.f32 %v888_v36 }
 0xf2b   :  { %v2943_v39 = vpop.eup %2942 }
 0xf2c   :  { %891 = vrot.lane.b32.xlu2 %v2943_v39, %s3129_s8 }
 0xf86   :  { %v892_v40 = vpop.permute.xlu2 %891 }
 0xf87   :  { %v894_v41 = vmul.f32 %v892_v40, %v874_v26 }
 0xf89   :  { %909 = vperm.xlu2 %2807, %v894_v41   ;;  %903 = vperm.xlu1 %2806, %v894_v41  }
 0xf8a   :  { %898 = vperm.xlu0 %2802, %v894_v41  }
 0xf91   :  { %2809 = vset.pattern.permute.xlu1 %v3133_v37 }
 0xf92   :  { %2808 = vset.pattern.permute.xlu0 %v3134_v38  ;;  %921 = vperm.xlu1 %2809, %v894_v41  }
 0xf93   :  { %914 = vperm.xlu0 %2808, %v894_v41   ;;  %v965_v41 = vld [vmem:[#allocation2 + $0x9] sm:$0x1] }
 0xf9a   :  { %2811 = vset.pattern.permute.xlu1 %v3130_v32 }
 0xf9b   :  { %2810 = vset.pattern.permute.xlu0 %v3131_v33 }
 0xfe3   :  { %v910_v46 = vpop.permute.xlu2 %909 }
 0xfe4   :  { %v912_v52 = vmul.f32 %v910_v46, %v3280_v43 }
 0xffb   :  { %v904_v44 = vpop.permute.xlu1 %903 }
 0xffc   :  { %v899_v42 = vpop.permute.xlu0 %898  ;;  %v906_v48 = vmul.f32 %v904_v44, %v3295_v49 }
 0xffd   :  { %v901_v50 = vmul.f32 %v899_v42, %v3285_v45 }
 0xfff   :  { %v907_v55 = vadd.f32 %v906_v48, %v901_v50 }
0x1004   :  { %v922_v54 = vpop.permute.xlu1 %921 }
0x1005   :  { %v915_v51 = vpop.permute.xlu0 %914  ;;  %v924_v57 = vmul.f32 %v922_v54, %v3304_v63 }
0x1006   :  { %v917_v53 = vmul.f32 %v915_v51, %v3290_v47 }
0x1008   :  { %v918_v56 = vadd.f32 %v917_v53, %v912_v52 }
0x100a   :  { %v919_v58 = vadd.f32 %v918_v56, %v907_v55 }
0x100c   :  { %v925_v59 = vadd.f32 %v924_v57, %v919_v58 }
0x100e   :  { %v926_v61 = vadd.f32 %v925_v59, %v895_v60 }
0x1010   :  { %v2678_v62 = vmul.f32 -1.442695, %v926_v61 }
0x1012   :  { %2944 = vpow2.f32 %v2678_v62 }
0x1018   :  { %v2945_v0 = vpop.eup %2944 }
0x1019   :  { %v930_v49 = vadd.f32 1.0, %v2945_v0 }
0x101b   :  { %2946 = vrcp.f32 %v930_v49  ;;  %v942_v43 = vand.u32 2147483648, %v930_v49  ;;  %v940_v47 = vand.u32 2147483647, %v930_v49  ;;  %vm936_vm4 = vweird.f32 %v930_v49 }
0x101d   :  { %v943_v63 = vor.u32 1.1754944e-38, %v942_v43  ;;  %vm941_vm6 = vcmp.eq.f32.partialorder %v940_v47, 8.507059e+37 }
0x1021   :  { %v2947_v45 = vpop.eup %2946 }
0x1022   :  { %v932_v1 = vmul.f32 %v2947_v45, %v930_v49  ;;  %vm937_vm3 = vweird.f32 %v2947_v45 }
0x1023   :  { %vm938_vm5 = vmor %vm936_vm4, %vm937_vm3 }
0x1024   :  { %v933_v2 = vsub.f32 1.0, %v932_v1 }
0x1026   :  { %v934_v3 = vmul.f32 %v2947_v45, %v933_v2 }
0x1028   :  { %v935_v4 = vadd.f32 %v2947_v45, %v934_v3 }
0x102a   :  { %v939_v5 = vsel %vm938_vm5, %v2947_v45, %v935_v4 }
0x102b   :  { %v944_v6 = vsel %vm941_vm6, %v943_v63, %v939_v5 }
0x102c   :  { %v946_v7 = vmul.f32 2.0, %v944_v6  ;;  %v948_v11 = vmul.f32 %v944_v6, %v888_v36 }
0x102e   :  { %v2679_v8 = vadd.f32 -1.0, %v946_v7 }
0x1030   :  { %950 = vrot.lane.b32.xlu2 %v2679_v8, %s3128_s30 }
0x108a   :  { %v951_v9 = vpop.permute.xlu2 %950 }
0x108b   :  { %v953_v10 = vmul.f32 %v951_v9, %v944_v6 }
0x108d   :  { %955 = vrot.lane.b32.xlu1 %v953_v10, %s3127_s18 }
0x10ff   :  { %v956_v12 = vpop.permute.xlu1 %955 }
0x1100   :  { %v958_v13 = vadd.f32 %v956_v12, %v948_v11 }
0x1102   :  { %2948 = vtanh.f32 %v958_v13 }
0x1108   :  { %v2949_v14 = vpop.eup %2948 }
0x1109   :  { %961 = vrot.lane.b32.xlu2 %v2949_v14, %s3129_s8 }
0x1163   :  { %v962_v15 = vpop.permute.xlu2 %961 }
0x1164   :  { %v964_v16 = vmul.f32 %v962_v15, %v944_v6 }
0x1166   :  { %979 = vperm.xlu2 %2807, %v964_v16   ;;  %973 = vperm.xlu1 %2811, %v964_v16  }
0x1167   :  { %968 = vperm.xlu0 %2810, %v964_v16  }
0x116e   :  { %2813 = vset.pattern.permute.xlu2 %v3133_v37  ;;  %2812 = vset.pattern.permute.xlu1 %v3134_v38 }
0x116f   :  { %991 = vperm.xlu2 %2813, %v964_v16   ;;  %984 = vperm.xlu1 %2812, %v964_v16   ;;  %v1035_v16 = vld [vmem:[#allocation2 + $0xa] sm:$0x1] }
0x1177   :  { %2815 = vset.pattern.permute.xlu2 %v3132_v34  ;;  %2814 = vset.pattern.permute.xlu1 %v3130_v32 }
0x11c0   :  { %v980_v18 = vpop.permute.xlu2 %979 }
0x11c1   :  { %v982_v26 = vmul.f32 %v3435_v25, %v980_v18 }
0x11c9   :  { %v992_v29 = vpop.permute.xlu2 %991 }
0x11ca   :  { %v994_v36 = vmul.f32 %v3447_v35, %v992_v29 }
0x11d8   :  { %v974_v17 = vpop.permute.xlu1 %973 }
0x11d9   :  { %v969_v19 = vpop.permute.xlu0 %968  ;;  %v976_v21 = vmul.f32 %v3423_v20, %v974_v17 }
0x11da   :  { %v971_v23 = vmul.f32 %v3429_v22, %v969_v19 }
0x11dc   :  { %v977_v30 = vadd.f32 %v976_v21, %v971_v23 }
0x11e1   :  { %v985_v24 = vpop.permute.xlu1 %984 }
0x11e2   :  { %v987_v28 = vmul.f32 %v3441_v27, %v985_v24 }
0x11e4   :  { %v988_v31 = vadd.f32 %v987_v28, %v982_v26 }
0x11e6   :  { %v989_v39 = vadd.f32 %v988_v31, %v977_v30 }
0x11e8   :  { %v995_v40 = vadd.f32 %v994_v36, %v989_v39 }
0x11ea   :  { %v996_v42 = vadd.f32 %v995_v40, %v965_v41 }
0x11ec   :  { %v2680_v44 = vmul.f32 -1.442695, %v996_v42 }
0x11ee   :  { %2950 = vpow2.f32 %v2680_v44 }
0x11f4   :  { %v2951_v46 = vpop.eup %2950 }
0x11f5   :  { %v1000_v48 = vadd.f32 1.0, %v2951_v46 }
0x11f7   :  { %2952 = vrcp.f32 %v1000_v48  ;;  %v1012_v53 = vand.u32 2147483648, %v1000_v48  ;;  %v1010_v55 = vand.u32 2147483647, %v1000_v48  ;;  %vm1006_vm8 = vweird.f32 %v1000_v48 }
0x11f9   :  { %v1013_v57 = vor.u32 1.1754944e-38, %v1012_v53  ;;  %vm1011_vm10 = vcmp.eq.f32.partialorder %v1010_v55, 8.507059e+37 }
0x11fd   :  { %v2953_v50 = vpop.eup %2952 }
0x11fe   :  { %v1002_v51 = vmul.f32 %v2953_v50, %v1000_v48  ;;  %vm1007_vm7 = vweird.f32 %v2953_v50 }
0x11ff   :  { %vm1008_vm9 = vmor %vm1006_vm8, %vm1007_vm7 }
0x1200   :  { %v1003_v52 = vsub.f32 1.0, %v1002_v51 }
0x1202   :  { %v1004_v54 = vmul.f32 %v2953_v50, %v1003_v52 }
0x1204   :  { %v1005_v56 = vadd.f32 %v2953_v50, %v1004_v54 }
0x1206   :  { %v1009_v58 = vsel %vm1008_vm9, %v2953_v50, %v1005_v56 }
0x1207   :  { %v1014_v59 = vsel %vm1011_vm10, %v1013_v57, %v1009_v58 }
0x1208   :  { %v1016_v60 = vmul.f32 2.0, %v1014_v59  ;;  %v1018_v49 = vmul.f32 %v1014_v59, %v958_v13 }
0x120a   :  { %v2681_v61 = vadd.f32 -1.0, %v1016_v60 }
0x120c   :  { %1020 = vrot.lane.b32.xlu0 %v2681_v61, %s3128_s30 }
0x127e   :  { %v1021_v62 = vpop.permute.xlu0 %1020 }
0x127f   :  { %v1023_v0 = vmul.f32 %v1021_v62, %v1014_v59 }
0x1281   :  { %1025 = vrot.lane.b32.xlu1 %v1023_v0, %s3127_s18 }
0x12f3   :  { %v1026_v45 = vpop.permute.xlu1 %1025 }
0x12f4   :  { %v1028_v1 = vadd.f32 %v1026_v45, %v1018_v49 }
0x12f6   :  { %2954 = vtanh.f32 %v1028_v1 }
0x12fc   :  { %v2955_v2 = vpop.eup %2954 }
0x12fd   :  { %1031 = vrot.lane.b32.xlu2 %v2955_v2, %s3129_s8 }
0x1357   :  { %v1032_v43 = vpop.permute.xlu2 %1031 }
0x1358   :  { %v1034_v3 = vmul.f32 %v1032_v43, %v1014_v59 }
0x135a   :  { %1049 = vperm.xlu2 %2815, %v1034_v3   ;;  %1043 = vperm.xlu1 %2814, %v1034_v3  }
0x135b   :  { %1038 = vperm.xlu0 %2810, %v1034_v3  }
0x1362   :  { %2817 = vset.pattern.permute.xlu1 %v3133_v37 }
0x1363   :  { %2816 = vset.pattern.permute.xlu0 %v3134_v38  ;;  %1061 = vperm.xlu1 %2817, %v1034_v3  }
0x1364   :  { %1054 = vperm.xlu0 %2816, %v1034_v3   ;;  %v1105_v3 = vld [vmem:[#allocation2 + $0xb] sm:$0x1] }
0x136b   :  { %2819 = vset.pattern.permute.xlu1 %v3130_v32 }
0x136c   :  { %2818 = vset.pattern.permute.xlu0 %v3131_v33 }
0x13b4   :  { %v1050_v63 = vpop.permute.xlu2 %1049 }
0x13b5   :  { %v1052_v8 = vmul.f32 %v3435_v25, %v1050_v63 }
0x13cc   :  { %v1044_v4 = vpop.permute.xlu1 %1043 }
0x13cd   :  { %v1039_v47 = vpop.permute.xlu0 %1038  ;;  %v1046_v5 = vmul.f32 %v3423_v20, %v1044_v4 }
0x13ce   :  { %v1041_v6 = vmul.f32 %v3429_v22, %v1039_v47 }
0x13d0   :  { %v1047_v11 = vadd.f32 %v1046_v5, %v1041_v6 }
0x13d5   :  { %v1062_v10 = vpop.permute.xlu1 %1061 }
0x13d6   :  { %v1055_v7 = vpop.permute.xlu0 %1054  ;;  %v1064_v13 = vmul.f32 %v3447_v35, %v1062_v10 }
0x13d7   :  { %v1057_v9 = vmul.f32 %v3441_v27, %v1055_v7 }
0x13d9   :  { %v1058_v12 = vadd.f32 %v1057_v9, %v1052_v8 }
0x13db   :  { %v1059_v14 = vadd.f32 %v1058_v12, %v1047_v11 }
0x13dd   :  { %v1065_v15 = vadd.f32 %v1064_v13, %v1059_v14 }
0x13df   :  { %v1066_v17 = vadd.f32 %v1065_v15, %v1035_v16 }
0x13e1   :  { %v2682_v18 = vmul.f32 -1.442695, %v1066_v17 }
0x13e3   :  { %2956 = vpow2.f32 %v2682_v18 }
0x13e9   :  { %v2957_v19 = vpop.eup %2956 }
0x13ea   :  { %v1070_v21 = vadd.f32 1.0, %v2957_v19 }
0x13ec   :  { %2958 = vrcp.f32 %v1070_v21  ;;  %v1082_v28 = vand.u32 2147483648, %v1070_v21  ;;  %v1080_v30 = vand.u32 2147483647, %v1070_v21  ;;  %vm1076_vm12 = vweird.f32 %v1070_v21 }
0x13ee   :  { %v1083_v36 = vor.u32 1.1754944e-38, %v1082_v28  ;;  %vm1081_vm14 = vcmp.eq.f32.partialorder %v1080_v30, 8.507059e+37 }
0x13f2   :  { %v2959_v23 = vpop.eup %2958 }
0x13f3   :  { %v1072_v24 = vmul.f32 %v2959_v23, %v1070_v21  ;;  %vm1077_vm11 = vweird.f32 %v2959_v23 }
0x13f4   :  { %vm1078_vm13 = vmor %vm1076_vm12, %vm1077_vm11 }
0x13f5   :  { %v1073_v26 = vsub.f32 1.0, %v1072_v24 }
0x13f7   :  { %v1074_v29 = vmul.f32 %v2959_v23, %v1073_v26 }
0x13f9   :  { %v1075_v31 = vadd.f32 %v2959_v23, %v1074_v29 }
0x13fb   :  { %v1079_v39 = vsel %vm1078_vm13, %v2959_v23, %v1075_v31 }
0x13fc   :  { %v1084_v40 = vsel %vm1081_vm14, %v1083_v36, %v1079_v39 }
0x13fd   :  { %v1086_v41 = vmul.f32 2.0, %v1084_v40  ;;  %v1088_v48 = vmul.f32 %v1084_v40, %v1028_v1 }
0x13ff   :  { %v2683_v42 = vadd.f32 -1.0, %v1086_v41 }
0x1401   :  { %1090 = vrot.lane.b32.xlu2 %v2683_v42, %s3128_s30 }
0x145b   :  { %v1091_v44 = vpop.permute.xlu2 %1090 }
0x145c   :  { %v1093_v46 = vmul.f32 %v1091_v44, %v1084_v40 }
0x145e   :  { %1095 = vrot.lane.b32.xlu1 %v1093_v46, %s3127_s18 }
0x14d0   :  { %v1096_v50 = vpop.permute.xlu1 %1095 }
0x14d1   :  { %v1098_v51 = vadd.f32 %v1096_v50, %v1088_v48 }
0x14d3   :  { %2960 = vtanh.f32 %v1098_v51 }
0x14d9   :  { %v2961_v52 = vpop.eup %2960 }
0x14da   :  { %1101 = vrot.lane.b32.xlu2 %v2961_v52, %s3129_s8 }
0x1534   :  { %v1102_v53 = vpop.permute.xlu2 %1101 }
0x1535   :  { %v1104_v54 = vmul.f32 %v1102_v53, %v1084_v40 }
0x1537   :  { %1119 = vperm.xlu2 %2815, %v1104_v54   ;;  %1113 = vperm.xlu1 %2819, %v1104_v54  }
0x1538   :  { %1108 = vperm.xlu0 %2818, %v1104_v54  }
0x153f   :  { %2821 = vset.pattern.permute.xlu2 %v3133_v37  ;;  %2820 = vset.pattern.permute.xlu1 %v3134_v38 }
0x1540   :  { %1131 = vperm.xlu2 %2821, %v1104_v54   ;;  %1124 = vperm.xlu1 %2820, %v1104_v54   ;;  %v1175_v54 = vld [vmem:[#allocation2 + $0xc] sm:$0x1] }
0x1548   :  { %2823 = vset.pattern.permute.xlu2 %v3132_v34  ;;  %2822 = vset.pattern.permute.xlu1 %v3130_v32 }
0x1591   :  { %v1120_v56 = vpop.permute.xlu2 %1119 }
0x1592   :  { %v1122_v61 = vmul.f32 %v3435_v25, %v1120_v56 }
0x159a   :  { %v1132_v0 = vpop.permute.xlu2 %1131 }
0x159b   :  { %v1134_v1 = vmul.f32 %v3447_v35, %v1132_v0 }
0x15a9   :  { %v1114_v55 = vpop.permute.xlu1 %1113 }
0x15aa   :  { %v1109_v57 = vpop.permute.xlu0 %1108  ;;  %v1116_v58 = vmul.f32 %v3423_v20, %v1114_v55 }
0x15ab   :  { %v1111_v59 = vmul.f32 %v3429_v22, %v1109_v57 }
0x15ad   :  { %v1117_v49 = vadd.f32 %v1116_v58, %v1111_v59 }
0x15b2   :  { %v1125_v60 = vpop.permute.xlu1 %1124 }
0x15b3   :  { %v1127_v62 = vmul.f32 %v3441_v27, %v1125_v60 }
0x15b5   :  { %v1128_v45 = vadd.f32 %v1127_v62, %v1122_v61 }
0x15b7   :  { %v1129_v2 = vadd.f32 %v1128_v45, %v1117_v49 }
0x15b9   :  { %v1135_v43 = vadd.f32 %v1134_v1, %v1129_v2 }
0x15bb   :  { %v1136_v47 = vadd.f32 %v1135_v43, %v1105_v3 }
0x15bd   :  { %v2684_v4 = vmul.f32 -1.442695, %v1136_v47 }
0x15bf   :  { %2962 = vpow2.f32 %v2684_v4 }
0x15c5   :  { %v2963_v63 = vpop.eup %2962 }
0x15c6   :  { %v1140_v5 = vadd.f32 1.0, %v2963_v63 }
0x15c8   :  { %2964 = vrcp.f32 %v1140_v5  ;;  %v1152_v9 = vand.u32 2147483648, %v1140_v5  ;;  %v1150_v11 = vand.u32 2147483647, %v1140_v5  ;;  %vm1146_vm1 = vweird.f32 %v1140_v5 }
0x15ca   :  { %v1153_v13 = vor.u32 1.1754944e-38, %v1152_v9  ;;  %vm1151_vm3 = vcmp.eq.f32.partialorder %v1150_v11, 8.507059e+37 }
0x15ce   :  { %v2965_v6 = vpop.eup %2964 }
0x15cf   :  { %v1142_v7 = vmul.f32 %v2965_v6, %v1140_v5  ;;  %vm1147_vm15 = vweird.f32 %v2965_v6 }
0x15d0   :  { %vm1148_vm2 = vmor %vm1146_vm1, %vm1147_vm15 }
0x15d1   :  { %v1143_v8 = vsub.f32 1.0, %v1142_v7 }
0x15d3   :  { %v1144_v10 = vmul.f32 %v2965_v6, %v1143_v8 }
0x15d5   :  { %v1145_v12 = vadd.f32 %v2965_v6, %v1144_v10 }
0x15d7   :  { %v1149_v14 = vsel %vm1148_vm2, %v2965_v6, %v1145_v12 }
0x15d8   :  { %v1154_v15 = vsel %vm1151_vm3, %v1153_v13, %v1149_v14 }
0x15d9   :  { %v1156_v16 = vmul.f32 2.0, %v1154_v15  ;;  %v1158_v21 = vmul.f32 %v1154_v15, %v1098_v51 }
0x15db   :  { %v2685_v17 = vadd.f32 -1.0, %v1156_v16 }
0x15dd   :  { %1160 = vrot.lane.b32.xlu0 %v2685_v17, %s3128_s30 }
0x164f   :  { %v1161_v18 = vpop.permute.xlu0 %1160 }
0x1650   :  { %v1163_v19 = vmul.f32 %v1161_v18, %v1154_v15 }
0x1652   :  { %1165 = vrot.lane.b32.xlu1 %v1163_v19, %s3127_s18 }
0x16c4   :  { %v1166_v23 = vpop.permute.xlu1 %1165 }
0x16c5   :  { %v1168_v24 = vadd.f32 %v1166_v23, %v1158_v21 }
0x16c7   :  { %2966 = vtanh.f32 %v1168_v24 }
0x16cd   :  { %v2967_v26 = vpop.eup %2966 }
0x16ce   :  { %1171 = vrot.lane.b32.xlu2 %v2967_v26, %s3129_s8 }
0x1728   :  { %v1172_v28 = vpop.permute.xlu2 %1171 }
0x1729   :  { %v1174_v29 = vmul.f32 %v1172_v28, %v1154_v15 }
0x172b   :  { %1189 = vperm.xlu2 %2823, %v1174_v29   ;;  %1183 = vperm.xlu1 %2822, %v1174_v29  }
0x172c   :  { %1178 = vperm.xlu0 %2818, %v1174_v29  }
0x1733   :  { %2825 = vset.pattern.permute.xlu1 %v3133_v37 }
0x1734   :  { %2824 = vset.pattern.permute.xlu0 %v3134_v38  ;;  %1201 = vperm.xlu1 %2825, %v1174_v29  }
0x1735   :  { %1194 = vperm.xlu0 %2824, %v1174_v29   ;;  %v1245_v29 = vld [vmem:[#allocation2 + $0xd] sm:$0x1] }
0x173c   :  { %2827 = vset.pattern.permute.xlu1 %v3130_v32 }
0x173d   :  { %2826 = vset.pattern.permute.xlu0 %v3131_v33 }
0x1785   :  { %v1190_v36 = vpop.permute.xlu2 %1189 }
0x1786   :  { %v1192_v42 = vmul.f32 %v3435_v25, %v1190_v36 }
0x179d   :  { %v1184_v31 = vpop.permute.xlu1 %1183 }
0x179e   :  { %v1179_v30 = vpop.permute.xlu0 %1178  ;;  %v1186_v39 = vmul.f32 %v3423_v20, %v1184_v31 }
0x179f   :  { %v1181_v40 = vmul.f32 %v3429_v22, %v1179_v30 }
0x17a1   :  { %v1187_v48 = vadd.f32 %v1186_v39, %v1181_v40 }
0x17a6   :  { %v1202_v46 = vpop.permute.xlu1 %1201 }
0x17a7   :  { %v1195_v41 = vpop.permute.xlu0 %1194  ;;  %v1204_v51 = vmul.f32 %v3447_v35, %v1202_v46 }
0x17a8   :  { %v1197_v44 = vmul.f32 %v3441_v27, %v1195_v41 }
0x17aa   :  { %v1198_v50 = vadd.f32 %v1197_v44, %v1192_v42 }
0x17ac   :  { %v1199_v52 = vadd.f32 %v1198_v50, %v1187_v48 }
0x17ae   :  { %v1205_v53 = vadd.f32 %v1204_v51, %v1199_v52 }
0x17b0   :  { %v1206_v55 = vadd.f32 %v1205_v53, %v1175_v54 }
0x17b2   :  { %v2686_v56 = vmul.f32 -1.442695, %v1206_v55 }
0x17b4   :  { %2968 = vpow2.f32 %v2686_v56 }
0x17ba   :  { %v2969_v57 = vpop.eup %2968 }
0x17bb   :  { %v1210_v58 = vadd.f32 1.0, %v2969_v57 }
0x17bd   :  { %2970 = vrcp.f32 %v1210_v58  ;;  %v1222_v62 = vand.u32 2147483648, %v1210_v58  ;;  %v1220_v49 = vand.u32 2147483647, %v1210_v58  ;;  %vm1216_vm5 = vweird.f32 %v1210_v58 }
0x17bf   :  { %v1223_v1 = vor.u32 1.1754944e-38, %v1222_v62  ;;  %vm1221_vm7 = vcmp.eq.f32.partialorder %v1220_v49, 8.507059e+37 }
0x17c3   :  { %v2971_v59 = vpop.eup %2970 }
0x17c4   :  { %v1212_v60 = vmul.f32 %v2971_v59, %v1210_v58  ;;  %vm1217_vm4 = vweird.f32 %v2971_v59 }
0x17c5   :  { %vm1218_vm6 = vmor %vm1216_vm5, %vm1217_vm4  ;;  %vm322_vm5 = vcmask 259072  }
0x17c6   :  { %v1213_v61 = vsub.f32 1.0, %v1212_v60 }
0x17c8   :  { %v1214_v0 = vmul.f32 %v2971_v59, %v1213_v61 }
0x17ca   :  { %v1215_v45 = vadd.f32 %v2971_v59, %v1214_v0 }
0x17cc   :  { %v1219_v2 = vsel %vm1218_vm6, %v2971_v59, %v1215_v45 }
0x17cd   :  { %v1224_v43 = vsel %vm1221_vm7, %v1223_v1, %v1219_v2 }
0x17ce   :  { %v1226_v3 = vmul.f32 2.0, %v1224_v43  ;;  %v1228_v5 = vmul.f32 %v1224_v43, %v1168_v24 }
0x17d0   :  { %v2687_v47 = vadd.f32 -1.0, %v1226_v3 }
0x17d2   :  { %1230 = vrot.lane.b32.xlu2 %v2687_v47, %s3128_s30 }
0x182c   :  { %v1231_v4 = vpop.permute.xlu2 %1230 }
0x182d   :  { %v1233_v63 = vmul.f32 %v1231_v4, %v1224_v43 }
0x182f   :  { %1235 = vrot.lane.b32.xlu1 %v1233_v63, %s3127_s18 }
0x18a1   :  { %v1236_v6 = vpop.permute.xlu1 %1235 }
0x18a2   :  { %v1238_v7 = vadd.f32 %v1236_v6, %v1228_v5 }
0x18a4   :  { %2972 = vtanh.f32 %v1238_v7 }
0x18aa   :  { %v2973_v8 = vpop.eup %2972 }
0x18ab   :  { %1241 = vrot.lane.b32.xlu2 %v2973_v8, %s3129_s8 }
0x1905   :  { %v1242_v9 = vpop.permute.xlu2 %1241 }
0x1906   :  { %v1244_v10 = vmul.f32 %v1242_v9, %v1224_v43 }
0x1908   :  { %1259 = vperm.xlu2 %2823, %v1244_v10   ;;  %1253 = vperm.xlu1 %2827, %v1244_v10  }
0x1909   :  { %1248 = vperm.xlu0 %2826, %v1244_v10  }
0x1910   :  { %2829 = vset.pattern.permute.xlu2 %v3133_v37  ;;  %2828 = vset.pattern.permute.xlu1 %v3134_v38 }
0x1911   :  { %1271 = vperm.xlu2 %2829, %v1244_v10   ;;  %1264 = vperm.xlu1 %2828, %v1244_v10   ;;  %v1315_v10 = vld [vmem:[#allocation2 + $0xe] sm:$0x1] }
0x1919   :  { %2831 = vset.pattern.permute.xlu2 %v3132_v34  ;;  %2830 = vset.pattern.permute.xlu1 %v3130_v32 }
0x1962   :  { %v1260_v12 = vpop.permute.xlu2 %1259 }
0x1963   :  { %v1262_v17 = vmul.f32 %v3435_v25, %v1260_v12 }
0x196b   :  { %v1272_v19 = vpop.permute.xlu2 %1271 }
0x196c   :  { %v1274_v24 = vmul.f32 %v3447_v35, %v1272_v19 }
0x197a   :  { %v1254_v11 = vpop.permute.xlu1 %1253 }
0x197b   :  { %v1249_v13 = vpop.permute.xlu0 %1248  ;;  %v1256_v14 = vmul.f32 %v3423_v20, %v1254_v11 }
0x197c   :  { %v1251_v15 = vmul.f32 %v3429_v22, %v1249_v13 }
0x197e   :  { %v1257_v21 = vadd.f32 %v1256_v14, %v1251_v15 }
0x1983   :  { %v1265_v16 = vpop.permute.xlu1 %1264 }
0x1984   :  { %v1267_v18 = vmul.f32 %v3441_v27, %v1265_v16 }
0x1986   :  { %v1268_v23 = vadd.f32 %v1267_v18, %v1262_v17 }
0x1988   :  { %v1269_v26 = vadd.f32 %v1268_v23, %v1257_v21 }
0x198a   :  { %v1275_v28 = vadd.f32 %v1274_v24, %v1269_v26 }
0x198c   :  { %v1276_v30 = vadd.f32 %v1275_v28, %v1245_v29 }
0x198e   :  { %v2688_v31 = vmul.f32 -1.442695, %v1276_v30 }
0x1990   :  { %2974 = vpow2.f32 %v2688_v31 }
0x1996   :  { %v2975_v36 = vpop.eup %2974 }
0x1997   :  { %v1280_v39 = vadd.f32 1.0, %v2975_v36 }
0x1999   :  { %2976 = vrcp.f32 %v1280_v39  ;;  %v1292_v44 = vand.u32 2147483648, %v1280_v39  ;;  %v1290_v48 = vand.u32 2147483647, %v1280_v39  ;;  %vm1286_vm9 = vweird.f32 %v1280_v39 }
0x199b   :  { %v1293_v51 = vor.u32 1.1754944e-38, %v1292_v44  ;;  %vm1291_vm11 = vcmp.eq.f32.partialorder %v1290_v48, 8.507059e+37 }
0x199f   :  { %v2977_v40 = vpop.eup %2976 }
0x19a0   :  { %v1282_v41 = vmul.f32 %v2977_v40, %v1280_v39  ;;  %vm1287_vm8 = vweird.f32 %v2977_v40 }
0x19a1   :  { %vm1288_vm10 = vmor %vm1286_vm9, %vm1287_vm8 }
0x19a2   :  { %v1283_v42 = vsub.f32 1.0, %v1282_v41 }
0x19a4   :  { %v1284_v46 = vmul.f32 %v2977_v40, %v1283_v42 }
0x19a6   :  { %v1285_v50 = vadd.f32 %v2977_v40, %v1284_v46 }
0x19a8   :  { %v1289_v52 = vsel %vm1288_vm10, %v2977_v40, %v1285_v50 }
0x19a9   :  { %v1294_v53 = vsel %vm1291_vm11, %v1293_v51, %v1289_v52 }
0x19aa   :  { %v1296_v54 = vmul.f32 2.0, %v1294_v53  ;;  %v1298_v58 = vmul.f32 %v1294_v53, %v1238_v7 }
0x19ac   :  { %v2689_v55 = vadd.f32 -1.0, %v1296_v54 }
0x19ae   :  { %1300 = vrot.lane.b32.xlu0 %v2689_v55, %s3128_s30 }
0x1a20   :  { %v1301_v56 = vpop.permute.xlu0 %1300 }
0x1a21   :  { %v1303_v57 = vmul.f32 %v1301_v56, %v1294_v53 }
0x1a23   :  { %1305 = vrot.lane.b32.xlu1 %v1303_v57, %s3127_s18 }
0x1a95   :  { %v1306_v59 = vpop.permute.xlu1 %1305 }
0x1a96   :  { %v1308_v60 = vadd.f32 %v1306_v59, %v1298_v58 }
0x1a98   :  { %2978 = vtanh.f32 %v1308_v60 }
0x1a9e   :  { %v2979_v61 = vpop.eup %2978 }
0x1a9f   :  { %1311 = vrot.lane.b32.xlu2 %v2979_v61, %s3129_s8 }
0x1af9   :  { %v1312_v62 = vpop.permute.xlu2 %1311 }
0x1afa   :  { %v1314_v0 = vmul.f32 %v1312_v62, %v1294_v53 }
0x1afc   :  { %1329 = vperm.xlu2 %2831, %v1314_v0   ;;  %1323 = vperm.xlu1 %2830, %v1314_v0  }
0x1afd   :  { %1318 = vperm.xlu0 %2826, %v1314_v0  }
0x1b04   :  { %2833 = vset.pattern.permute.xlu1 %v3133_v37 }
0x1b05   :  { %2832 = vset.pattern.permute.xlu0 %v3134_v38  ;;  %1341 = vperm.xlu1 %2833, %v1314_v0  }
0x1b06   :  { %1334 = vperm.xlu0 %2832, %v1314_v0   ;;  %v1385_v0 = vld [vmem:[#allocation2 + $0xf] sm:$0x1] }
0x1b0d   :  { %2835 = vset.pattern.permute.xlu1 %v3130_v32 }
0x1b0e   :  { %2834 = vset.pattern.permute.xlu0 %v3131_v33 }
0x1b56   :  { %v1330_v1 = vpop.permute.xlu2 %1329 }
0x1b57   :  { %v1332_v47 = vmul.f32 %v3435_v25, %v1330_v1 }
0x1b6e   :  { %v1324_v45 = vpop.permute.xlu1 %1323 }
0x1b6f   :  { %v1319_v49 = vpop.permute.xlu0 %1318  ;;  %v1326_v2 = vmul.f32 %v3423_v20, %v1324_v45 }
0x1b70   :  { %v1321_v43 = vmul.f32 %v3429_v22, %v1319_v49 }
0x1b72   :  { %v1327_v5 = vadd.f32 %v1326_v2, %v1321_v43 }
0x1b77   :  { %v1342_v63 = vpop.permute.xlu1 %1341 }
0x1b78   :  { %v1335_v3 = vpop.permute.xlu0 %1334  ;;  %v1344_v7 = vmul.f32 %v3447_v35, %v1342_v63 }
0x1b79   :  { %v1337_v4 = vmul.f32 %v3441_v27, %v1335_v3 }
0x1b7b   :  { %v1338_v6 = vadd.f32 %v1337_v4, %v1332_v47 }
0x1b7d   :  { %v1339_v8 = vadd.f32 %v1338_v6, %v1327_v5 }
0x1b7f   :  { %v1345_v9 = vadd.f32 %v1344_v7, %v1339_v8 }
0x1b81   :  { %v1346_v11 = vadd.f32 %v1345_v9, %v1315_v10 }
0x1b83   :  { %v2690_v12 = vmul.f32 -1.442695, %v1346_v11 }
0x1b85   :  { %2980 = vpow2.f32 %v2690_v12 }
0x1b8b   :  { %v2981_v13 = vpop.eup %2980 }
0x1b8c   :  { %v1350_v14 = vadd.f32 1.0, %v2981_v13 }
0x1b8e   :  { %2982 = vrcp.f32 %v1350_v14  ;;  %v1362_v18 = vand.u32 2147483648, %v1350_v14  ;;  %v1360_v21 = vand.u32 2147483647, %v1350_v14  ;;  %vm1356_vm13 = vweird.f32 %v1350_v14 }
0x1b90   :  { %v1363_v24 = vor.u32 1.1754944e-38, %v1362_v18  ;;  %vm1361_vm15 = vcmp.eq.f32.partialorder %v1360_v21, 8.507059e+37  ;;  %v2730_v18 = vld [vmem:[%s3802_s0 + $0x20] sm:$0x70]  ;;  %v2558_v21 = vld [vmem:[%s3802_s0 + $0x24] sm:$0x70] }
0x1b94   :  { %v2983_v15 = vpop.eup %2982 }
0x1b95   :  { %v1352_v16 = vmul.f32 %v2983_v15, %v1350_v14  ;;  %vm1357_vm12 = vweird.f32 %v2983_v15  ;;  %v2564_v14 = vld [vmem:[%s3802_s0 + $0x20] sm:$0xf] }
0x1b96   :  { %vm1358_vm14 = vmor %vm1356_vm13, %vm1357_vm12 }
0x1b97   :  { %v1353_v17 = vsub.f32 1.0, %v1352_v16  ;;  %v2556_v16 = vld [vmem:[%s3802_s0 + $0x18] sm:$0xf] }
0x1b99   :  { %v1354_v19 = vmul.f32 %v2983_v15, %v1353_v17 }
0x1b9b   :  { %v1355_v23 = vadd.f32 %v2983_v15, %v1354_v19  ;;  %v2729_v19 = vld [vmem:[%s3802_s0 + $0x1c] sm:$0xf] }
0x1b9d   :  { %v1359_v26 = vsel %vm1358_vm14, %v2983_v15, %v1355_v23  ;;  %v2731_v15 = vld [vmem:[%s3802_s0 + $0x28] sm:$0x70]  ;;  %v2557_v23 = vor.u32 %v2730_v18, %v2556_v16 }
0x1b9e   :  { %v1364_v28 = vsel %vm1361_vm15, %v1363_v24, %v1359_v26  ;;  %v2565_v17 = vor.u32 %v2731_v15, %v2564_v14  ;;  %v2561_v24 = vor.u32 %v2729_v19, %v2558_v21 }
0x1b9f   :  { %v1366_v29 = vmul.f32 2.0, %v1364_v28  ;;  %v1368_v39 = vmul.f32 %v1364_v28, %v1308_v60  ;;  %274 = vmatmul.bf16.gmra.mxu0 %v2557_v23 }
0x1ba0   :  { %312 = vmatmul.bf16.gmra.mxu2 %v2565_v17  ;;  %293 = vmatmul.bf16.gmra.mxu1 %v2561_v24 }
0x1ba1   :  { %v2691_v30 = vadd.f32 -1.0, %v1366_v29 }
0x1ba3   :  { %1370 = vrot.lane.b32.xlu2 %v2691_v30, %s3128_s30 }
0x1bfd   :  { %v1371_v31 = vpop.permute.xlu2 %1370 }
0x1bfe   :  { %v1373_v36 = vmul.f32 %v1371_v31, %v1364_v28 }
0x1c00   :  { %1375 = vrot.lane.b32.xlu1 %v1373_v36, %s3127_s18 }
0x1c72   :  { %v1376_v40 = vpop.permute.xlu1 %1375 }
0x1c73   :  { %v3512_v41 = vadd.f32 %v1376_v40, %v1368_v39  ;;  %v275_v39 = vpop.f32.mrf.mxu0  ;;  %v3085_v40 = vld [vmem:[%s3808_s6] ss:$0 sm:$0xff] }
0x1c75   :  { %2984 = vtanh.f32 %v3512_v41 }
0x1c7b   :  { %v2985_v42 = vpop.eup %2984 }
0x1c7c   :  { %1381 = vrot.lane.b32.xlu2 %v2985_v42, %s3129_s8  ;;  %v294_v42 = vpop.f32.mrf.mxu1 }
0x1cd6   :  { %v1382_v44 = vpop.permute.xlu2 %1381 }
0x1cd7   :  { %v1384_v46 = vmul.f32 %v1382_v44, %v1364_v28 }
0x1cd9   :  { %1399 = vperm.xlu2 %2831, %v1384_v46   ;;  %1393 = vperm.xlu1 %2835, %v1384_v46  }
0x1cda   :  { %1388 = vperm.xlu0 %2834, %v1384_v46  }
0x1ce1   :  { %2837 = vset.pattern.permute.xlu2 %v3133_v37  ;;  %2836 = vset.pattern.permute.xlu1 %v3134_v38 }
0x1ce2   :  { %1411 = vperm.xlu2 %2837, %v1384_v46   ;;  %1404 = vperm.xlu1 %2836, %v1384_v46   ;;  %v313_v46 = vpop.f32.mrf.mxu2 }
0x1cea   :  { %2839 = vset.pattern.permute.xlu2 %v3132_v34  ;;  %2838 = vset.pattern.permute.xlu1 %v3130_v32 }
0x1d33   :  { %v1400_v50 = vpop.permute.xlu2 %1399 }
0x1d34   :  { %v1402_v55 = vmul.f32 %v3435_v25, %v1400_v50  ;;  %v277_v50 = vpop.f32.mrf.mxu0 }
0x1d3c   :  { %v1412_v57 = vpop.permute.xlu2 %1411 }
0x1d3d   :  { %v1414_v60 = vmul.f32 %v3447_v35, %v1412_v57 }
0x1d4b   :  { %v1394_v48 = vpop.permute.xlu1 %1393 }
0x1d4c   :  { %v1389_v51 = vpop.permute.xlu0 %1388  ;;  %v1396_v52 = vmul.f32 %v3423_v20, %v1394_v48 }
0x1d4d   :  { %v1391_v53 = vmul.f32 %v3429_v22, %v1389_v51  ;;  %v296_v51 = vpop.f32.mrf.mxu1 }
0x1d4f   :  { %v1397_v58 = vadd.f32 %v1396_v52, %v1391_v53  ;;  %v278_v52 = vadd.f32 %v3085_v40, %v277_v50  ;;  %v315_v53 = vpop.f32.mrf.mxu2 }
0x1d54   :  { %v1405_v54 = vpop.permute.xlu1 %1404 }
0x1d55   :  { %v1407_v56 = vmul.f32 %v3441_v27, %v1405_v54  ;;  %v297_v54 = vadd.f32 %v296_v51, %v278_v52 }
0x1d57   :  { %v1408_v59 = vadd.f32 %v1407_v56, %v1402_v55  ;;  %v316_v55 = vadd.f32 %v315_v53, %v297_v54 }
0x1d59   :  { %v1409_v61 = vadd.f32 %v1408_v59, %v1397_v58  ;;  %323 = vst.msk [vmem:[#allocation2 + $0x18] sm:$0x3f] %vm322_vm5, %v316_v55 }
0x1d5b   :  { %v1415_v62 = vadd.f32 %v1414_v60, %v1409_v61 }
0x1d5d   :  { %v1416_v49 = vadd.f32 %v1415_v62, %v1385_v0 }
0x1d5f   :  { %v2692_v45 = vmul.f32 -1.442695, %v1416_v49 }
0x1d61   :  { %2986 = vpow2.f32 %v2692_v45 }
0x1d67   :  { %v2987_v1 = vpop.eup %2986 }
0x1d68   :  { %v1420_v2 = vadd.f32 1.0, %v2987_v1 }
0x1d6a   :  { %2988 = vrcp.f32 %v1420_v2  ;;  %v1432_v4 = vand.u32 2147483648, %v1420_v2  ;;  %v1430_v5 = vand.u32 2147483647, %v1420_v2  ;;  %vm1426_vm2 = vweird.f32 %v1420_v2 }
0x1d6c   :  { %v1433_v7 = vor.u32 1.1754944e-38, %v1432_v4  ;;  %vm1431_vm4 = vcmp.eq.f32.partialorder %v1430_v5, 8.507059e+37 }
0x1d70   :  { %v2989_v43 = vpop.eup %2988 }
0x1d71   :  { %v1422_v3 = vmul.f32 %v2989_v43, %v1420_v2  ;;  %vm1427_vm1 = vweird.f32 %v2989_v43 }
0x1d72   :  { %vm1428_vm3 = vmor %vm1426_vm2, %vm1427_vm1 }
0x1d73   :  { %v1423_v47 = vsub.f32 1.0, %v1422_v3 }
0x1d75   :  { %v1424_v63 = vmul.f32 %v2989_v43, %v1423_v47 }
0x1d77   :  { %v1425_v6 = vadd.f32 %v2989_v43, %v1424_v63 }
0x1d79   :  { %v1429_v8 = vsel %vm1428_vm3, %v2989_v43, %v1425_v6 }
0x1d7a   :  { %v1434_v9 = vsel %vm1431_vm4, %v1433_v7, %v1429_v8 }
0x1d7b   :  { %v1436_v10 = vmul.f32 2.0, %v1434_v9  ;;  %v1438_v26 = vmul.f32 %v1434_v9, %v3512_v41  ;;  %v276_v41 = vadd.f32 %v3085_v40, %v275_v39 }
0x1d7d   :  { %v2693_v11 = vadd.f32 -1.0, %v1436_v10  ;;  %v295_v44 = vadd.f32 %v294_v42, %v276_v41 }
0x1d7f   :  { %1440 = vrot.lane.b32.xlu0 %v2693_v11, %s3128_s30  ;;  %v314_v48 = vadd.f32 %v313_v46, %v295_v44 }
0x1d81   :  { %321 = vst.msk [vmem:[#allocation2 + $0x10] sm:$0xff] %vm318_vm0, %v314_v48 }
0x1d88   :  { %v1455_v3 = vld [vmem:[#allocation2 + $0x10] sm:$0x1]  ;;  %v1525_v55 = vld [vmem:[#allocation2 + $0x11] sm:$0x1] }
0x1df1   :  { %v1441_v12 = vpop.permute.xlu0 %1440 }
0x1df2   :  { %v1443_v13 = vmul.f32 %v1441_v12, %v1434_v9 }
0x1df4   :  { %1445 = vrot.lane.b32.xlu1 %v1443_v13, %s3127_s18 }
0x1e66   :  { %v1446_v28 = vpop.permute.xlu1 %1445 }
0x1e67   :  { %v3546_v29 = vadd.f32 %v1446_v28, %v1438_v26 }
0x1e69   :  { %2990 = vtanh.f32 %v3546_v29 }
0x1e6f   :  { %v2991_v30 = vpop.eup %2990 }
0x1e70   :  { %1451 = vrot.lane.b32.xlu2 %v2991_v30, %s3129_s8 }
0x1eca   :  { %v1452_v31 = vpop.permute.xlu2 %1451 }
0x1ecb   :  { %v1454_v36 = vmul.f32 %v1452_v31, %v1434_v9 }
0x1ecd   :  { %1469 = vperm.xlu2 %2839, %v1454_v36   ;;  %1463 = vperm.xlu1 %2838, %v1454_v36  }
0x1ece   :  { %1458 = vperm.xlu0 %2834, %v1454_v36  }
0x1ed5   :  { %2841 = vset.pattern.permute.xlu1 %v3133_v37 }
0x1ed6   :  { %2840 = vset.pattern.permute.xlu0 %v3134_v38  ;;  %1481 = vperm.xlu1 %2841, %v1454_v36  }
0x1ed7   :  { %1474 = vperm.xlu0 %2840, %v1454_v36  }
0x1ede   :  { %2843 = vset.pattern.permute.xlu1 %v3130_v32 }
0x1edf   :  { %2842 = vset.pattern.permute.xlu0 %v3131_v33 }
0x1f27   :  { %v1470_v58 = vpop.permute.xlu2 %1469 }
0x1f28   :  { %v1472_v62 = vmul.f32 %v3435_v25, %v1470_v58 }
0x1f3f   :  { %v1464_v57 = vpop.permute.xlu1 %1463 }
0x1f40   :  { %v1459_v56 = vpop.permute.xlu0 %1458  ;;  %v1466_v59 = vmul.f32 %v3423_v20, %v1464_v57 }
0x1f41   :  { %v1461_v60 = vmul.f32 %v3429_v22, %v1459_v56 }
0x1f43   :  { %v1467_v45 = vadd.f32 %v1466_v59, %v1461_v60 }
0x1f48   :  { %v1482_v49 = vpop.permute.xlu1 %1481 }
0x1f49   :  { %v1475_v61 = vpop.permute.xlu0 %1474  ;;  %v1484_v2 = vmul.f32 %v3447_v35, %v1482_v49 }
0x1f4a   :  { %v1477_v0 = vmul.f32 %v3441_v27, %v1475_v61 }
0x1f4c   :  { %v1478_v1 = vadd.f32 %v1477_v0, %v1472_v62 }
0x1f4e   :  { %v1479_v43 = vadd.f32 %v1478_v1, %v1467_v45 }
0x1f50   :  { %v1485_v47 = vadd.f32 %v1484_v2, %v1479_v43 }
0x1f52   :  { %v1486_v4 = vadd.f32 %v1485_v47, %v1455_v3 }
0x1f54   :  { %v2694_v63 = vmul.f32 -1.442695, %v1486_v4 }
0x1f56   :  { %2992 = vpow2.f32 %v2694_v63 }
0x1f5c   :  { %v2993_v5 = vpop.eup %2992 }
0x1f5d   :  { %v1490_v6 = vadd.f32 1.0, %v2993_v5 }
0x1f5f   :  { %2994 = vrcp.f32 %v1490_v6  ;;  %v1502_v10 = vand.u32 2147483648, %v1490_v6  ;;  %v1500_v12 = vand.u32 2147483647, %v1490_v6  ;;  %vm1496_vm6 = vweird.f32 %v1490_v6 }
0x1f61   :  { %v1503_v14 = vor.u32 1.1754944e-38, %v1502_v10  ;;  %vm1501_vm8 = vcmp.eq.f32.partialorder %v1500_v12, 8.507059e+37  ;;  %v3586_v10 = vld [vmem:[%s3806_s4 + $0x1] sm:$0x1]  ;;  %v3592_v12 = vld [vmem:[%s3806_s4] sm:$0x1] }
0x1f65   :  { %v2995_v7 = vpop.eup %2994 }
0x1f66   :  { %v1492_v8 = vmul.f32 %v2995_v7, %v1490_v6  ;;  %vm1497_vm0 = vweird.f32 %v2995_v7 }
0x1f67   :  { %vm1498_vm7 = vmor %vm1496_vm6, %vm1497_vm0 }
0x1f68   :  { %v1493_v9 = vsub.f32 1.0, %v1492_v8 }
0x1f6a   :  { %v1494_v11 = vmul.f32 %v2995_v7, %v1493_v9 }
0x1f6c   :  { %v1495_v13 = vadd.f32 %v2995_v7, %v1494_v11 }
0x1f6e   :  { %v1499_v15 = vsel %vm1498_vm7, %v2995_v7, %v1495_v13 }
0x1f6f   :  { %v1504_v16 = vsel %vm1501_vm8, %v1503_v14, %v1499_v15  ;;  %v3598_v15 = vld [vmem:[%s3806_s4 + $0x2] sm:$0x1] }
0x1f70   :  { %v1506_v17 = vmul.f32 2.0, %v1504_v16  ;;  %v1508_v23 = vmul.f32 %v1504_v16, %v3546_v29 }
0x1f72   :  { %v2695_v18 = vadd.f32 -1.0, %v1506_v17  ;;  %v3604_v17 = vld [vmem:[%s3806_s4 + $0x3] sm:$0x1] }
0x1f74   :  { %1510 = vrot.lane.b32.xlu2 %v2695_v18, %s3128_s30 }
0x1fce   :  { %v1511_v19 = vpop.permute.xlu2 %1510 }
0x1fcf   :  { %v1513_v21 = vmul.f32 %v1511_v19, %v1504_v16 }
0x1fd1   :  { %1515 = vrot.lane.b32.xlu1 %v1513_v21, %s3127_s18 }
0x2043   :  { %v1516_v24 = vpop.permute.xlu1 %1515 }
0x2044   :  { %v1518_v26 = vadd.f32 %v1516_v24, %v1508_v23  ;;  %v3610_v24 = vld [vmem:[%s3806_s4 + $0x4] sm:$0x1] }
0x2046   :  { %2996 = vtanh.f32 %v1518_v26 }
0x204c   :  { %v2997_v28 = vpop.eup %2996 }
0x204d   :  { %1521 = vrot.lane.b32.xlu2 %v2997_v28, %s3129_s8 }
0x20a7   :  { %v1522_v30 = vpop.permute.xlu2 %1521 }
0x20a8   :  { %v1524_v31 = vmul.f32 %v1522_v30, %v1504_v16 }
0x20aa   :  { %1539 = vperm.xlu2 %2839, %v1524_v31   ;;  %1533 = vperm.xlu1 %2843, %v1524_v31  }
0x20ab   :  { %1528 = vperm.xlu0 %2842, %v1524_v31  }
0x20b2   :  { %2845 = vset.pattern.permute.xlu2 %v3133_v37  ;;  %2844 = vset.pattern.permute.xlu1 %v3134_v38 }
0x20b3   :  { %1551 = vperm.xlu2 %2845, %v1524_v31   ;;  %1544 = vperm.xlu1 %2844, %v1524_v31   ;;  %v1595_v31 = vld [vmem:[#allocation2 + $0x12] sm:$0x1] }
0x20bb   :  { %2847 = vset.pattern.permute.xlu2 %v3132_v34  ;;  %2846 = vset.pattern.permute.xlu1 %v3130_v32 }
0x2104   :  { %v1540_v36 = vpop.permute.xlu2 %1539 }
0x2105   :  { %v1542_v44 = vmul.f32 %v3435_v25, %v1540_v36 }
0x210d   :  { %v1552_v48 = vpop.permute.xlu2 %1551 }
0x210e   :  { %v1554_v52 = vmul.f32 %v3447_v35, %v1552_v48 }
0x211c   :  { %v1534_v29 = vpop.permute.xlu1 %1533 }
0x211d   :  { %v1529_v39 = vpop.permute.xlu0 %1528  ;;  %v1536_v40 = vmul.f32 %v3423_v20, %v1534_v29 }
0x211e   :  { %v1531_v41 = vmul.f32 %v3429_v22, %v1529_v39 }
0x2120   :  { %v1537_v50 = vadd.f32 %v1536_v40, %v1531_v41 }
0x2125   :  { %v1545_v42 = vpop.permute.xlu1 %1544 }
0x2126   :  { %v1547_v46 = vmul.f32 %v3441_v27, %v1545_v42 }
0x2128   :  { %v1548_v51 = vadd.f32 %v1547_v46, %v1542_v44 }
0x212a   :  { %v1549_v53 = vadd.f32 %v1548_v51, %v1537_v50 }
0x212c   :  { %v1555_v54 = vadd.f32 %v1554_v52, %v1549_v53 }
0x212e   :  { %v1556_v56 = vadd.f32 %v1555_v54, %v1525_v55 }
0x2130   :  { %v2696_v57 = vmul.f32 -1.442695, %v1556_v56 }
0x2132   :  { %2998 = vpow2.f32 %v2696_v57 }
0x2138   :  { %v2999_v58 = vpop.eup %2998 }
0x2139   :  { %v1560_v20 = vadd.f32 1.0, %v2999_v58 }
0x213b   :  { %3000 = vrcp.f32 %v1560_v20  ;;  %v1572_v25 = vand.u32 2147483648, %v1560_v20  ;;  %v1570_v27 = vand.u32 2147483647, %v1560_v20  ;;  %vm1566_vm10 = vweird.f32 %v1560_v20 }
0x213d   :  { %v1573_v35 = vor.u32 1.1754944e-38, %v1572_v25  ;;  %vm1571_vm12 = vcmp.eq.f32.partialorder %v1570_v27, 8.507059e+37 }
0x2141   :  { %v3001_v22 = vpop.eup %3000 }
0x2142   :  { %v1562_v59 = vmul.f32 %v3001_v22, %v1560_v20  ;;  %vm1567_vm9 = vweird.f32 %v3001_v22 }
0x2143   :  { %vm1568_vm11 = vmor %vm1566_vm10, %vm1567_vm9 }
0x2144   :  { %v1563_v60 = vsub.f32 1.0, %v1562_v59 }
0x2146   :  { %v1564_v61 = vmul.f32 %v3001_v22, %v1563_v60 }
0x2148   :  { %v1565_v62 = vadd.f32 %v3001_v22, %v1564_v61 }
0x214a   :  { %v1569_v0 = vsel %vm1568_vm11, %v3001_v22, %v1565_v62 }
0x214b   :  { %v1574_v49 = vsel %vm1571_vm12, %v1573_v35, %v1569_v0 }
0x214c   :  { %v1576_v45 = vmul.f32 2.0, %v1574_v49  ;;  %v1578_v3 = vmul.f32 %v1574_v49, %v1518_v26 }
0x214e   :  { %v2697_v1 = vadd.f32 -1.0, %v1576_v45 }
0x2150   :  { %1580 = vrot.lane.b32.xlu0 %v2697_v1, %s3128_s30 }
0x21c2   :  { %v1581_v2 = vpop.permute.xlu0 %1580 }
0x21c3   :  { %v1583_v43 = vmul.f32 %v1581_v2, %v1574_v49 }
0x21c5   :  { %1585 = vrot.lane.b32.xlu1 %v1583_v43, %s3127_s18 }
0x2237   :  { %v1586_v47 = vpop.permute.xlu1 %1585 }
0x2238   :  { %v1588_v4 = vadd.f32 %v1586_v47, %v1578_v3 }
0x223a   :  { %3002 = vtanh.f32 %v1588_v4 }
0x2240   :  { %v3003_v63 = vpop.eup %3002 }
0x2241   :  { %1591 = vrot.lane.b32.xlu2 %v3003_v63, %s3129_s8 }
0x229b   :  { %v1592_v5 = vpop.permute.xlu2 %1591 }
0x229c   :  { %v1594_v6 = vmul.f32 %v1592_v5, %v1574_v49 }
0x229e   :  { %1609 = vperm.xlu2 %2847, %v1594_v6   ;;  %1603 = vperm.xlu1 %2846, %v1594_v6  }
0x229f   :  { %1598 = vperm.xlu0 %2842, %v1594_v6  }
0x22a6   :  { %2849 = vset.pattern.permute.xlu1 %v3133_v37 }
0x22a7   :  { %2848 = vset.pattern.permute.xlu0 %v3134_v38  ;;  %1621 = vperm.xlu1 %2849, %v1594_v6  }
0x22a8   :  { %1614 = vperm.xlu0 %2848, %v1594_v6   ;;  %v1665_v6 = vld [vmem:[#allocation2 + $0x13] sm:$0x1] }
0x22af   :  { %2851 = vset.pattern.permute.xlu1 %v3130_v32 }
0x22b0   :  { %2850 = vset.pattern.permute.xlu0 %v3131_v33 }
0x22f8   :  { %v1610_v9 = vpop.permute.xlu2 %1609 }
0x22f9   :  { %v1612_v16 = vmul.f32 %v3598_v15, %v1610_v9 }
0x2310   :  { %v1604_v8 = vpop.permute.xlu1 %1603 }
0x2311   :  { %v1599_v7 = vpop.permute.xlu0 %1598  ;;  %v1606_v11 = vmul.f32 %v3586_v10, %v1604_v8 }
0x2312   :  { %v1601_v13 = vmul.f32 %v3592_v12, %v1599_v7 }
0x2314   :  { %v1607_v21 = vadd.f32 %v1606_v11, %v1601_v13 }
0x2319   :  { %v1622_v19 = vpop.permute.xlu1 %1621 }
0x231a   :  { %v1615_v14 = vpop.permute.xlu0 %1614  ;;  %v1624_v26 = vmul.f32 %v3610_v24, %v1622_v19 }
0x231b   :  { %v1617_v18 = vmul.f32 %v3604_v17, %v1615_v14 }
0x231d   :  { %v1618_v23 = vadd.f32 %v1617_v18, %v1612_v16 }
0x231f   :  { %v1619_v28 = vadd.f32 %v1618_v23, %v1607_v21 }
0x2321   :  { %v1625_v30 = vadd.f32 %v1624_v26, %v1619_v28 }
0x2323   :  { %v1626_v29 = vadd.f32 %v1625_v30, %v1595_v31 }
0x2325   :  { %v2698_v36 = vmul.f32 -1.442695, %v1626_v29 }
0x2327   :  { %3004 = vpow2.f32 %v2698_v36 }
0x232d   :  { %v3005_v39 = vpop.eup %3004 }
0x232e   :  { %v1630_v40 = vadd.f32 1.0, %v3005_v39 }
0x2330   :  { %3006 = vrcp.f32 %v1630_v40  ;;  %v1642_v46 = vand.u32 2147483648, %v1630_v40  ;;  %v1640_v50 = vand.u32 2147483647, %v1630_v40  ;;  %vm1636_vm14 = vweird.f32 %v1630_v40 }
0x2332   :  { %v1643_v52 = vor.u32 1.1754944e-38, %v1642_v46  ;;  %vm1641_vm1 = vcmp.eq.f32.partialorder %v1640_v50, 8.507059e+37 }
0x2336   :  { %v3007_v41 = vpop.eup %3006 }
0x2337   :  { %v1632_v42 = vmul.f32 %v3007_v41, %v1630_v40  ;;  %vm1637_vm13 = vweird.f32 %v3007_v41 }
0x2338   :  { %vm1638_vm15 = vmor %vm1636_vm14, %vm1637_vm13 }
0x2339   :  { %v1633_v44 = vsub.f32 1.0, %v1632_v42 }
0x233b   :  { %v1634_v48 = vmul.f32 %v3007_v41, %v1633_v44 }
0x233d   :  { %v1635_v51 = vadd.f32 %v3007_v41, %v1634_v48 }
0x233f   :  { %v1639_v53 = vsel %vm1638_vm15, %v3007_v41, %v1635_v51 }
0x2340   :  { %v1644_v54 = vsel %vm1641_vm1, %v1643_v52, %v1639_v53 }
0x2341   :  { %v1646_v55 = vmul.f32 2.0, %v1644_v54  ;;  %v1648_v20 = vmul.f32 %v1644_v54, %v1588_v4 }
0x2343   :  { %v2699_v56 = vadd.f32 -1.0, %v1646_v55 }
0x2345   :  { %1650 = vrot.lane.b32.xlu2 %v2699_v56, %s3128_s30 }
0x239f   :  { %v1651_v57 = vpop.permute.xlu2 %1650 }
0x23a0   :  { %v1653_v58 = vmul.f32 %v1651_v57, %v1644_v54 }
0x23a2   :  { %1655 = vrot.lane.b32.xlu1 %v1653_v58, %s3127_s18 }
0x2414   :  { %v1656_v22 = vpop.permute.xlu1 %1655 }
0x2415   :  { %v1658_v59 = vadd.f32 %v1656_v22, %v1648_v20 }
0x2417   :  { %3008 = vtanh.f32 %v1658_v59 }
0x241d   :  { %v3009_v60 = vpop.eup %3008 }
0x241e   :  { %1661 = vrot.lane.b32.xlu2 %v3009_v60, %s3129_s8 }
0x2478   :  { %v1662_v25 = vpop.permute.xlu2 %1661 }
0x2479   :  { %v1664_v61 = vmul.f32 %v1662_v25, %v1644_v54 }
0x247b   :  { %1679 = vperm.xlu2 %2847, %v1664_v61   ;;  %1673 = vperm.xlu1 %2851, %v1664_v61  }
0x247c   :  { %1668 = vperm.xlu0 %2850, %v1664_v61  }
0x2483   :  { %2853 = vset.pattern.permute.xlu2 %v3133_v37  ;;  %2852 = vset.pattern.permute.xlu1 %v3134_v38 }
0x2484   :  { %1691 = vperm.xlu2 %2853, %v1664_v61   ;;  %1684 = vperm.xlu1 %2852, %v1664_v61   ;;  %v1735_v61 = vld [vmem:[#allocation2 + $0x14] sm:$0x1] }
0x248c   :  { %2855 = vset.pattern.permute.xlu2 %v3132_v34  ;;  %2854 = vset.pattern.permute.xlu1 %v3130_v32 }
0x24d5   :  { %v1680_v62 = vpop.permute.xlu2 %1679 }
0x24d6   :  { %v1682_v1 = vmul.f32 %v3598_v15, %v1680_v62 }
0x24de   :  { %v1692_v43 = vpop.permute.xlu2 %1691 }
0x24df   :  { %v1694_v4 = vmul.f32 %v3610_v24, %v1692_v43 }
0x24ed   :  { %v1674_v27 = vpop.permute.xlu1 %1673 }
0x24ee   :  { %v1669_v35 = vpop.permute.xlu0 %1668  ;;  %v1676_v0 = vmul.f32 %v3586_v10, %v1674_v27 }
0x24ef   :  { %v1671_v49 = vmul.f32 %v3592_v12, %v1669_v35 }
0x24f1   :  { %v1677_v3 = vadd.f32 %v1676_v0, %v1671_v49 }
0x24f6   :  { %v1685_v45 = vpop.permute.xlu1 %1684 }
0x24f7   :  { %v1687_v2 = vmul.f32 %v3604_v17, %v1685_v45 }
0x24f9   :  { %v1688_v47 = vadd.f32 %v1687_v2, %v1682_v1 }
0x24fb   :  { %v1689_v63 = vadd.f32 %v1688_v47, %v1677_v3 }
0x24fd   :  { %v1695_v5 = vadd.f32 %v1694_v4, %v1689_v63 }
0x24ff   :  { %v1696_v7 = vadd.f32 %v1695_v5, %v1665_v6 }
0x2501   :  { %v2700_v8 = vmul.f32 -1.442695, %v1696_v7 }
0x2503   :  { %3010 = vpow2.f32 %v2700_v8 }
0x2509   :  { %v3011_v9 = vpop.eup %3010 }
0x250a   :  { %v1700_v11 = vadd.f32 1.0, %v3011_v9 }
0x250c   :  { %3012 = vrcp.f32 %v1700_v11  ;;  %v1712_v18 = vand.u32 2147483648, %v1700_v11  ;;  %v1710_v21 = vand.u32 2147483647, %v1700_v11  ;;  %vm1706_vm3 = vweird.f32 %v1700_v11 }
0x250e   :  { %v1713_v26 = vor.u32 1.1754944e-38, %v1712_v18  ;;  %vm1711_vm5 = vcmp.eq.f32.partialorder %v1710_v21, 8.507059e+37 }
0x2512   :  { %v3013_v13 = vpop.eup %3012 }
0x2513   :  { %v1702_v14 = vmul.f32 %v3013_v13, %v1700_v11  ;;  %vm1707_vm2 = vweird.f32 %v3013_v13 }
0x2514   :  { %vm1708_vm4 = vmor %vm1706_vm3, %vm1707_vm2 }
0x2515   :  { %v1703_v16 = vsub.f32 1.0, %v1702_v14 }
0x2517   :  { %v1704_v19 = vmul.f32 %v3013_v13, %v1703_v16 }
0x2519   :  { %v1705_v23 = vadd.f32 %v3013_v13, %v1704_v19 }
0x251b   :  { %v1709_v28 = vsel %vm1708_vm4, %v3013_v13, %v1705_v23 }
0x251c   :  { %v1714_v30 = vsel %vm1711_vm5, %v1713_v26, %v1709_v28 }
0x251d   :  { %v1716_v31 = vmul.f32 2.0, %v1714_v30  ;;  %v1718_v40 = vmul.f32 %v1714_v30, %v1658_v59 }
0x251f   :  { %v2701_v29 = vadd.f32 -1.0, %v1716_v31 }
0x2521   :  { %1720 = vrot.lane.b32.xlu0 %v2701_v29, %s3128_s30 }
0x2593   :  { %v1721_v36 = vpop.permute.xlu0 %1720 }
0x2594   :  { %v1723_v39 = vmul.f32 %v1721_v36, %v1714_v30 }
0x2596   :  { %1725 = vrot.lane.b32.xlu1 %v1723_v39, %s3127_s18 }
0x2608   :  { %v1726_v41 = vpop.permute.xlu1 %1725 }
0x2609   :  { %v1728_v42 = vadd.f32 %v1726_v41, %v1718_v40 }
0x260b   :  { %3014 = vtanh.f32 %v1728_v42 }
0x2611   :  { %v3015_v44 = vpop.eup %3014 }
0x2612   :  { %1731 = vrot.lane.b32.xlu2 %v3015_v44, %s3129_s8 }
0x266c   :  { %v1732_v46 = vpop.permute.xlu2 %1731 }
0x266d   :  { %v1734_v48 = vmul.f32 %v1732_v46, %v1714_v30 }
0x266f   :  { %1749 = vperm.xlu2 %2855, %v1734_v48   ;;  %1743 = vperm.xlu1 %2854, %v1734_v48  }
0x2670   :  { %1738 = vperm.xlu0 %2850, %v1734_v48  }
0x2677   :  { %2857 = vset.pattern.permute.xlu1 %v3133_v37 }
0x2678   :  { %2856 = vset.pattern.permute.xlu0 %v3134_v38  ;;  %1761 = vperm.xlu1 %2857, %v1734_v48  }
0x2679   :  { %1754 = vperm.xlu0 %2856, %v1734_v48   ;;  %v1805_v48 = vld [vmem:[#allocation2 + $0x15] sm:$0x1] }
0x2680   :  { %2859 = vset.pattern.permute.xlu1 %v3130_v32 }
0x2681   :  { %2858 = vset.pattern.permute.xlu0 %v3131_v33 }
0x26c9   :  { %v1750_v52 = vpop.permute.xlu2 %1749 }
0x26ca   :  { %v1752_v56 = vmul.f32 %v3598_v15, %v1750_v52 }
0x26e1   :  { %v1744_v51 = vpop.permute.xlu1 %1743 }
0x26e2   :  { %v1739_v50 = vpop.permute.xlu0 %1738  ;;  %v1746_v53 = vmul.f32 %v3586_v10, %v1744_v51 }
0x26e3   :  { %v1741_v54 = vmul.f32 %v3592_v12, %v1739_v50 }
0x26e5   :  { %v1747_v20 = vadd.f32 %v1746_v53, %v1741_v54 }
0x26ea   :  { %v1762_v58 = vpop.permute.xlu1 %1761 }
0x26eb   :  { %v1755_v55 = vpop.permute.xlu0 %1754  ;;  %v1764_v59 = vmul.f32 %v3610_v24, %v1762_v58 }
0x26ec   :  { %v1757_v57 = vmul.f32 %v3604_v17, %v1755_v55 }
0x26ee   :  { %v1758_v22 = vadd.f32 %v1757_v57, %v1752_v56 }
0x26f0   :  { %v1759_v60 = vadd.f32 %v1758_v22, %v1747_v20 }
0x26f2   :  { %v1765_v25 = vadd.f32 %v1764_v59, %v1759_v60 }
0x26f4   :  { %v1766_v27 = vadd.f32 %v1765_v25, %v1735_v61 }
0x26f6   :  { %v2702_v62 = vmul.f32 -1.442695, %v1766_v27 }
0x26f8   :  { %3016 = vpow2.f32 %v2702_v62 }
0x26fe   :  { %v3017_v35 = vpop.eup %3016 }
0x26ff   :  { %v1770_v0 = vadd.f32 1.0, %v3017_v35 }
0x2701   :  { %3018 = vrcp.f32 %v1770_v0  ;;  %v1782_v2 = vand.u32 2147483648, %v1770_v0  ;;  %v1780_v3 = vand.u32 2147483647, %v1770_v0  ;;  %vm1776_vm6 = vweird.f32 %v1770_v0 }
0x2703   :  { %v1783_v4 = vor.u32 1.1754944e-38, %v1782_v2  ;;  %vm1781_vm8 = vcmp.eq.f32.partialorder %v1780_v3, 8.507059e+37 }
0x2707   :  { %v3019_v49 = vpop.eup %3018 }
0x2708   :  { %v1772_v45 = vmul.f32 %v3019_v49, %v1770_v0  ;;  %vm1777_vm0 = vweird.f32 %v3019_v49 }
0x2709   :  { %vm1778_vm7 = vmor %vm1776_vm6, %vm1777_vm0 }
0x270a   :  { %v1773_v1 = vsub.f32 1.0, %v1772_v45 }
0x270c   :  { %v1774_v43 = vmul.f32 %v3019_v49, %v1773_v1 }
0x270e   :  { %v1775_v47 = vadd.f32 %v3019_v49, %v1774_v43 }
0x2710   :  { %v1779_v63 = vsel %vm1778_vm7, %v3019_v49, %v1775_v47 }
0x2711   :  { %v1784_v5 = vsel %vm1781_vm8, %v1783_v4, %v1779_v63 }
0x2712   :  { %v1786_v6 = vmul.f32 2.0, %v1784_v5  ;;  %v1788_v11 = vmul.f32 %v1784_v5, %v1728_v42 }
0x2714   :  { %v2703_v7 = vadd.f32 -1.0, %v1786_v6 }
0x2716   :  { %1790 = vrot.lane.b32.xlu2 %v2703_v7, %s3128_s30 }
0x2770   :  { %v1791_v8 = vpop.permute.xlu2 %1790 }
0x2771   :  { %v1793_v9 = vmul.f32 %v1791_v8, %v1784_v5 }
0x2773   :  { %1795 = vrot.lane.b32.xlu1 %v1793_v9, %s3127_s18 }
0x27e5   :  { %v1796_v13 = vpop.permute.xlu1 %1795 }
0x27e6   :  { %v1798_v14 = vadd.f32 %v1796_v13, %v1788_v11 }
0x27e8   :  { %3020 = vtanh.f32 %v1798_v14 }
0x27ee   :  { %v3021_v16 = vpop.eup %3020 }
0x27ef   :  { %1801 = vrot.lane.b32.xlu2 %v3021_v16, %s3129_s8 }
0x2849   :  { %v1802_v18 = vpop.permute.xlu2 %1801 }
0x284a   :  { %v1804_v19 = vmul.f32 %v1802_v18, %v1784_v5 }
0x284c   :  { %1819 = vperm.xlu2 %2855, %v1804_v19   ;;  %1813 = vperm.xlu1 %2859, %v1804_v19  }
0x284d   :  { %1808 = vperm.xlu0 %2858, %v1804_v19  }
0x2854   :  { %2861 = vset.pattern.permute.xlu2 %v3133_v37  ;;  %2860 = vset.pattern.permute.xlu1 %v3134_v38 }
0x2855   :  { %1831 = vperm.xlu2 %2861, %v1804_v19   ;;  %1824 = vperm.xlu1 %2860, %v1804_v19   ;;  %v1875_v19 = vld [vmem:[#allocation2 + $0x16] sm:$0x1] }
0x285d   :  { %2863 = vset.pattern.permute.xlu2 %v3132_v34  ;;  %2862 = vset.pattern.permute.xlu1 %v3130_v32 }
0x28a6   :  { %v1820_v23 = vpop.permute.xlu2 %1819 }
0x28a7   :  { %v1822_v29 = vmul.f32 %v3598_v15, %v1820_v23 }
0x28af   :  { %v1832_v39 = vpop.permute.xlu2 %1831 }
0x28b0   :  { %v1834_v42 = vmul.f32 %v3610_v24, %v1832_v39 }
0x28be   :  { %v1814_v21 = vpop.permute.xlu1 %1813 }
0x28bf   :  { %v1809_v26 = vpop.permute.xlu0 %1808  ;;  %v1816_v28 = vmul.f32 %v3586_v10, %v1814_v21 }
0x28c0   :  { %v1811_v30 = vmul.f32 %v3592_v12, %v1809_v26 }
0x28c2   :  { %v1817_v40 = vadd.f32 %v1816_v28, %v1811_v30 }
0x28c7   :  { %v1825_v31 = vpop.permute.xlu1 %1824 }
0x28c8   :  { %v1827_v36 = vmul.f32 %v3604_v17, %v1825_v31 }
0x28ca   :  { %v1828_v41 = vadd.f32 %v1827_v36, %v1822_v29 }
0x28cc   :  { %v1829_v44 = vadd.f32 %v1828_v41, %v1817_v40 }
0x28ce   :  { %v1835_v46 = vadd.f32 %v1834_v42, %v1829_v44 }
0x28d0   :  { %v1836_v50 = vadd.f32 %v1835_v46, %v1805_v48 }
0x28d2   :  { %v2704_v51 = vmul.f32 -1.442695, %v1836_v50 }
0x28d4   :  { %3022 = vpow2.f32 %v2704_v51 }
0x28da   :  { %v3023_v52 = vpop.eup %3022 }
0x28db   :  { %v1840_v53 = vadd.f32 1.0, %v3023_v52 }
0x28dd   :  { %3024 = vrcp.f32 %v1840_v53  ;;  %v1852_v57 = vand.u32 2147483648, %v1840_v53  ;;  %v1850_v20 = vand.u32 2147483647, %v1840_v53  ;;  %vm1846_vm10 = vweird.f32 %v1840_v53 }
0x28df   :  { %v1853_v59 = vor.u32 1.1754944e-38, %v1852_v57  ;;  %vm1851_vm12 = vcmp.eq.f32.partialorder %v1850_v20, 8.507059e+37 }
0x28e3   :  { %v3025_v54 = vpop.eup %3024 }
0x28e4   :  { %v1842_v55 = vmul.f32 %v3025_v54, %v1840_v53  ;;  %vm1847_vm9 = vweird.f32 %v3025_v54 }
0x28e5   :  { %vm1848_vm11 = vmor %vm1846_vm10, %vm1847_vm9 }
0x28e6   :  { %v1843_v56 = vsub.f32 1.0, %v1842_v55 }
0x28e8   :  { %v1844_v58 = vmul.f32 %v3025_v54, %v1843_v56 }
0x28ea   :  { %v1845_v22 = vadd.f32 %v3025_v54, %v1844_v58 }
0x28ec   :  { %v1849_v60 = vsel %vm1848_vm11, %v3025_v54, %v1845_v22 }
0x28ed   :  { %v1854_v25 = vsel %vm1851_vm12, %v1853_v59, %v1849_v60 }
0x28ee   :  { %v1856_v61 = vmul.f32 2.0, %v1854_v25  ;;  %v1858_v0 = vmul.f32 %v1854_v25, %v1798_v14 }
0x28f0   :  { %v2705_v27 = vadd.f32 -1.0, %v1856_v61 }
0x28f2   :  { %1860 = vrot.lane.b32.xlu0 %v2705_v27, %s3128_s30 }
0x2964   :  { %v1861_v62 = vpop.permute.xlu0 %1860 }
0x2965   :  { %v1863_v35 = vmul.f32 %v1861_v62, %v1854_v25 }
0x2967   :  { %1865 = vrot.lane.b32.xlu1 %v1863_v35, %s3127_s18 }
0x29d9   :  { %v1866_v49 = vpop.permute.xlu1 %1865 }
0x29da   :  { %v1868_v45 = vadd.f32 %v1866_v49, %v1858_v0 }
0x29dc   :  { %3026 = vtanh.f32 %v1868_v45 }
0x29e2   :  { %v3027_v1 = vpop.eup %3026 }
0x29e3   :  { %1871 = vrot.lane.b32.xlu2 %v3027_v1, %s3129_s8 }
0x2a3d   :  { %v1872_v2 = vpop.permute.xlu2 %1871 }
0x2a3e   :  { %v1874_v43 = vmul.f32 %v1872_v2, %v1854_v25 }
0x2a40   :  { %1889 = vperm.xlu2 %2863, %v1874_v43   ;;  %1883 = vperm.xlu1 %2862, %v1874_v43  }
0x2a41   :  { %1878 = vperm.xlu0 %2858, %v1874_v43  }
0x2a48   :  { %2865 = vset.pattern.permute.xlu1 %v3133_v37 }
0x2a49   :  { %2864 = vset.pattern.permute.xlu0 %v3134_v38  ;;  %1901 = vperm.xlu1 %2865, %v1874_v43  }
0x2a4a   :  { %1894 = vperm.xlu0 %2864, %v1874_v43   ;;  %v1945_v43 = vld [vmem:[#allocation2 + $0x17] sm:$0x1] }
0x2a51   :  { %2867 = vset.pattern.permute.xlu1 %v3130_v32 }
0x2a52   :  { %2866 = vset.pattern.permute.xlu0 %v3131_v33 }
0x2a9a   :  { %v1890_v4 = vpop.permute.xlu2 %1889 }
0x2a9b   :  { %v1892_v7 = vmul.f32 %v3598_v15, %v1890_v4 }
0x2ab2   :  { %v1884_v47 = vpop.permute.xlu1 %1883 }
0x2ab3   :  { %v1879_v3 = vpop.permute.xlu0 %1878  ;;  %v1886_v63 = vmul.f32 %v3586_v10, %v1884_v47 }
0x2ab4   :  { %v1881_v5 = vmul.f32 %v3592_v12, %v1879_v3 }
0x2ab6   :  { %v1887_v11 = vadd.f32 %v1886_v63, %v1881_v5 }
0x2abb   :  { %v1902_v9 = vpop.permute.xlu1 %1901 }
0x2abc   :  { %v1895_v6 = vpop.permute.xlu0 %1894  ;;  %v1904_v14 = vmul.f32 %v3610_v24, %v1902_v9 }
0x2abd   :  { %v1897_v8 = vmul.f32 %v3604_v17, %v1895_v6 }
0x2abf   :  { %v1898_v13 = vadd.f32 %v1897_v8, %v1892_v7 }
0x2ac1   :  { %v1899_v16 = vadd.f32 %v1898_v13, %v1887_v11 }
0x2ac3   :  { %v1905_v18 = vadd.f32 %v1904_v14, %v1899_v16 }
0x2ac5   :  { %v1906_v21 = vadd.f32 %v1905_v18, %v1875_v19 }
0x2ac7   :  { %v2706_v23 = vmul.f32 -1.442695, %v1906_v21 }
0x2ac9   :  { %3028 = vpow2.f32 %v2706_v23 }
0x2acf   :  { %v3029_v26 = vpop.eup %3028 }
0x2ad0   :  { %v1910_v28 = vadd.f32 1.0, %v3029_v26 }
0x2ad2   :  { %3030 = vrcp.f32 %v1910_v28  ;;  %v1922_v36 = vand.u32 2147483648, %v1910_v28  ;;  %v1920_v40 = vand.u32 2147483647, %v1910_v28  ;;  %vm1916_vm14 = vweird.f32 %v1910_v28 }
0x2ad4   :  { %v1923_v42 = vor.u32 1.1754944e-38, %v1922_v36  ;;  %vm1921_vm1 = vcmp.eq.f32.partialorder %v1920_v40, 8.507059e+37 }
0x2ad8   :  { %v3031_v30 = vpop.eup %3030 }
0x2ad9   :  { %v1912_v31 = vmul.f32 %v3031_v30, %v1910_v28  ;;  %vm1917_vm13 = vweird.f32 %v3031_v30 }
0x2ada   :  { %vm1918_vm15 = vmor %vm1916_vm14, %vm1917_vm13 }
0x2adb   :  { %v1913_v29 = vsub.f32 1.0, %v1912_v31 }
0x2add   :  { %v1914_v39 = vmul.f32 %v3031_v30, %v1913_v29 }
0x2adf   :  { %v1915_v41 = vadd.f32 %v3031_v30, %v1914_v39 }
0x2ae1   :  { %v1919_v44 = vsel %vm1918_vm15, %v3031_v30, %v1915_v41 }
0x2ae2   :  { %v1924_v46 = vsel %vm1921_vm1, %v1923_v42, %v1919_v44 }
0x2ae3   :  { %v1926_v48 = vmul.f32 2.0, %v1924_v46  ;;  %v1928_v53 = vmul.f32 %v1924_v46, %v1868_v45 }
0x2ae5   :  { %v2707_v50 = vadd.f32 -1.0, %v1926_v48 }
0x2ae7   :  { %1930 = vrot.lane.b32.xlu2 %v2707_v50, %s3128_s30 }
0x2b41   :  { %v1931_v51 = vpop.permute.xlu2 %1930 }
0x2b42   :  { %v1933_v52 = vmul.f32 %v1931_v51, %v1924_v46 }
0x2b44   :  { %1935 = vrot.lane.b32.xlu1 %v1933_v52, %s3127_s18 }
0x2bb6   :  { %v1936_v54 = vpop.permute.xlu1 %1935 }
0x2bb7   :  { %v1938_v55 = vadd.f32 %v1936_v54, %v1928_v53 }
0x2bb9   :  { %3032 = vtanh.f32 %v1938_v55 }
0x2bbf   :  { %v3033_v56 = vpop.eup %3032 }
0x2bc0   :  { %1941 = vrot.lane.b32.xlu2 %v3033_v56, %s3129_s8 }
0x2c1a   :  { %v1942_v57 = vpop.permute.xlu2 %1941 }
0x2c1b   :  { %v1944_v58 = vmul.f32 %v1942_v57, %v1924_v46 }
0x2c1d   :  { %1959 = vperm.xlu2 %2863, %v1944_v58   ;;  %1953 = vperm.xlu1 %2867, %v1944_v58  }
0x2c1e   :  { %1948 = vperm.xlu0 %2866, %v1944_v58  }
0x2c25   :  { %2869 = vset.pattern.permute.xlu2 %v3133_v37  ;;  %2868 = vset.pattern.permute.xlu1 %v3134_v38 }
0x2c26   :  { %1971 = vperm.xlu2 %2869, %v1944_v58   ;;  %1964 = vperm.xlu1 %2868, %v1944_v58   ;;  %v2015_v58 = vld [vmem:[#allocation2 + $0x18] sm:$0x1] }
0x2c2e   :  { %2871 = vset.pattern.permute.xlu2 %v3132_v34  ;;  %2870 = vset.pattern.permute.xlu1 %v3130_v32 }
0x2c77   :  { %v1960_v22 = vpop.permute.xlu2 %1959 }
0x2c78   :  { %v1962_v27 = vmul.f32 %v3598_v15, %v1960_v22 }
0x2c80   :  { %v1972_v35 = vpop.permute.xlu2 %1971 }
0x2c81   :  { %v1974_v45 = vmul.f32 %v3610_v24, %v1972_v35 }
0x2c8f   :  { %v1954_v20 = vpop.permute.xlu1 %1953 }
0x2c90   :  { %v1949_v59 = vpop.permute.xlu0 %1948  ;;  %v1956_v60 = vmul.f32 %v3586_v10, %v1954_v20 }
0x2c91   :  { %v1951_v25 = vmul.f32 %v3592_v12, %v1949_v59 }
0x2c93   :  { %v1957_v0 = vadd.f32 %v1956_v60, %v1951_v25 }
0x2c98   :  { %v1965_v61 = vpop.permute.xlu1 %1964 }
0x2c99   :  { %v1967_v62 = vmul.f32 %v3604_v17, %v1965_v61 }
0x2c9b   :  { %v1968_v49 = vadd.f32 %v1967_v62, %v1962_v27 }
0x2c9d   :  { %v1969_v1 = vadd.f32 %v1968_v49, %v1957_v0 }
0x2c9f   :  { %v1975_v2 = vadd.f32 %v1974_v45, %v1969_v1 }
0x2ca1   :  { %v1976_v3 = vadd.f32 %v1975_v2, %v1945_v43 }
0x2ca3   :  { %v2708_v47 = vmul.f32 -1.442695, %v1976_v3 }
0x2ca5   :  { %3034 = vpow2.f32 %v2708_v47 }
0x2cab   :  { %v3035_v4 = vpop.eup %3034 }
0x2cac   :  { %v1980_v63 = vadd.f32 1.0, %v3035_v4 }
0x2cae   :  { %3036 = vrcp.f32 %v1980_v63  ;;  %v1992_v8 = vand.u32 2147483648, %v1980_v63  ;;  %v1990_v11 = vand.u32 2147483647, %v1980_v63  ;;  %vm1986_vm3 = vweird.f32 %v1980_v63 }
0x2cb0   :  { %v1993_v14 = vor.u32 1.1754944e-38, %v1992_v8  ;;  %vm1991_vm5 = vcmp.eq.f32.partialorder %v1990_v11, 8.507059e+37 }
0x2cb4   :  { %v3037_v5 = vpop.eup %3036 }
0x2cb5   :  { %v1982_v6 = vmul.f32 %v3037_v5, %v1980_v63  ;;  %vm1987_vm2 = vweird.f32 %v3037_v5 }
0x2cb6   :  { %vm1988_vm4 = vmor %vm1986_vm3, %vm1987_vm2 }
0x2cb7   :  { %v1983_v7 = vsub.f32 1.0, %v1982_v6 }
0x2cb9   :  { %v1984_v9 = vmul.f32 %v3037_v5, %v1983_v7 }
0x2cbb   :  { %v1985_v13 = vadd.f32 %v3037_v5, %v1984_v9 }
0x2cbd   :  { %v1989_v16 = vsel %vm1988_vm4, %v3037_v5, %v1985_v13 }
0x2cbe   :  { %v1994_v18 = vsel %vm1991_vm5, %v1993_v14, %v1989_v16 }
0x2cbf   :  { %v1996_v19 = vmul.f32 2.0, %v1994_v18  ;;  %v1998_v28 = vmul.f32 %v1994_v18, %v1938_v55 }
0x2cc1   :  { %v2709_v21 = vadd.f32 -1.0, %v1996_v19 }
0x2cc3   :  { %2000 = vrot.lane.b32.xlu0 %v2709_v21, %s3128_s30 }
0x2d35   :  { %v2001_v23 = vpop.permute.xlu0 %2000 }
0x2d36   :  { %v2003_v26 = vmul.f32 %v2001_v23, %v1994_v18 }
0x2d38   :  { %2005 = vrot.lane.b32.xlu1 %v2003_v26, %s3127_s18 }
0x2daa   :  { %v2006_v30 = vpop.permute.xlu1 %2005 }
0x2dab   :  { %v2008_v31 = vadd.f32 %v2006_v30, %v1998_v28 }
0x2dad   :  { %3038 = vtanh.f32 %v2008_v31 }
0x2db3   :  { %v3039_v29 = vpop.eup %3038 }
0x2db4   :  { %2011 = vrot.lane.b32.xlu2 %v3039_v29, %s3129_s8 }
0x2e0e   :  { %v2012_v36 = vpop.permute.xlu2 %2011 }
0x2e0f   :  { %v2014_v39 = vmul.f32 %v2012_v36, %v1994_v18 }
0x2e11   :  { %2029 = vperm.xlu2 %2871, %v2014_v39   ;;  %2023 = vperm.xlu1 %2870, %v2014_v39  }
0x2e12   :  { %2018 = vperm.xlu0 %2866, %v2014_v39  }
0x2e19   :  { %2873 = vset.pattern.permute.xlu1 %v3133_v37 }
0x2e1a   :  { %2872 = vset.pattern.permute.xlu0 %v3134_v38  ;;  %2041 = vperm.xlu1 %2873, %v2014_v39  }
0x2e1b   :  { %2034 = vperm.xlu0 %2872, %v2014_v39   ;;  %v2085_v39 = vld [vmem:[#allocation2 + $0x19] sm:$0x1] }
0x2e22   :  { %2875 = vset.pattern.permute.xlu1 %v3130_v32 }
0x2e23   :  { %2874 = vset.pattern.permute.xlu0 %v3131_v33 }
0x2e6b   :  { %v2030_v42 = vpop.permute.xlu2 %2029 }
0x2e6c   :  { %v2032_v50 = vmul.f32 %v3598_v15, %v2030_v42 }
0x2e83   :  { %v2024_v41 = vpop.permute.xlu1 %2023 }
0x2e84   :  { %v2019_v40 = vpop.permute.xlu0 %2018  ;;  %v2026_v44 = vmul.f32 %v3586_v10, %v2024_v41 }
0x2e85   :  { %v2021_v46 = vmul.f32 %v3592_v12, %v2019_v40 }
0x2e87   :  { %v2027_v53 = vadd.f32 %v2026_v44, %v2021_v46 }
0x2e8c   :  { %v2042_v52 = vpop.permute.xlu1 %2041 }
0x2e8d   :  { %v2035_v48 = vpop.permute.xlu0 %2034  ;;  %v2044_v55 = vmul.f32 %v3610_v24, %v2042_v52 }
0x2e8e   :  { %v2037_v51 = vmul.f32 %v3604_v17, %v2035_v48 }
0x2e90   :  { %v2038_v54 = vadd.f32 %v2037_v51, %v2032_v50 }
0x2e92   :  { %v2039_v56 = vadd.f32 %v2038_v54, %v2027_v53 }
0x2e94   :  { %v2045_v57 = vadd.f32 %v2044_v55, %v2039_v56 }
0x2e96   :  { %v2046_v20 = vadd.f32 %v2045_v57, %v2015_v58 }
0x2e98   :  { %v2710_v22 = vmul.f32 -1.442695, %v2046_v20 }
0x2e9a   :  { %3040 = vpow2.f32 %v2710_v22 }
0x2ea0   :  { %v3041_v59 = vpop.eup %3040 }
0x2ea1   :  { %v2050_v60 = vadd.f32 1.0, %v3041_v59 }
0x2ea3   :  { %3042 = vrcp.f32 %v2050_v60  ;;  %v2062_v62 = vand.u32 2147483648, %v2050_v60  ;;  %v2060_v0 = vand.u32 2147483647, %v2050_v60  ;;  %vm2056_vm6 = vweird.f32 %v2050_v60 }
0x2ea5   :  { %v2063_v45 = vor.u32 1.1754944e-38, %v2062_v62  ;;  %vm2061_vm8 = vcmp.eq.f32.partialorder %v2060_v0, 8.507059e+37 }
0x2ea9   :  { %v3043_v25 = vpop.eup %3042 }
0x2eaa   :  { %v2052_v61 = vmul.f32 %v3043_v25, %v2050_v60  ;;  %vm2057_vm0 = vweird.f32 %v3043_v25 }
0x2eab   :  { %vm2058_vm7 = vmor %vm2056_vm6, %vm2057_vm0 }
0x2eac   :  { %v2053_v27 = vsub.f32 1.0, %v2052_v61 }
0x2eae   :  { %v2054_v35 = vmul.f32 %v3043_v25, %v2053_v27 }
0x2eb0   :  { %v2055_v49 = vadd.f32 %v3043_v25, %v2054_v35 }
0x2eb2   :  { %v2059_v1 = vsel %vm2058_vm7, %v3043_v25, %v2055_v49 }
0x2eb3   :  { %v2064_v2 = vsel %vm2061_vm8, %v2063_v45, %v2059_v1 }
0x2eb4   :  { %v2066_v43 = vmul.f32 2.0, %v2064_v2  ;;  %v2068_v63 = vmul.f32 %v2064_v2, %v2008_v31 }
0x2eb6   :  { %v2711_v3 = vadd.f32 -1.0, %v2066_v43 }
0x2eb8   :  { %2070 = vrot.lane.b32.xlu2 %v2711_v3, %s3128_s30 }
0x2f12   :  { %v2071_v47 = vpop.permute.xlu2 %2070 }
0x2f13   :  { %v2073_v4 = vmul.f32 %v2071_v47, %v2064_v2 }
0x2f15   :  { %2075 = vrot.lane.b32.xlu1 %v2073_v4, %s3127_s18 }
0x2f87   :  { %v2076_v5 = vpop.permute.xlu1 %2075 }
0x2f88   :  { %v2078_v6 = vadd.f32 %v2076_v5, %v2068_v63 }
0x2f8a   :  { %3044 = vtanh.f32 %v2078_v6 }
0x2f90   :  { %v3045_v7 = vpop.eup %3044 }
0x2f91   :  { %2081 = vrot.lane.b32.xlu2 %v3045_v7, %s3129_s8 }
0x2feb   :  { %v2082_v8 = vpop.permute.xlu2 %2081 }
0x2fec   :  { %v2084_v9 = vmul.f32 %v2082_v8, %v2064_v2 }
0x2fee   :  { %2099 = vperm.xlu2 %2871, %v2084_v9   ;;  %2093 = vperm.xlu1 %2875, %v2084_v9  }
0x2fef   :  { %2088 = vperm.xlu0 %2874, %v2084_v9  }
0x2ff6   :  { %2877 = vset.pattern.permute.xlu2 %v3133_v37  ;;  %2876 = vset.pattern.permute.xlu1 %v3134_v38 }
0x2ff7   :  { %2111 = vperm.xlu2 %2877, %v2084_v9   ;;  %2104 = vperm.xlu1 %2876, %v2084_v9   ;;  %v2155_v9 = vld [vmem:[#allocation2 + $0x1a] sm:$0x1] }
0x2fff   :  { %2879 = vset.pattern.permute.xlu2 %v3132_v34  ;;  %2878 = vset.pattern.permute.xlu1 %v3130_v32 }
0x3048   :  { %v2100_v13 = vpop.permute.xlu2 %2099 }
0x3049   :  { %v2102_v21 = vmul.f32 %v3598_v15, %v2100_v13 }
0x3051   :  { %v2112_v26 = vpop.permute.xlu2 %2111 }
0x3052   :  { %v2114_v31 = vmul.f32 %v3610_v24, %v2112_v26 }
0x3060   :  { %v2094_v11 = vpop.permute.xlu1 %2093 }
0x3061   :  { %v2089_v14 = vpop.permute.xlu0 %2088  ;;  %v2096_v16 = vmul.f32 %v3586_v10, %v2094_v11 }
0x3062   :  { %v2091_v18 = vmul.f32 %v3592_v12, %v2089_v14 }
0x3064   :  { %v2097_v28 = vadd.f32 %v2096_v16, %v2091_v18 }
0x3069   :  { %v2105_v19 = vpop.permute.xlu1 %2104 }
0x306a   :  { %v2107_v23 = vmul.f32 %v3604_v17, %v2105_v19 }
0x306c   :  { %v2108_v30 = vadd.f32 %v2107_v23, %v2102_v21 }
0x306e   :  { %v2109_v29 = vadd.f32 %v2108_v30, %v2097_v28 }
0x3070   :  { %v2115_v36 = vadd.f32 %v2114_v31, %v2109_v29 }
0x3072   :  { %v2116_v40 = vadd.f32 %v2115_v36, %v2085_v39 }
0x3074   :  { %v2712_v41 = vmul.f32 -1.442695, %v2116_v40 }
0x3076   :  { %3046 = vpow2.f32 %v2712_v41 }
0x307c   :  { %v3047_v42 = vpop.eup %3046 }
0x307d   :  { %v2120_v44 = vadd.f32 1.0, %v3047_v42 }
0x307f   :  { %3048 = vrcp.f32 %v2120_v44  ;;  %v2132_v51 = vand.u32 2147483648, %v2120_v44  ;;  %v2130_v53 = vand.u32 2147483647, %v2120_v44  ;;  %vm2126_vm10 = vweird.f32 %v2120_v44 }
0x3081   :  { %v2133_v55 = vor.u32 1.1754944e-38, %v2132_v51  ;;  %vm2131_vm12 = vcmp.eq.f32.partialorder %v2130_v53, 8.507059e+37  ;;  %v3719_v51 = vld [vmem:[%s3806_s4 + $0x1] sm:$0x1]  ;;  %v3725_v53 = vld [vmem:[%s3806_s4] sm:$0x1] }
0x3085   :  { %v3049_v46 = vpop.eup %3048 }
0x3086   :  { %v2122_v48 = vmul.f32 %v3049_v46, %v2120_v44  ;;  %vm2127_vm9 = vweird.f32 %v3049_v46 }
0x3087   :  { %vm2128_vm11 = vmor %vm2126_vm10, %vm2127_vm9 }
0x3088   :  { %v2123_v50 = vsub.f32 1.0, %v2122_v48 }
0x308a   :  { %v2124_v52 = vmul.f32 %v3049_v46, %v2123_v50 }
0x308c   :  { %v2125_v54 = vadd.f32 %v3049_v46, %v2124_v52 }
0x308e   :  { %v2129_v56 = vsel %vm2128_vm11, %v3049_v46, %v2125_v54 }
0x308f   :  { %v2134_v57 = vsel %vm2131_vm12, %v2133_v55, %v2129_v56  ;;  %v3731_v55 = vld [vmem:[%s3806_s4 + $0x2] sm:$0x1] }
0x3090   :  { %v2136_v58 = vmul.f32 2.0, %v2134_v57  ;;  %v2138_v60 = vmul.f32 %v2134_v57, %v2078_v6 }
0x3092   :  { %v2713_v20 = vadd.f32 -1.0, %v2136_v58 }
0x3094   :  { %2140 = vrot.lane.b32.xlu0 %v2713_v20, %s3128_s30 }
0x3106   :  { %v2141_v22 = vpop.permute.xlu0 %2140 }
0x3107   :  { %v2143_v59 = vmul.f32 %v2141_v22, %v2134_v57 }
0x3109   :  { %2145 = vrot.lane.b32.xlu1 %v2143_v59, %s3127_s18 }
0x317b   :  { %v2146_v25 = vpop.permute.xlu1 %2145 }
0x317c   :  { %v2148_v61 = vadd.f32 %v2146_v25, %v2138_v60  ;;  %v3743_v60 = vld [vmem:[%s3806_s4 + $0x4] sm:$0x1] }
0x317e   :  { %3050 = vtanh.f32 %v2148_v61 }
0x3184   :  { %v3051_v27 = vpop.eup %3050 }
0x3185   :  { %2151 = vrot.lane.b32.xlu2 %v3051_v27, %s3129_s8 }
0x31df   :  { %v2152_v62 = vpop.permute.xlu2 %2151 }
0x31e0   :  { %v2154_v35 = vmul.f32 %v2152_v62, %v2134_v57  ;;  %v3737_v57 = vld [vmem:[%s3806_s4 + $0x3] sm:$0x1]  ;;  %v2225_v62 = vld [vmem:[#allocation2 + $0x1b] sm:$0x1] }
0x31e2   :  { %2169 = vperm.xlu2 %2879, %v2154_v35   ;;  %2163 = vperm.xlu1 %2878, %v2154_v35  }
0x31e3   :  { %2158 = vperm.xlu0 %2874, %v2154_v35  }
0x31ea   :  { %2881 = vset.pattern.permute.xlu1 %v3133_v37 }
0x31eb   :  { %2880 = vset.pattern.permute.xlu0 %v3134_v38  ;;  %2181 = vperm.xlu1 %2881, %v2154_v35  }
0x31ec   :  { %2174 = vperm.xlu0 %2880, %v2154_v35  }
0x31f3   :  { %2883 = vset.pattern.permute.xlu1 %v3130_v32 }
0x31f4   :  { %2882 = vset.pattern.permute.xlu0 %v3131_v33 }
0x323c   :  { %v2170_v45 = vpop.permute.xlu2 %2169 }
0x323d   :  { %v2172_v3 = vmul.f32 %v3598_v15, %v2170_v45 }
0x3254   :  { %v2164_v49 = vpop.permute.xlu1 %2163 }
0x3255   :  { %v2159_v0 = vpop.permute.xlu0 %2158  ;;  %v2166_v1 = vmul.f32 %v3586_v10, %v2164_v49 }
0x3256   :  { %v2161_v2 = vmul.f32 %v3592_v12, %v2159_v0 }
0x3258   :  { %v2167_v63 = vadd.f32 %v2166_v1, %v2161_v2 }
0x325d   :  { %v2182_v4 = vpop.permute.xlu1 %2181 }
0x325e   :  { %v2175_v43 = vpop.permute.xlu0 %2174  ;;  %v2184_v6 = vmul.f32 %v3610_v24, %v2182_v4 }
0x325f   :  { %v2177_v47 = vmul.f32 %v3604_v17, %v2175_v43 }
0x3261   :  { %v2178_v5 = vadd.f32 %v2177_v47, %v2172_v3 }
0x3263   :  { %v2179_v7 = vadd.f32 %v2178_v5, %v2167_v63 }
0x3265   :  { %v2185_v8 = vadd.f32 %v2184_v6, %v2179_v7 }
0x3267   :  { %v2186_v11 = vadd.f32 %v2185_v8, %v2155_v9 }
0x3269   :  { %v2714_v13 = vmul.f32 -1.442695, %v2186_v11 }
0x326b   :  { %3052 = vpow2.f32 %v2714_v13 }
0x3271   :  { %v3053_v14 = vpop.eup %3052 }
0x3272   :  { %v2190_v10 = vadd.f32 1.0, %v3053_v14 }
0x3274   :  { %3054 = vrcp.f32 %v2190_v10  ;;  %v2202_v15 = vand.u32 2147483648, %v2190_v10  ;;  %v2200_v17 = vand.u32 2147483647, %v2190_v10  ;;  %vm2196_vm14 = vweird.f32 %v2190_v10 }
0x3276   :  { %v2203_v24 = vor.u32 1.1754944e-38, %v2202_v15  ;;  %vm2201_vm1 = vcmp.eq.f32.partialorder %v2200_v17, 8.507059e+37 }
0x327a   :  { %v3055_v12 = vpop.eup %3054 }
0x327b   :  { %v2192_v16 = vmul.f32 %v3055_v12, %v2190_v10  ;;  %vm2197_vm13 = vweird.f32 %v3055_v12 }
0x327c   :  { %vm2198_vm15 = vmor %vm2196_vm14, %vm2197_vm13  ;;  %vm2445_vm13 = vcmask 1042432   ;;  %vm2441_vm14 = vcmask 220160  }
0x327d   :  { %v2193_v18 = vsub.f32 1.0, %v2192_v16 }
0x327f   :  { %v2194_v19 = vmul.f32 %v3055_v12, %v2193_v18 }
0x3281   :  { %v2195_v21 = vadd.f32 %v3055_v12, %v2194_v19 }
0x3283   :  { %v2199_v23 = vsel %vm2198_vm15, %v3055_v12, %v2195_v21  ;;  %vm2472_vm15 = vcmask 64512  }
0x3284   :  { %v2204_v26 = vsel %vm2201_vm1, %v2203_v24, %v2199_v23 }
0x3285   :  { %v2206_v28 = vmul.f32 2.0, %v2204_v26  ;;  %v2208_v36 = vmul.f32 %v2204_v26, %v2148_v61 }
0x3287   :  { %v2715_v30 = vadd.f32 -1.0, %v2206_v28 }
0x3289   :  { %2210 = vrot.lane.b32.xlu2 %v2715_v30, %s3128_s30 }
0x32e3   :  { %v2211_v31 = vpop.permute.xlu2 %2210 }
0x32e4   :  { %v2213_v29 = vmul.f32 %v2211_v31, %v2204_v26 }
0x32e6   :  { %2215 = vrot.lane.b32.xlu1 %v2213_v29, %s3127_s18 }
0x3358   :  { %v2216_v39 = vpop.permute.xlu1 %2215 }
0x3359   :  { %v2218_v40 = vadd.f32 %v2216_v39, %v2208_v36 }
0x335b   :  { %3056 = vtanh.f32 %v2218_v40 }
0x3361   :  { %v3057_v41 = vpop.eup %3056 }
0x3362   :  { %2221 = vrot.lane.b32.xlu2 %v3057_v41, %s3129_s8 }
0x33bc   :  { %v2222_v42 = vpop.permute.xlu2 %2221 }
0x33bd   :  { %v2224_v44 = vmul.f32 %v2222_v42, %v2204_v26 }
0x33bf   :  { %2239 = vperm.xlu2 %2879, %v2224_v44   ;;  %2233 = vperm.xlu1 %2883, %v2224_v44  }
0x33c0   :  { %2228 = vperm.xlu0 %2882, %v2224_v44  }
0x33c7   :  { %2885 = vset.pattern.permute.xlu2 %v3133_v37  ;;  %2884 = vset.pattern.permute.xlu1 %v3134_v38 }
0x33c8   :  { %2251 = vperm.xlu2 %2885, %v2224_v44   ;;  %2244 = vperm.xlu1 %2884, %v2224_v44  }
0x33d0   :  { %2887 = vset.pattern.permute.xlu2 %v3132_v34  ;;  %2886 = vset.pattern.permute.xlu1 %v3130_v32 }
0x3419   :  { %v2240_v48 = vpop.permute.xlu2 %2239 }
0x341a   :  { %v2242_v56 = vmul.f32 %v3731_v55, %v2240_v48 }
0x3422   :  { %v2252_v20 = vpop.permute.xlu2 %2251 }
0x3423   :  { %v2254_v25 = vmul.f32 %v3743_v60, %v2252_v20 }
0x3431   :  { %v2234_v46 = vpop.permute.xlu1 %2233 }
0x3432   :  { %v2229_v50 = vpop.permute.xlu0 %2228  ;;  %v2236_v52 = vmul.f32 %v3719_v51, %v2234_v46 }
0x3433   :  { %v2231_v54 = vmul.f32 %v3725_v53, %v2229_v50 }
0x3435   :  { %v2237_v22 = vadd.f32 %v2236_v52, %v2231_v54 }
0x343a   :  { %v2245_v34 = vpop.permute.xlu1 %2244 }
0x343b   :  { %v2247_v58 = vmul.f32 %v3737_v57, %v2245_v34 }
0x343d   :  { %v2248_v59 = vadd.f32 %v2247_v58, %v2242_v56 }
0x343f   :  { %v2249_v61 = vadd.f32 %v2248_v59, %v2237_v22 }
0x3441   :  { %v2255_v27 = vadd.f32 %v2254_v25, %v2249_v61 }
0x3443   :  { %v2256_v35 = vadd.f32 %v2255_v27, %v2225_v62 }
0x3445   :  { %v2716_v0 = vmul.f32 -1.442695, %v2256_v35 }
0x3447   :  { %3058 = vpow2.f32 %v2716_v0 }
0x344d   :  { %v3059_v49 = vpop.eup %3058 }
0x344e   :  { %v2260_v45 = vadd.f32 1.0, %v3059_v49 }
0x3450   :  { %3060 = vrcp.f32 %v2260_v45  ;;  %v2272_v3 = vand.u32 2147483648, %v2260_v45  ;;  %v2270_v4 = vand.u32 2147483647, %v2260_v45  ;;  %vm2266_vm3 = vweird.f32 %v2260_v45 }
0x3452   :  { %v2273_v5 = vor.u32 1.1754944e-38, %v2272_v3  ;;  %vm2271_vm5 = vcmp.eq.f32.partialorder %v2270_v4, 8.507059e+37 }
0x3456   :  { %v3061_v1 = vpop.eup %3060 }
0x3457   :  { %v2262_v2 = vmul.f32 %v3061_v1, %v2260_v45  ;;  %vm2267_vm2 = vweird.f32 %v3061_v1 }
0x3458   :  { %vm2268_vm4 = vmor %vm2266_vm3, %vm2267_vm2 }
0x3459   :  { %v2263_v43 = vsub.f32 1.0, %v2262_v2 }
0x345b   :  { %v2264_v47 = vmul.f32 %v3061_v1, %v2263_v43 }
0x345d   :  { %v2265_v63 = vadd.f32 %v3061_v1, %v2264_v47 }
0x345f   :  { %v2269_v6 = vsel %vm2268_vm4, %v3061_v1, %v2265_v63 }
0x3460   :  { %v2274_v7 = vsel %vm2271_vm5, %v2273_v5, %v2269_v6  ;;  %vm2518_vm5 = vcmask 253952  }
0x3461   :  { %v2276_v8 = vmul.f32 2.0, %v2274_v7  ;;  %v2278_v14 = vmul.f32 %v2274_v7, %v2218_v40 }
0x3463   :  { %v2717_v9 = vadd.f32 -1.0, %v2276_v8 }
0x3465   :  { %2280 = vrot.lane.b32.xlu0 %v2717_v9, %s3128_s30 }
0x34d7   :  { %v2281_v11 = vpop.permute.xlu0 %2280 }
0x34d8   :  { %v2283_v13 = vmul.f32 %v2281_v11, %v2274_v7 }
0x34da   :  { %2285 = vrot.lane.b32.xlu1 %v2283_v13, %s3127_s18 }
0x354c   :  { %v2286_v10 = vpop.permute.xlu1 %2285 }
0x354d   :  { %v2288_v12 = vadd.f32 %v2286_v10, %v2278_v14 }
0x354f   :  { %3062 = vtanh.f32 %v2288_v12 }
0x3555   :  { %v3063_v16 = vpop.eup %3062 }
0x3556   :  { %2291 = vrot.lane.b32.xlu2 %v3063_v16, %s3129_s8 }
0x35b0   :  { %v2292_v18 = vpop.permute.xlu2 %2291 }
0x35b1   :  { %v2294_v15 = vmul.f32 %v2292_v18, %v2274_v7 }
0x35b3   :  { %2309 = vperm.xlu2 %2887, %v2294_v15   ;;  %2303 = vperm.xlu1 %2886, %v2294_v15  }
0x35b4   :  { %2298 = vperm.xlu0 %2882, %v2294_v15  }
0x35bb   :  { %2889 = vset.pattern.permute.xlu1 %v3133_v37 }
0x35bc   :  { %2888 = vset.pattern.permute.xlu0 %v3134_v38  ;;  %2321 = vperm.xlu1 %2889, %v2294_v15  }
0x35bd   :  { %2314 = vperm.xlu0 %2888, %v2294_v15  }
0x35c4   :  { %2891 = vset.pattern.permute.xlu1 %v3130_v32 }
0x35c5   :  { %2890 = vset.pattern.permute.xlu0 %v3131_v33  ;;  %v2295_v33 = vld [vmem:[#allocation2 + $0x1c] sm:$0x1] }
0x360d   :  { %v2310_v21 = vpop.permute.xlu2 %2309 }
0x360e   :  { %v2312_v28 = vmul.f32 %v3731_v55, %v2310_v21 }
0x3625   :  { %v2304_v17 = vpop.permute.xlu1 %2303 }
0x3626   :  { %v2299_v19 = vpop.permute.xlu0 %2298  ;;  %v2306_v24 = vmul.f32 %v3719_v51, %v2304_v17 }
0x3627   :  { %v2301_v23 = vmul.f32 %v3725_v53, %v2299_v19 }
0x3629   :  { %v2307_v29 = vadd.f32 %v2306_v24, %v2301_v23 }
0x362e   :  { %v2322_v31 = vpop.permute.xlu1 %2321 }
0x362f   :  { %v2315_v26 = vpop.permute.xlu0 %2314  ;;  %v2324_v39 = vmul.f32 %v3743_v60, %v2322_v31 }
0x3630   :  { %v2317_v30 = vmul.f32 %v3737_v57, %v2315_v26 }
0x3632   :  { %v2318_v36 = vadd.f32 %v2317_v30, %v2312_v28 }
0x3634   :  { %v2319_v32 = vadd.f32 %v2318_v36, %v2307_v29 }
0x3636   :  { %v2325_v40 = vadd.f32 %v2324_v39, %v2319_v32  ;;  %v2440_v32 = vld [vmem:[%s3807_s5 + $0x20] sm:$0x7] }
0x3637   :  { %2722 = vmatpush.msk.msra.mxu3 %vm2445_vm13, %v2440_v32 }
0x3638   :  { %v2326_v41 = vadd.f32 %v2325_v40, %v2295_v33  ;;  %v2439_v40 = vld [vmem:[%s3807_s5 + $0x18] sm:$0xff]  ;;  %v2438_v33 = vld [vmem:[%s3807_s5 + $0x10] sm:$0xff] }
0x3639   :  { %2462 = vmatpush.msra.mxu3 %v2439_v40 }
0x363a   :  { %v2718_v42 = vmul.f32 -1.442695, %v2326_v41  ;;  %v2437_v41 = vld [vmem:[%s3807_s5 + $0x8] sm:$0xff] }
0x363b   :  { %2463 = vmatpush.msra.mxu3 %v2438_v33 }
0x363c   :  { %3064 = vpow2.f32 %v2718_v42  ;;  %v2436_v42 = vld [vmem:[%s3803_s1] sm:$0x1] }
0x363d   :  { %2464 = vmatpush.msra.mxu3 %v2437_v41 }
0x363e   :  { %2723 = vmatmul.msk.f32.vlgmr.msra.gmra.mxu3 %vm2441_vm14, %v2436_v42 }
0x3642   :  { %v3065_v44 = vpop.eup %3064 }
0x3643   :  { %v2330_v46 = vadd.f32 1.0, %v3065_v44  ;;  %v2435_v44 = vld [vmem:[%s3807_s5] sm:$0xff] }
0x3644   :  { %2490 = vmatpush.msrb.mxu3 %v2435_v44 }
0x3645   :  { %3066 = vrcp.f32 %v2330_v46  ;;  %v2342_v54 = vand.u32 2147483648, %v2330_v46  ;;  %v2340_v56 = vand.u32 2147483647, %v2330_v46  ;;  %vm2336_vm6 = vweird.f32 %v2330_v46 }
0x3647   :  { %v2343_v20 = vor.u32 1.1754944e-38, %v2342_v54  ;;  %vm2341_vm8 = vcmp.eq.f32.partialorder %v2340_v56, 8.507059e+37 }
0x364b   :  { %v3067_v48 = vpop.eup %3066 }
0x364c   :  { %v2332_v50 = vmul.f32 %v3067_v48, %v2330_v46  ;;  %vm2337_vm0 = vweird.f32 %v3067_v48 }
0x364d   :  { %vm2338_vm7 = vmor %vm2336_vm6, %vm2337_vm0  ;;  %vm2524_vm0 = vcmask 0  }
0x364e   :  { %v2333_v52 = vsub.f32 1.0, %v2332_v50 }
0x3650   :  { %v2334_v34 = vmul.f32 %v3067_v48, %v2333_v52 }
0x3652   :  { %v2335_v58 = vadd.f32 %v3067_v48, %v2334_v34  ;;  %v2495_v34 = vld [vmem:[%s3808_s6 + $0x1] sm:$0x1] }
0x3654   :  { %v2339_v22 = vsel %vm2338_vm7, %v3067_v48, %v2335_v58 }
0x3655   :  { %v2344_v59 = vsel %vm2341_vm8, %v2343_v20, %v2339_v22 }
0x3656   :  { %v2346_v25 = vmul.f32 2.0, %v2344_v59  ;;  %v2348_v35 = vmul.f32 %v2344_v59, %v2288_v12 }
0x3658   :  { %v2719_v61 = vadd.f32 -1.0, %v2346_v25 }
0x365a   :  { %2350 = vrot.lane.b32.xlu2 %v2719_v61, %s3128_s30 }
0x36b4   :  { %v2351_v27 = vpop.permute.xlu2 %2350 }
0x36b5   :  { %v2353_v62 = vmul.f32 %v2351_v27, %v2344_v59 }
0x36b7   :  { %2355 = vrot.lane.b32.xlu1 %v2353_v62, %s3127_s18 }
0x36c1   :  { %v2466_v52 = vpop.f32.mrf.mxu3 }
0x3729   :  { %v2356_v0 = vpop.permute.xlu1 %2355 }
0x372a   :  { %v2358_v49 = vadd.f32 %v2356_v0, %v2348_v35 }
0x372c   :  { %3068 = vtanh.f32 %v2358_v49 }
0x3732   :  { %v3069_v45 = vpop.eup %3068 }
0x3733   :  { %2361 = vrot.lane.b32.xlu2 %v3069_v45, %s3129_s8 }
0x378d   :  { %v2362_v1 = vpop.permute.xlu2 %2361 }
0x378e   :  { %v2364_v2 = vmul.f32 %v2362_v1, %v2344_v59  ;;  %v2516_v1 = vld [vmem:[%s3808_s6 + $0x2] sm:$0x1] }
0x3790   :  { %2379 = vperm.xlu2 %2887, %v2364_v2   ;;  %2373 = vperm.xlu1 %2891, %v2364_v2  }
0x3791   :  { %2368 = vperm.xlu0 %2890, %v2364_v2  }
0x3798   :  { %2893 = vset.pattern.permute.xlu2 %v3133_v37  ;;  %2892 = vset.pattern.permute.xlu1 %v3134_v38 }
0x3799   :  { %2391 = vperm.xlu2 %2893, %v2364_v2   ;;  %2384 = vperm.xlu1 %2892, %v2364_v2  }
0x379a   :  { %2894 = vset.pattern.permute.xlu0 %v3133_v37  ;;  %v2365_v37 = vld [vmem:[#allocation2 + $0x1d] sm:$0x1] }
0x37ea   :  { %v2380_v3 = vpop.permute.xlu2 %2379 }
0x37eb   :  { %v2382_v6 = vmul.f32 %v3731_v55, %v2380_v3 }
0x37f3   :  { %v2392_v8 = vpop.permute.xlu2 %2391 }
0x37f4   :  { %v2394_v38 = vmul.f32 %v3743_v60, %v2392_v8 }
0x3802   :  { %v2374_v43 = vpop.permute.xlu1 %2373 }
0x3803   :  { %v2369_v47 = vpop.permute.xlu0 %2368  ;;  %v2376_v4 = vmul.f32 %v3719_v51, %v2374_v43 }
0x3804   :  { %v2371_v63 = vmul.f32 %v3725_v53, %v2369_v47 }
0x3806   :  { %v2377_v9 = vadd.f32 %v2376_v4, %v2371_v63  ;;  %v2522_v4 = vld [vmem:[%s3808_s6 + $0x3] sm:$0x1] }
0x380b   :  { %v2385_v5 = vpop.permute.xlu1 %2384 }
0x380c   :  { %v2387_v7 = vmul.f32 %v3737_v57, %v2385_v5 }
0x380e   :  { %v2388_v11 = vadd.f32 %v2387_v7, %v2382_v6 }
0x3810   :  { %v2389_v13 = vadd.f32 %v2388_v11, %v2377_v9 }
0x3812   :  { %v2395_v14 = vadd.f32 %v2394_v38, %v2389_v13 }
0x3814   :  { %v2396_v10 = vadd.f32 %v2395_v14, %v2365_v37 }
0x3816   :  { %v2720_v12 = vmul.f32 -1.442695, %v2396_v10 }
0x3818   :  { %3070 = vpow2.f32 %v2720_v12 }
0x381e   :  { %v3071_v16 = vpop.eup %3070 }
0x381f   :  { %v2400_v51 = vadd.f32 1.0, %v3071_v16 }
0x3821   :  { %3072 = vrcp.f32 %v2400_v51  ;;  %v2412_v55 = vand.u32 2147483648, %v2400_v51  ;;  %v2410_v57 = vand.u32 2147483647, %v2400_v51  ;;  %vm2406_vm10 = vweird.f32 %v2400_v51 }
0x3823   :  { %v2413_v60 = vor.u32 1.1754944e-38, %v2412_v55  ;;  %vm2411_vm12 = vcmp.eq.f32.partialorder %v2410_v57, 8.507059e+37 }
0x3827   :  { %v3073_v53 = vpop.eup %3072 }
0x3828   :  { %v2402_v18 = vmul.f32 %v3073_v53, %v2400_v51  ;;  %vm2407_vm9 = vweird.f32 %v3073_v53 }
0x3829   :  { %vm2408_vm11 = vmor %vm2406_vm10, %vm2407_vm9 }
0x382a   :  { %v2403_v15 = vsub.f32 1.0, %v2402_v18 }
0x382c   :  { %v2404_v19 = vmul.f32 %v3073_v53, %v2403_v15 }
0x382e   :  { %v2405_v17 = vadd.f32 %v3073_v53, %v2404_v19 }
0x3830   :  { %v2409_v21 = vsel %vm2408_vm11, %v3073_v53, %v2405_v17 }
0x3831   :  { %v2414_v24 = vsel %vm2411_vm12, %v2413_v60, %v2409_v21 }
0x3832   :  { %v2416_v23 = vmul.f32 2.0, %v2414_v24  ;;  %v2418_v31 = vmul.f32 %v2414_v24, %v2358_v49 }
0x3834   :  { %v2721_v26 = vadd.f32 -1.0, %v2416_v23 }
0x3836   :  { %2420 = vrot.lane.b32.xlu0 %v2721_v26, %s3128_s30 }
0x38a8   :  { %v2421_v28 = vpop.permute.xlu0 %2420 }
0x38a9   :  { %v2423_v30 = vmul.f32 %v2421_v28, %v2414_v24 }
0x38ab   :  { %2425 = vrot.lane.b32.xlu1 %v2423_v30, %s3127_s18 }
0x391d   :  { %v2426_v29 = vpop.permute.xlu1 %2425 }
0x391e   :  { %v2428_v36 = vadd.f32 %v2426_v29, %v2418_v31 }
0x3920   :  { %3074 = vtanh.f32 %v2428_v36 }
0x3926   :  { %v3075_v39 = vpop.eup %3074 }
0x3927   :  { %2431 = vrot.lane.b32.xlu2 %v3075_v39, %s3129_s8 }
0x3981   :  { %v2432_v46 = vpop.permute.xlu2 %2431 }
0x3982   :  { %v2434_v48 = vmul.f32 %v2432_v46, %v2414_v24 }
0x3984   :  { %2470 = vrot.lane.b32.xlu0 %v2434_v48, %s3135_s2 }
0x39f6   :  { %v2471_v50 = vpop.permute.xlu0 %2470 }
0x39f7   :  { %2724 = vmatmul.msk.f32.vlgmr.msrb.gmra.mxu3 %vm2472_vm15, %v2471_v50 }
0x3a7a   :  { %v2492_v54 = vpop.f32.mrf.mxu3 }
0x3a7b   :  { %v2493_v56 = vadd.f32 %v2492_v54, %v2466_v52 }
0x3a7d   :  { %v2496_v58 = vadd.f32 %v2495_v34, %v2493_v56 }
0x3a7f   :  { %v2725_v20 = vmul.f32 -1.442695, %v2496_v58 }
0x3a81   :  { %3076 = vpow2.f32 %v2725_v20 }
0x3a87   :  { %v3077_v22 = vpop.eup %3076 }
0x3a88   :  { %v2500_v59 = vadd.f32 1.0, %v3077_v22 }
0x3a8a   :  { %3078 = vrcp.f32 %v2500_v59  ;;  %v2512_v62 = vand.u32 2147483648, %v2500_v59  ;;  %v2510_v0 = vand.u32 2147483647, %v2500_v59  ;;  %vm2506_vm2 = vweird.f32 %v2500_v59 }
0x3a8c   :  { %v2513_v45 = vor.u32 1.1754944e-38, %v2512_v62  ;;  %vm2511_vm4 = vcmp.eq.f32.partialorder %v2510_v0, 8.507059e+37 }
0x3a90   :  { %v3079_v25 = vpop.eup %3078 }
0x3a91   :  { %v2502_v61 = vmul.f32 %v3079_v25, %v2500_v59  ;;  %vm2507_vm1 = vweird.f32 %v3079_v25 }
0x3a92   :  { %vm2508_vm3 = vmor %vm2506_vm2, %vm2507_vm1 }
0x3a93   :  { %v2503_v27 = vsub.f32 1.0, %v2502_v61 }
0x3a95   :  { %v2504_v35 = vmul.f32 %v3079_v25, %v2503_v27 }
0x3a97   :  { %v2505_v49 = vadd.f32 %v3079_v25, %v2504_v35 }
0x3a99   :  { %v2509_v2 = vsel %vm2508_vm3, %v3079_v25, %v2505_v49 }
0x3a9a   :  { %v2514_v43 = vsel %vm2511_vm4, %v2513_v45, %v2509_v2 }
0x3a9b   :  { %v2517_v3 = vmul.f32 %v2516_v1, %v2514_v43 }
0x3a9d   :  { %v2519_v47 = vsel %vm2518_vm5, %v2517_v3, 0.0 }
0x3a9e   :  { %2520 = vadd.xlane.f32.xlu1 %v2519_v47 }
0x3b11   :  { %v2521_v63 = vpop.xlane.xlu1 %2520 }
0x3b12   :  { %v2523_v5 = vadd.f32 %v2522_v4, %v2521_v63 }
0x3b14   :  { %2525 = vst.msk [vmem:[#allocation3] sm:$0x1] %vm2524_vm0, %v2523_v5 }
0x3b15   :  { %2536 = dma.vmem_to_hbm [thread:$0]  %s2532_s20, 16, %s2534_s23, [#allocation4]  }
0x3b16   :  { %3120 = dma.done.wait [#allocation4], 16  }
0x3b17   :  { %3121 = vsyncadd [#allocation4], 4294967280 }
0x3b18   :  { %2541 = vsyncpa [#allocation4], 1 }

</bundles_post_ra>
